<compile_context>
chip_gen: v7x
topology: tpu7x:2x2x1
jax: 0.10.0
libtpu: 0.0.40
codegen_flags: <defaults>
</compile_context>

<pallas_src>
import jax
import jax.numpy as jnp
from jax.experimental import pallas as pl

# ---- small demo shapes (consistent with the module's forward) ----
E = 32          # embeddings_dim (1024 in the original defaults)
L = 16          # sequence length
B = 4           # batch
K = 9           # conv kernel_size
PAD = K // 2
KE = K * E
LA_HID = 32     # hidden dim of LightAttention.linear
LA_OUT = 128    # LightAttention output dim used by LA_MLP_*
FF1 = 1280
FF2 = 640
OUT_DIM = 2     # final output dim
BN_EPS = 1e-5
LRELU = 0.1     # torch.nn.LeakyReLU(0.1) in the FFNN


# ---------------------------------------------------------------------------
# Single fused kernel: im2col conv (feature+attention) -> softmax-attention
# pooling + max pooling -> folded MLP head.  Everything resident in VMEM.
# ---------------------------------------------------------------------------
def fused_kernel(xcol_ref, wcat_ref, bcat_ref,
                 w1_ref, b1_ref, wfold_ref, bfold_ref,
                 wf2_ref, bf2_ref, wf3_ref, bf3_ref, out_ref):
    # xcol_ref : (B*L, K*E)  bf16 im2col of the zero-padded sequence
    # wcat_ref : (K*E, 2E)   bf16, feature|attention conv weights concatenated
    # bcat_ref : (1, 2E)     f32 biases [bf | ba]
    # w1/b1    : Linear(2E, 32)
    # wfold/bfold : BN-folded Linear(32,128) @ Linear(128,1280)  -> (32, 1280)
    # wf2/bf2  : Linear(1280, 640)
    # wf3/bf3  : Linear(640, OUT_DIM)
    # out_ref  : (B, OUT_DIM)

    # One MXU matmul for both convs over the whole batch: (B*L, 2E), f32 accum.
    fa = jnp.dot(xcol_ref[...], wcat_ref[...],
                 preferred_element_type=jnp.float32) + bcat_ref[...]

    # Per-batch attention pooling (static loop; row slices at multiples of 8).
    pooled_rows = []
    for b in range(B):
        fab = fa[b * L:(b + 1) * L, :]          # (L, 2E)
        feat = fab[:, 0:E]                      # (L, E)
        attn = fab[:, E:2 * E]                  # (L, E)
        # softmax over the sequence axis (torch softmax(dim=-1) on [B, E, L])
        attn = attn - jnp.max(attn, axis=0, keepdims=True)
        p = jnp.exp(attn)
        p = p * pl.reciprocal(jnp.sum(p, axis=0, keepdims=True), approx=True)
        o1 = jnp.sum(feat * p, axis=0, keepdims=True)   # (1, E)
        o2 = jnp.max(feat, axis=0, keepdims=True)       # (1, E)
        pooled_rows.append(jnp.concatenate([o1, o2], axis=-1))  # (1, 2E)
    pooled = jnp.concatenate(pooled_rows, axis=0)        # (B, 2E), stays in VMEM

    # MLP head: Linear(2E,32) -> ReLU -> [BN + Linear(32,128) + Linear(128,1280)
    # folded into one (32,1280) matmul] -> LeakyReLU -> Linear(1280,640)
    # -> LeakyReLU -> Linear(640, OUT_DIM).
    h = jnp.dot(pooled, w1_ref[...], preferred_element_type=jnp.float32) + b1_ref[...]
    h = jnp.maximum(h, 0.0)                              # ReLU (Dropout = identity)
    h = jnp.dot(h.astype(jnp.bfloat16), wfold_ref[...],
                preferred_element_type=jnp.float32) + bfold_ref[...]   # (B, 1280)
    h = jnp.where(h > 0, h, LRELU * h)
    h = jnp.dot(h.astype(jnp.bfloat16), wf2_ref[...],
                preferred_element_type=jnp.float32) + bf2_ref[...]     # (B, 640)
    h = jnp.where(h > 0, h, LRELU * h)
    h = jnp.dot(h, wf3_ref[...], preferred_element_type=jnp.float32) + bf3_ref[...]
    out_ref[...] = h


# ---------------------------------------------------------------------------
# Wrapper: im2col on the host/XLA side, one pallas_call, full arrays in VMEM.
# (At the real E=1024 the conv weight would need a contraction-tile grid axis
#  and/or a higher vmem_limit_bytes; unnecessary at these demo shapes.)
# ---------------------------------------------------------------------------
@jax.jit
def forward(x, fp):
    # x: (B, L, E).  Zero pad = Conv1d padding=k//2.
    xpad = jnp.pad(x, ((0, 0), (PAD, PAD), (0, 0)))            # (B, L+2*PAD, E)
    # im2col: xcol[b, l, k*E + e] = xpad[b, l + k, e]
    xcol = jnp.concatenate([xpad[:, k:k + L, :] for k in range(K)], axis=-1)
    xcol = xcol.reshape(B * L, KE).astype(jnp.bfloat16)        # (B*L, K*E)
    return pl.pallas_call(
        fused_kernel,
        out_shape=jax.ShapeDtypeStruct((B, OUT_DIM), jnp.float32),
    )(xcol, fp["wcat"], fp["bcat"], fp["w1"], fp["b1"],
      fp["wfold"], fp["bfold"], fp["wf2"], fp["bf2"], fp["wf3"], fp["bf3"])


# ---------------------------------------------------------------------------
# Parameter construction + host-side eval-mode folding
# ---------------------------------------------------------------------------
def init_params(key):
    ks = jax.random.split(key, 20)
    n = lambda k, shp, s=0.05: (jax.random.normal(k, shp, jnp.float32) * s)
    return {
        # LightAttention convs (weights stored [k, in, out], i.e. W[:, :, k].T)
        "wf": n(ks[0], (K, E, E)), "bf": n(ks[1], (1, E)),
        "wa": n(ks[2], (K, E, E)), "ba": n(ks[3], (1, E)),
        # LightAttention.linear: Linear(2E, 32) + BatchNorm1d(32)
        "w1": n(ks[4], (2 * E, LA_HID)), "b1": n(ks[5], (1, LA_HID)),
        "bn_gamma": 1.0 + n(ks[6], (1, LA_HID)),
        "bn_beta": n(ks[7], (1, LA_HID)),
        "bn_mean": n(ks[8], (1, LA_HID)),
        "bn_var": 1.0 + jnp.abs(n(ks[9], (1, LA_HID))),
        # LightAttention.output: Linear(32, 128)
        "wo": n(ks[10], (LA_HID, LA_OUT)), "bo": n(ks[11], (1, LA_OUT)),
        # FFNN of LA_MLP_AvgTaskVect_extra
        "wf1": n(ks[12], (LA_OUT, FF1)), "bf1": n(ks[13], (1, FF1)),
        "wf2": n(ks[14], (FF1, FF2)),    "bf2": n(ks[15], (1, FF2)),
        "wf3": n(ks[16], (FF2, OUT_DIM)), "bf3": n(ks[17], (1, OUT_DIM)),
    }


def fold_params(p):
    """Eval-mode algebraic folding + layout prep for the fused kernel."""
    # BatchNorm1d (running stats) -> affine: y = x*scale + shift
    scale = p["bn_gamma"] * jax.lax.rsqrt(p["bn_var"] + BN_EPS)   # (1, 32)
    shift = p["bn_beta"] - p["bn_mean"] * scale                   # (1, 32)
    # No nonlinearity between Linear(32,128) and Linear(128,1280): pre-multiply,
    # then fold the BN affine into the combined weight/bias.
    w_of = p["wo"] @ p["wf1"]                                     # (32, 1280)
    wfold = scale.reshape(LA_HID, 1) * w_of                       # (32, 1280)
    bfold = shift @ w_of + p["bo"] @ p["wf1"] + p["bf1"]          # (1, 1280)
    # Concatenate feature/attention conv weights -> single im2col weight.
    wcat = jnp.concatenate([p["wf"].reshape(KE, E),
                            p["wa"].reshape(KE, E)], axis=-1)     # (K*E, 2E)
    bcat = jnp.concatenate([p["bf"], p["ba"]], axis=-1)           # (1, 2E)
    return {
        "wcat": wcat.astype(jnp.bfloat16), "bcat": bcat,
        "w1": p["w1"], "b1": p["b1"],
        "wfold": wfold.astype(jnp.bfloat16), "bfold": bfold,
        "wf2": p["wf2"].astype(jnp.bfloat16), "bf2": p["bf2"],
        "wf3": p["wf3"], "bf3": p["bf3"],
    }


if __name__ == "__main__":
    key = jax.random.PRNGKey(0)
    k_x, k_p = jax.random.split(key)
    x = jax.random.normal(k_x, (B, L, E), jnp.float32)
    params = fold_params(init_params(k_p))

    out = forward(x, params)
    out = jax.block_until_ready(out)
    assert out.shape == (B, OUT_DIM), out.shape
    assert bool(jnp.all(jnp.isfinite(out)))
    print("KERNEL_OK")
</pallas_src>

<mosaic_0001>
module attributes {stable_mosaic.version = 11 : i64} {
  func.func @fused_kernel(%arg0: memref<64x288xbf16, #tpu.memory_space<vmem>>, %arg1: memref<288x64xbf16, #tpu.memory_space<vmem>>, %arg2: memref<1x64xf32, #tpu.memory_space<vmem>>, %arg3: memref<64x32xf32, #tpu.memory_space<vmem>>, %arg4: memref<1x32xf32, #tpu.memory_space<vmem>>, %arg5: memref<32x1280xbf16, #tpu.memory_space<vmem>>, %arg6: memref<1x1280xf32, #tpu.memory_space<vmem>>, %arg7: memref<1280x640xbf16, #tpu.memory_space<vmem>>, %arg8: memref<1x640xf32, #tpu.memory_space<vmem>>, %arg9: memref<640x2xf32, #tpu.memory_space<vmem>>, %arg10: memref<1x2xf32, #tpu.memory_space<vmem>>, %arg11: memref<4x2xf32, #tpu.memory_space<vmem>>) attributes {dimension_semantics = [], scalar_prefetch = 0 : i64, scratch_operands = 0 : i64, tpu.core_type = #tpu.core_type<tc>} {
    %c0 = arith.constant 0 : index
    %c0_0 = arith.constant 0 : index
    %0 = vector.load %arg0[%c0, %c0_0] : memref<64x288xbf16, #tpu.memory_space<vmem>>, vector<64x288xbf16>
    %c0_1 = arith.constant 0 : index
    %c0_2 = arith.constant 0 : index
    %1 = vector.load %arg1[%c0_1, %c0_2] : memref<288x64xbf16, #tpu.memory_space<vmem>>, vector<288x64xbf16>
    %cst = arith.constant dense<0.000000e+00> : vector<64x64xf32>
    %2 = tpu.matmul %0, %1, %cst {dimension_numbers = #tpu.dot_dimension_numbers<[1], [0], [0], [1], [0, 0, 1, 1], [], []>} : vector<64x288xbf16>, vector<288x64xbf16>, vector<64x64xf32> -> vector<64x64xf32>
    %c0_3 = arith.constant 0 : index
    %c0_4 = arith.constant 0 : index
    %3 = vector.load %arg2[%c0_3, %c0_4] : memref<1x64xf32, #tpu.memory_space<vmem>>, vector<1x64xf32>
    %4 = vector.broadcast %3 : vector<1x64xf32> to vector<64x64xf32>
    %5 = arith.addf %2, %4 : vector<64x64xf32>
    %6 = vector.extract_strided_slice %5 {offsets = [0, 0], sizes = [16, 64], strides = [1, 1]} : vector<64x64xf32> to vector<16x64xf32>
    %7 = vector.extract_strided_slice %6 {offsets = [0, 0], sizes = [16, 32], strides = [1, 1]} : vector<16x64xf32> to vector<16x32xf32>
    %8 = vector.extract_strided_slice %6 {offsets = [0, 32], sizes = [16, 32], strides = [1, 1]} : vector<16x64xf32> to vector<16x32xf32>
    %cst_5 = arith.constant dense<0xFF800000> : vector<32xf32>
    %9 = vector.multi_reduction <maximumf>, %8, %cst_5 [0] : vector<16x32xf32> to vector<32xf32>
    %10 = vector.shape_cast %9 : vector<32xf32> to vector<1x32xf32>
    %11 = vector.broadcast %10 : vector<1x32xf32> to vector<16x32xf32>
    %12 = arith.subf %8, %11 : vector<16x32xf32>
    %13 = math.exp %12 : vector<16x32xf32>
    %cst_6 = arith.constant dense<0.000000e+00> : vector<32xf32>
    %14 = vector.multi_reduction <add>, %13, %cst_6 [0] : vector<16x32xf32> to vector<32xf32>
    %15 = vector.shape_cast %14 : vector<32xf32> to vector<1x32xf32>
    %16 = tpu.reciprocal %15 {approx = true} : vector<1x32xf32> -> vector<1x32xf32>
    %17 = vector.broadcast %16 : vector<1x32xf32> to vector<16x32xf32>
    %18 = arith.mulf %13, %17 : vector<16x32xf32>
    %19 = arith.mulf %7, %18 : vector<16x32xf32>
    %cst_7 = arith.constant dense<0.000000e+00> : vector<32xf32>
    %20 = vector.multi_reduction <add>, %19, %cst_7 [0] : vector<16x32xf32> to vector<32xf32>
    %21 = vector.shape_cast %20 : vector<32xf32> to vector<1x32xf32>
    %cst_8 = arith.constant dense<0xFF800000> : vector<32xf32>
    %22 = vector.multi_reduction <maximumf>, %7, %cst_8 [0] : vector<16x32xf32> to vector<32xf32>
    %23 = vector.shape_cast %22 : vector<32xf32> to vector<1x32xf32>
    %24 = tpu.concatenate %21, %23 in 1 : vector<1x32xf32>, vector<1x32xf32> -> vector<1x64xf32>
    %25 = vector.extract_strided_slice %5 {offsets = [16, 0], sizes = [16, 64], strides = [1, 1]} : vector<64x64xf32> to vector<16x64xf32>
    %26 = vector.extract_strided_slice %25 {offsets = [0, 0], sizes = [16, 32], strides = [1, 1]} : vector<16x64xf32> to vector<16x32xf32>
    %27 = vector.extract_strided_slice %25 {offsets = [0, 32], sizes = [16, 32], strides = [1, 1]} : vector<16x64xf32> to vector<16x32xf32>
    %cst_9 = arith.constant dense<0xFF800000> : vector<32xf32>
    %28 = vector.multi_reduction <maximumf>, %27, %cst_9 [0] : vector<16x32xf32> to vector<32xf32>
    %29 = vector.shape_cast %28 : vector<32xf32> to vector<1x32xf32>
    %30 = vector.broadcast %29 : vector<1x32xf32> to vector<16x32xf32>
    %31 = arith.subf %27, %30 : vector<16x32xf32>
    %32 = math.exp %31 : vector<16x32xf32>
    %cst_10 = arith.constant dense<0.000000e+00> : vector<32xf32>
    %33 = vector.multi_reduction <add>, %32, %cst_10 [0] : vector<16x32xf32> to vector<32xf32>
    %34 = vector.shape_cast %33 : vector<32xf32> to vector<1x32xf32>
    %35 = tpu.reciprocal %34 {approx = true} : vector<1x32xf32> -> vector<1x32xf32>
    %36 = vector.broadcast %35 : vector<1x32xf32> to vector<16x32xf32>
    %37 = arith.mulf %32, %36 : vector<16x32xf32>
    %38 = arith.mulf %26, %37 : vector<16x32xf32>
    %cst_11 = arith.constant dense<0.000000e+00> : vector<32xf32>
    %39 = vector.multi_reduction <add>, %38, %cst_11 [0] : vector<16x32xf32> to vector<32xf32>
    %40 = vector.shape_cast %39 : vector<32xf32> to vector<1x32xf32>
    %cst_12 = arith.constant dense<0xFF800000> : vector<32xf32>
    %41 = vector.multi_reduction <maximumf>, %26, %cst_12 [0] : vector<16x32xf32> to vector<32xf32>
    %42 = vector.shape_cast %41 : vector<32xf32> to vector<1x32xf32>
    %43 = tpu.concatenate %40, %42 in 1 : vector<1x32xf32>, vector<1x32xf32> -> vector<1x64xf32>
    %44 = vector.extract_strided_slice %5 {offsets = [32, 0], sizes = [16, 64], strides = [1, 1]} : vector<64x64xf32> to vector<16x64xf32>
    %45 = vector.extract_strided_slice %44 {offsets = [0, 0], sizes = [16, 32], strides = [1, 1]} : vector<16x64xf32> to vector<16x32xf32>
    %46 = vector.extract_strided_slice %44 {offsets = [0, 32], sizes = [16, 32], strides = [1, 1]} : vector<16x64xf32> to vector<16x32xf32>
    %cst_13 = arith.constant dense<0xFF800000> : vector<32xf32>
    %47 = vector.multi_reduction <maximumf>, %46, %cst_13 [0] : vector<16x32xf32> to vector<32xf32>
    %48 = vector.shape_cast %47 : vector<32xf32> to vector<1x32xf32>
    %49 = vector.broadcast %48 : vector<1x32xf32> to vector<16x32xf32>
    %50 = arith.subf %46, %49 : vector<16x32xf32>
    %51 = math.exp %50 : vector<16x32xf32>
    %cst_14 = arith.constant dense<0.000000e+00> : vector<32xf32>
    %52 = vector.multi_reduction <add>, %51, %cst_14 [0] : vector<16x32xf32> to vector<32xf32>
    %53 = vector.shape_cast %52 : vector<32xf32> to vector<1x32xf32>
    %54 = tpu.reciprocal %53 {approx = true} : vector<1x32xf32> -> vector<1x32xf32>
    %55 = vector.broadcast %54 : vector<1x32xf32> to vector<16x32xf32>
    %56 = arith.mulf %51, %55 : vector<16x32xf32>
    %57 = arith.mulf %45, %56 : vector<16x32xf32>
    %cst_15 = arith.constant dense<0.000000e+00> : vector<32xf32>
    %58 = vector.multi_reduction <add>, %57, %cst_15 [0] : vector<16x32xf32> to vector<32xf32>
    %59 = vector.shape_cast %58 : vector<32xf32> to vector<1x32xf32>
    %cst_16 = arith.constant dense<0xFF800000> : vector<32xf32>
    %60 = vector.multi_reduction <maximumf>, %45, %cst_16 [0] : vector<16x32xf32> to vector<32xf32>
    %61 = vector.shape_cast %60 : vector<32xf32> to vector<1x32xf32>
    %62 = tpu.concatenate %59, %61 in 1 : vector<1x32xf32>, vector<1x32xf32> -> vector<1x64xf32>
    %63 = vector.extract_strided_slice %5 {offsets = [48, 0], sizes = [16, 64], strides = [1, 1]} : vector<64x64xf32> to vector<16x64xf32>
    %64 = vector.extract_strided_slice %63 {offsets = [0, 0], sizes = [16, 32], strides = [1, 1]} : vector<16x64xf32> to vector<16x32xf32>
    %65 = vector.extract_strided_slice %63 {offsets = [0, 32], sizes = [16, 32], strides = [1, 1]} : vector<16x64xf32> to vector<16x32xf32>
    %cst_17 = arith.constant dense<0xFF800000> : vector<32xf32>
    %66 = vector.multi_reduction <maximumf>, %65, %cst_17 [0] : vector<16x32xf32> to vector<32xf32>
    %67 = vector.shape_cast %66 : vector<32xf32> to vector<1x32xf32>
    %68 = vector.broadcast %67 : vector<1x32xf32> to vector<16x32xf32>
    %69 = arith.subf %65, %68 : vector<16x32xf32>
    %70 = math.exp %69 : vector<16x32xf32>
    %cst_18 = arith.constant dense<0.000000e+00> : vector<32xf32>
    %71 = vector.multi_reduction <add>, %70, %cst_18 [0] : vector<16x32xf32> to vector<32xf32>
    %72 = vector.shape_cast %71 : vector<32xf32> to vector<1x32xf32>
    %73 = tpu.reciprocal %72 {approx = true} : vector<1x32xf32> -> vector<1x32xf32>
    %74 = vector.broadcast %73 : vector<1x32xf32> to vector<16x32xf32>
    %75 = arith.mulf %70, %74 : vector<16x32xf32>
    %76 = arith.mulf %64, %75 : vector<16x32xf32>
    %cst_19 = arith.constant dense<0.000000e+00> : vector<32xf32>
    %77 = vector.multi_reduction <add>, %76, %cst_19 [0] : vector<16x32xf32> to vector<32xf32>
    %78 = vector.shape_cast %77 : vector<32xf32> to vector<1x32xf32>
    %cst_20 = arith.constant dense<0xFF800000> : vector<32xf32>
    %79 = vector.multi_reduction <maximumf>, %64, %cst_20 [0] : vector<16x32xf32> to vector<32xf32>
    %80 = vector.shape_cast %79 : vector<32xf32> to vector<1x32xf32>
    %81 = tpu.concatenate %78, %80 in 1 : vector<1x32xf32>, vector<1x32xf32> -> vector<1x64xf32>
    %82 = tpu.concatenate %24, %43, %62, %81 in 0 : vector<1x64xf32>, vector<1x64xf32>, vector<1x64xf32>, vector<1x64xf32> -> vector<4x64xf32>
    %c0_21 = arith.constant 0 : index
    %c0_22 = arith.constant 0 : index
    %83 = vector.load %arg3[%c0_21, %c0_22] : memref<64x32xf32, #tpu.memory_space<vmem>>, vector<64x32xf32>
    %cst_23 = arith.constant dense<0.000000e+00> : vector<4x32xf32>
    %84 = tpu.matmul %82, %83, %cst_23 {dimension_numbers = #tpu.dot_dimension_numbers<[1], [0], [0], [1], [0, 0, 1, 1], [], []>} : vector<4x64xf32>, vector<64x32xf32>, vector<4x32xf32> -> vector<4x32xf32>
    %c0_24 = arith.constant 0 : index
    %c0_25 = arith.constant 0 : index
    %85 = vector.load %arg4[%c0_24, %c0_25] : memref<1x32xf32, #tpu.memory_space<vmem>>, vector<1x32xf32>
    %86 = vector.broadcast %85 : vector<1x32xf32> to vector<4x32xf32>
    %87 = arith.addf %84, %86 : vector<4x32xf32>
    %cst_26 = arith.constant 0.000000e+00 : f32
    %88 = vector.broadcast %cst_26 : f32 to vector<4x32xf32>
    %89 = arith.maximumf %87, %88 : vector<4x32xf32>
    %90 = arith.truncf %89 : vector<4x32xf32> to vector<4x32xbf16>
    %c0_27 = arith.constant 0 : index
    %c0_28 = arith.constant 0 : index
    %91 = vector.load %arg5[%c0_27, %c0_28] : memref<32x1280xbf16, #tpu.memory_space<vmem>>, vector<32x1280xbf16>
    %cst_29 = arith.constant dense<0.000000e+00> : vector<4x1280xf32>
    %92 = tpu.matmul %90, %91, %cst_29 {dimension_numbers = #tpu.dot_dimension_numbers<[1], [0], [0], [1], [0, 0, 1, 1], [], []>} : vector<4x32xbf16>, vector<32x1280xbf16>, vector<4x1280xf32> -> vector<4x1280xf32>
    %c0_30 = arith.constant 0 : index
    %c0_31 = arith.constant 0 : index
    %93 = vector.load %arg6[%c0_30, %c0_31] : memref<1x1280xf32, #tpu.memory_space<vmem>>, vector<1x1280xf32>
    %94 = vector.broadcast %93 : vector<1x1280xf32> to vector<4x1280xf32>
    %95 = arith.addf %92, %94 : vector<4x1280xf32>
    %cst_32 = arith.constant 0.000000e+00 : f32
    %96 = vector.broadcast %cst_32 : f32 to vector<4x1280xf32>
    %97 = arith.cmpf ogt, %95, %96 : vector<4x1280xf32>
    %cst_33 = arith.constant 1.000000e-01 : f32
    %98 = vector.broadcast %cst_33 : f32 to vector<4x1280xf32>
    %99 = arith.mulf %98, %95 : vector<4x1280xf32>
    %100 = arith.select %97, %95, %99 : vector<4x1280xi1>, vector<4x1280xf32>
    %101 = arith.truncf %100 : vector<4x1280xf32> to vector<4x1280xbf16>
    %c0_34 = arith.constant 0 : index
    %c0_35 = arith.constant 0 : index
    %102 = vector.load %arg7[%c0_34, %c0_35] : memref<1280x640xbf16, #tpu.memory_space<vmem>>, vector<1280x640xbf16>
    %cst_36 = arith.constant dense<0.000000e+00> : vector<4x640xf32>
    %103 = tpu.matmul %101, %102, %cst_36 {dimension_numbers = #tpu.dot_dimension_numbers<[1], [0], [0], [1], [0, 0, 1, 1], [], []>} : vector<4x1280xbf16>, vector<1280x640xbf16>, vector<4x640xf32> -> vector<4x640xf32>
    %c0_37 = arith.constant 0 : index
    %c0_38 = arith.constant 0 : index
    %104 = vector.load %arg8[%c0_37, %c0_38] : memref<1x640xf32, #tpu.memory_space<vmem>>, vector<1x640xf32>
    %105 = vector.broadcast %104 : vector<1x640xf32> to vector<4x640xf32>
    %106 = arith.addf %103, %105 : vector<4x640xf32>
    %cst_39 = arith.constant 0.000000e+00 : f32
    %107 = vector.broadcast %cst_39 : f32 to vector<4x640xf32>
    %108 = arith.cmpf ogt, %106, %107 : vector<4x640xf32>
    %cst_40 = arith.constant 1.000000e-01 : f32
    %109 = vector.broadcast %cst_40 : f32 to vector<4x640xf32>
    %110 = arith.mulf %109, %106 : vector<4x640xf32>
    %111 = arith.select %108, %106, %110 : vector<4x640xi1>, vector<4x640xf32>
    %c0_41 = arith.constant 0 : index
    %c0_42 = arith.constant 0 : index
    %112 = vector.load %arg9[%c0_41, %c0_42] : memref<640x2xf32, #tpu.memory_space<vmem>>, vector<640x2xf32>
    %cst_43 = arith.constant dense<0.000000e+00> : vector<4x2xf32>
    %113 = tpu.matmul %111, %112, %cst_43 {dimension_numbers = #tpu.dot_dimension_numbers<[1], [0], [0], [1], [0, 0, 1, 1], [], []>} : vector<4x640xf32>, vector<640x2xf32>, vector<4x2xf32> -> vector<4x2xf32>
    %c0_44 = arith.constant 0 : index
    %c0_45 = arith.constant 0 : index
    %114 = vector.load %arg10[%c0_44, %c0_45] : memref<1x2xf32, #tpu.memory_space<vmem>>, vector<1x2xf32>
    %115 = vector.broadcast %114 : vector<1x2xf32> to vector<4x2xf32>
    %116 = arith.addf %113, %115 : vector<4x2xf32>
    %c0_46 = arith.constant 0 : index
    %c0_47 = arith.constant 0 : index
    %117 = vector.load %arg11[%c0_46, %c0_47] : memref<4x2xf32, #tpu.memory_space<vmem>>, vector<4x2xf32>
    tpu.vector_store %arg11[%c0_46, %c0_47], %116 {strides = array<i32>} : memref<4x2xf32, #tpu.memory_space<vmem>>, vector<4x2xf32>,
    return
  }
}

</mosaic_0001>

<bundles_post_ra>
// kernel: forward.1
= control target key start
LH: loop header
LB: loop body
LE: loop exit
PB: predicated region body
PF: predicated region fallthrough
CT: control target
= control target key end

     0   :  { %16 = vsyncpa [#allocation3], 0  ;;  %s7317_s0 = inlined_call_operand.vmem [shape: bf16[64,288], index: 0, kind: input, shape index: {}]   ;;  %s7318_s1 = inlined_call_operand.vmem [shape: bf16[288,64], index: 1, kind: input, shape index: {}]   ;;  %s7319_s2 = inlined_call_operand.hbm [shape: f32[1,64], index: 2, kind: input, shape index: {}]   ;;  %s7320_s3 = inlined_call_operand.vmem [shape: f32[64,32], index: 3, kind: input, shape index: {}]   ;;  %s7321_s4 = inlined_call_operand.hbm [shape: f32[1,32], index: 4, kind: input, shape index: {}]   ;;  %s7322_s5 = inlined_call_operand.hbm [shape: bf16[32,1280], index: 5, kind: input, shape index: {}]   ;;  %s7323_s6 = inlined_call_operand.hbm [shape: f32[1,1280], index: 6, kind: input, shape index: {}]   ;;  %s7324_s7 = inlined_call_operand.hbm [shape: bf16[1280,640], index: 7, kind: input, shape index: {}]   ;;  %s7325_s8 = inlined_call_operand.hbm [shape: f32[1,640], index: 8, kind: input, shape index: {}]   ;;  %s7326_s9 = inlined_call_operand.vmem [shape: f32[640,2], index: 9, kind: input, shape index: {}]   ;;  %s7327_s10 = inlined_call_operand.hbm [shape: f32[1,2], index: 10, kind: input, shape index: {}]   ;;  %s7328_s11 = inlined_call_operand.vmem [shape: f32[4,2], index: 11, kind: output, shape index: {}]  }
   0x1   :  { %17 = vsyncpa [#allocation5], 0 }
   0x2   :  { %18 = vsyncpa [#allocation8], 0 }
   0x3   :  { %19 = vsyncpa [#allocation11], 0  ;;  %s6526_s17 = smov [#allocation4]   ;;  %s6527_s19 = smov [#allocation7]  }
   0x4   :  { %s42_s18 = sshll.u32 %s6526_s17, 4  ;;  %s64_s20 = sshll.u32 %s6527_s19, 4  ;;  %s43_s18 = int_to_ptr.vmem [resolvable:$true] %s42_s18  ;;  %s65_s20 = int_to_ptr.vmem [resolvable:$true] %s64_s20 }
   0x5   :  { %s6364_s23 = scalar_lea.hbm %s7321_s4, 16 }
   0x6   :  { %p6365_p0 = scmp.ne.s32.totalorder %s7321_s4, %s6364_s23  ;;  %p6368_p1 = scmp.lt.u32.totalorder %s6364_s23, %s7321_s4 }
   0x8   :  { %p6370_p2 = pnand %p6368_p1, %p6365_p0 }
   0xa   :  { %6373 = shalt.err (!%p6370_p2)
}
   0xb   :  { %s6374_s28 = scalar_lea.vmem %s43_s18, 16  ;;  %s6378_s29 = scalar_lea.vmem %s43_s18, 32 }
   0xc   :  { %p6375_p3 = scmp.ne.s32.totalorder %s43_s18, %s6374_s28  ;;  %p6379_p4 = scmp.lt.s32.totalorder %s43_s18, %s43_s18 }
   0xd   :  { %p6380_p5 = scmp.lt.s32.totalorder %s6378_s29, %s6374_s28 }
   0xf   :  { %p6381_p6 = por %p6380_p5, %p6379_p4 }
  0x11   :  { %p6382_p7 = pnand %p6381_p6, %p6375_p3 }
  0x13   :  { %6385 = shalt.err (!%p6382_p7)
}
  0x14   :  { %45 = dma.hbm_to_vmem [thread:$0]  %s7321_s4, 16, %s43_s18, [#allocation5]  }
  0x15   :  { %s6386_s15 = scalar_lea.hbm %s7323_s6, 160 }
  0x16   :  { %p6387_p8 = scmp.ne.s32.totalorder %s7323_s6, %s6386_s15  ;;  %p6390_p9 = scmp.lt.u32.totalorder %s6386_s15, %s7323_s6 }
  0x18   :  { %p6392_p10 = pnand %p6390_p9, %p6387_p8 }
  0x1a   :  { %6395 = shalt.err (!%p6392_p10)
}
  0x1b   :  { %s6396_s22 = scalar_lea.vmem %s65_s20, 160  ;;  %p6401_p12 = scmp.lt.s32.totalorder %s65_s20, %s65_s20 }
  0x1c   :  { %p6397_p11 = scmp.ne.s32.totalorder %s65_s20, %s6396_s22  ;;  %p6402_p13 = scmp.lt.s32.totalorder %s6396_s22, %s6396_s22 }
  0x1e   :  { %p6403_p0 = por %p6402_p13, %p6401_p12 }
  0x20   :  { %p6404_p1 = pnand %p6403_p0, %p6397_p11 }
  0x22   :  { %6407 = shalt.err (!%p6404_p1)
}
  0x23   :  { %67 = dma.hbm_to_vmem [thread:$0]  %s7323_s6, 160, %s65_s20, [#allocation8]  }
  0x24   :  { %s6528_s23 = smov [#allocation10]   ;;  %s6529_s25 = smov [#allocation2]  }
  0x25   :  { %s86_s24 = sshll.u32 %s6528_s23, 4  ;;  %s30_s26 = sshll.u32 %s6529_s25, 4  ;;  %s87_s24 = int_to_ptr.vmem [resolvable:$true] %s86_s24  ;;  %s31_s26 = int_to_ptr.vmem [resolvable:$true] %s30_s26 }
  0x26   :  { %s6408_s29 = scalar_lea.hbm %s7325_s8, 80 }
  0x27   :  { %p6409_p2 = scmp.ne.s32.totalorder %s7325_s8, %s6408_s29  ;;  %p6412_p3 = scmp.lt.u32.totalorder %s6408_s29, %s7325_s8 }
  0x29   :  { %p6414_p4 = pnand %p6412_p3, %p6409_p2 }
  0x2b   :  { %6417 = shalt.err (!%p6414_p4)
}
  0x2c   :  { %s6418_s6 = scalar_lea.vmem %s87_s24, 80  ;;  %s6422_s20 = scalar_lea.vmem %s87_s24, 96 }
  0x2d   :  { %p6419_p5 = scmp.ne.s32.totalorder %s87_s24, %s6418_s6  ;;  %p6423_p6 = scmp.lt.s32.totalorder %s87_s24, %s87_s24 }
  0x2e   :  { %p6424_p7 = scmp.lt.s32.totalorder %s6422_s20, %s6418_s6 }
  0x30   :  { %p6425_p8 = por %p6424_p7, %p6423_p6 }
  0x32   :  { %p6426_p9 = pnand %p6425_p8, %p6419_p5 }
  0x34   :  { %6429 = shalt.err (!%p6426_p9)
}
  0x35   :  { %89 = dma.hbm_to_vmem [thread:$0]  %s7325_s8, 80, %s87_s24, [#allocation11]  }
  0x36   :  { %s6430_s21 = scalar_lea.hbm %s7319_s2, 16 }
  0x37   :  { %p6431_p10 = scmp.ne.s32.totalorder %s7319_s2, %s6430_s21  ;;  %p6434_p11 = scmp.lt.u32.totalorder %s6430_s21, %s7319_s2 }
  0x39   :  { %p6436_p12 = pnand %p6434_p11, %p6431_p10 }
  0x3b   :  { %6439 = shalt.err (!%p6436_p12)
}
  0x3c   :  { %s6440_s25 = scalar_lea.vmem %s31_s26, 16  ;;  %s6444_s27 = scalar_lea.vmem %s31_s26, 32 }
  0x3d   :  { %p6441_p13 = scmp.ne.s32.totalorder %s31_s26, %s6440_s25  ;;  %p6445_p0 = scmp.lt.s32.totalorder %s31_s26, %s31_s26 }
  0x3e   :  { %p6446_p1 = scmp.lt.s32.totalorder %s6444_s27, %s6440_s25 }
  0x40   :  { %p6447_p2 = por %p6446_p1, %p6445_p0 }
  0x42   :  { %p6448_p3 = pnand %p6447_p2, %p6441_p13 }
  0x44   :  { %6451 = shalt.err (!%p6448_p3)
}
  0x45   :  { %33 = dma.hbm_to_vmem [thread:$0]  %s7319_s2, 16, %s31_s26, [#allocation3]  }
  0x46   :  { %s6530_s28 = smov [#allocation6]   ;;  %s6452_s13 = scalar_lea.hbm %s7322_s5, 2560 }
  0x47   :  { %s51_s29 = sshll.u32 %s6530_s28, 4  ;;  %p6453_p4 = scmp.ne.s32.totalorder %s7322_s5, %s6452_s13  ;;  %s52_s29 = int_to_ptr.vmem [resolvable:$true] %s51_s29 }
  0x48   :  { %p6456_p5 = scmp.lt.u32.totalorder %s6452_s13, %s7322_s5 }
  0x4a   :  { %p6458_p6 = pnand %p6456_p5, %p6453_p4 }
  0x4c   :  { %6461 = shalt.err (!%p6458_p6)
}
  0x4d   :  { %s6462_s16 = scalar_lea.vmem %s52_s29, 2560  ;;  %p6467_p8 = scmp.lt.s32.totalorder %s52_s29, %s52_s29 }
  0x4e   :  { %p6463_p7 = scmp.ne.s32.totalorder %s52_s29, %s6462_s16  ;;  %p6468_p9 = scmp.lt.s32.totalorder %s6462_s16, %s6462_s16 }
  0x50   :  { %p6469_p10 = por %p6468_p9, %p6467_p8 }
  0x52   :  { %p6470_p11 = pnand %p6469_p10, %p6463_p7 }
  0x54   :  { %6473 = shalt.err (!%p6470_p11)
}
  0x55   :  { %s6531_s2 = smov 640   ;;  %s6532_s26 = smov 40  }
  0x56   :  { %57 = dma.hbm_to_vmem [thread:$0]  %s7322_s5, 2560, %s52_s29, [#allocation5], %s6531_s2, %s6531_s2, %s6532_s26  }
  0x57   :  { %s6533_s21 = smov [#allocation9]   ;;  %s6474_s23 = scalar_lea.hbm %s7324_s7, 51200 }
  0x58   :  { %s73_s22 = sshll.u32 %s6533_s21, 4  ;;  %p6475_p12 = scmp.ne.s32.totalorder %s7324_s7, %s6474_s23  ;;  %s74_s22 = int_to_ptr.vmem [resolvable:$true] %s73_s22 }
  0x59   :  { %p6478_p13 = scmp.lt.u32.totalorder %s6474_s23, %s7324_s7 }
  0x5b   :  { %p6480_p0 = pnand %p6478_p13, %p6475_p12 }
  0x5d   :  { %6483 = shalt.err (!%p6480_p0)
}
  0x5e   :  { %s6484_s28 = scalar_lea.vmem %s74_s22, 51200  ;;  %p6489_p2 = scmp.lt.s32.totalorder %s74_s22, %s74_s22 }
  0x5f   :  { %p6485_p1 = scmp.ne.s32.totalorder %s74_s22, %s6484_s28  ;;  %p6490_p3 = scmp.lt.s32.totalorder %s6484_s28, %s6484_s28 }
  0x61   :  { %p6491_p4 = por %p6490_p3, %p6489_p2 }
  0x63   :  { %p6492_p5 = pnand %p6491_p4, %p6485_p1 }
  0x65   :  { %6495 = shalt.err (!%p6492_p5)
}
  0x66   :  { %s6534_s5 = smov 320   ;;  %s6535_s29 = smov 20  }
  0x67   :  { %79 = dma.hbm_to_vmem [thread:$0]  %s7324_s7, 51200, %s74_s22, [#allocation8], %s6534_s5, %s6534_s5, %s6535_s29  }
  0x68   :  { %s6536_s13 = smov [#allocation12]   ;;  %s6496_s15 = scalar_lea.hbm %s7327_s10, 16 }
  0x69   :  { %s98_s14 = sshll.u32 %s6536_s13, 4  ;;  %p6497_p6 = scmp.ne.s32.totalorder %s7327_s10, %s6496_s15  ;;  %s99_s14 = int_to_ptr.vmem [resolvable:$true] %s98_s14 }
  0x6a   :  { %p6500_p7 = scmp.lt.u32.totalorder %s6496_s15, %s7327_s10 }
  0x6c   :  { %p6502_p8 = pnand %p6500_p7, %p6497_p6 }
  0x6e   :  { %6505 = shalt.err (!%p6502_p8)
}
  0x6f   :  { %s6506_s19 = scalar_lea.vmem %s99_s14, 16  ;;  %s6510_s7 = scalar_lea.vmem %s99_s14, 32 }
  0x70   :  { %p6507_p9 = scmp.ne.s32.totalorder %s99_s14, %s6506_s19  ;;  %p6511_p10 = scmp.lt.s32.totalorder %s99_s14, %s99_s14 }
  0x71   :  { %p6512_p11 = scmp.lt.s32.totalorder %s6510_s7, %s6506_s19 }
  0x73   :  { %p6513_p12 = por %p6512_p11, %p6511_p10 }
  0x75   :  { %p6514_p13 = pnand %p6513_p12, %p6507_p9 }
  0x77   :  { %6517 = shalt.err (!%p6514_p13)
}
  0x78   :  { %101 = dma.hbm_to_vmem [thread:$0]  %s7327_s10, 16, %s99_s14, [#allocation11]  }
  0x79   :  { %6518 = dma.done.wait [#allocation3], 16  }
  0x7a   :  { %6519 = vsyncadd [#allocation3], 4294967280 }
  0x7b   :  { %6520 = dma.done.wait [#allocation5], 2576  }
  0x7c   :  { %6521 = vsyncadd [#allocation5], 4294964720 }
  0x7d   :  { %6522 = dma.done.wait [#allocation8], 51360  }
  0x7e   :  { %6523 = vsyncadd [#allocation8], 4294915936 }
  0x7f   :  { %6524 = dma.done.wait [#allocation11], 96  }
  0x80   :  { %6525 = vsyncadd [#allocation11], 4294967200  ;;  %v5716_v0 = vld [vmem:[%s7318_s1 + $0x40] sm:$0xff]   ;;  %v5718_v2 = vld [vmem:[%s7318_s1 + $0x48] sm:$0xff]   ;;  %vm351_vm0 = vcmask 261120   ;;  %vm494_vm1 = vcmask 523520  }
  0x81   :  { %v5717_v1 = vld [vmem:[%s7318_s1] sm:$0xff]   ;;  %5245 = vmatprep.subr.bf16.mxu0 %v5716_v0  ;;  %v5719_v3 = vld [vmem:[%s7318_s1 + $0x8] sm:$0xff]   ;;  %v5720_v4 = vld [vmem:[%s7318_s1 + $0x50] sm:$0xff]   ;;  %s6539_s7 = smov 32   ;;  %vm6540_vm2 = vmmov 0   ;;  %vm744_vm3 = vcmask 1040384  }
  0x82   :  { %5246 = vmatpush3.bf16.msra.mxu0 %v5717_v1  ;;  %v5721_v5 = vld [vmem:[%s7318_s1 + $0x10] sm:$0xff]   ;;  %v5722_v6 = vld [vmem:[%s7318_s1 + $0x58] sm:$0xff]   ;;  %v5724_v8 = vld [vmem:[%s7318_s1 + $0x60] sm:$0xff]   ;;  %vm746_vm4 = vcmask 1041408   ;;  %vm748_vm5 = vcmask 1042432   ;;  %vm765_vm6 = vcmask 523264  }
  0x83   :  { %5247 = vmatprep.subr.bf16.mxu0 %v5718_v2  ;;  %v5723_v7 = vld [vmem:[%s7318_s1 + $0x18] sm:$0xff]   ;;  %v5725_v9 = vld [vmem:[%s7318_s1 + $0x20] sm:$0xff]   ;;  %v5726_v11 = vld [vmem:[%s7318_s1 + $0x68] sm:$0xff]  }
  0x84   :  { %v5731_v10 = vld [vmem:[%s7318_s1 + $0x80] sm:$0xff]   ;;  %v5727_v12 = vld [vmem:[%s7318_s1 + $0x28] sm:$0xff]   ;;  %v5728_v13 = vld [vmem:[%s7318_s1 + $0x70] sm:$0xff]  }
  0x85   :  { %5497 = vmatprep.subr.bf16.mxu1 %v5731_v10  ;;  %v5735_v14 = vld [vmem:[%s7317_s0 + $0x4] ss:$12 sps:$4 sm:$0xff]   ;;  %v5736_v15 = vld [vmem:[%s7318_s1 + $0x88] sm:$0xff]   ;;  %v5730_v19 = vld [vmem:[%s7318_s1 + $0x78] sm:$0xff]  }
  0x86   :  { %5248 = vmatpush3.bf16.msra.mxu0 %v5719_v3  ;;  %5498 = vmatpush3.bf16.msra.mxu1 %v5731_v10  ;;  %v5737_v16 = vld [vmem:[%s7317_s0 + $0x8] ss:$12 sps:$4 sm:$0xff]   ;;  %v5738_v17 = vld [vmem:[%s7317_s0 + $0x20] ss:$12 sps:$4 sm:$0xff]   ;;  %v5745_v20 = vld [vmem:[%s7317_s0 + $0x38] ss:$12 sps:$4 sm:$0xff]  }
  0x87   :  { %5249 = vmatprep.subr.bf16.mxu0 %v5720_v4  ;;  %396 = vmatprep.mubr.bf16.mxu0 %v5735_v14  ;;  %v5729_v18 = vld [vmem:[%s7318_s1 + $0x30] sm:$0xff]   ;;  %v5732_v21 = vld [vmem:[%s7318_s1 + $0x38] sm:$0xff]   ;;  %v5733_v23 = vld [vmem:[%s7317_s0] ss:$12 sps:$4 sm:$0xff]  }
  0x88   :  { %5499 = vmatprep.subr.bf16.mxu1 %v5736_v15  ;;  %5501 = vmatprep.mubr.msk.bf16.mxu1 %vm351_vm0, %v5737_v16  ;;  %v5746_v22 = vld [vmem:[%s7317_s0 + $0x50] ss:$12 sps:$4 sm:$0xff]   ;;  %v5741_v25 = vld [vmem:[%s7317_s0 + $0x18] ss:$12 sps:$4 sm:$0xff]   ;;  %v5742_v26 = vld [vmem:[%s7317_s0 + $0x34] ss:$12 sps:$4 sm:$0xff]  }
  0x89   :  { %v5739_v24 = vld [vmem:[%s7317_s0 + $0x1c] ss:$12 sps:$4 sm:$0xff]   ;;  %v5747_v28 = vld [vmem:[%s7317_s0 + $0x4c] ss:$12 sps:$4 sm:$0xff]   ;;  %v6783_v38 = vld [vmem:[#allocation2] ss:$0 sm:$0xff] }
  0x8a   :  { %5250 = vmatpush3.bf16.msra.mxu0 %v5721_v5  ;;  %5500 = vmatpush3.bf16.msra.mxu1 %v5736_v15  ;;  %v5744_v27 = vld [vmem:[%s7317_s0 + $0x30] ss:$12 sps:$4 sm:$0xff]   ;;  %v5749_v29 = vld [vmem:[%s7317_s0 + $0x48] ss:$12 sps:$4 sm:$0xff]   ;;  %s6537_s0 = smov 96  }
  0x8b   :  { %5251 = vmatprep.subr.bf16.mxu0 %v5722_v6 }
  0x8d   :  { %5502 = vmatmul.mubr.msk.bf16.vlgmr.msra.gmra.mrb[0].mxu1 %vm351_vm0, %v5738_v17 }
  0x8e   :  { %5252 = vmatpush3.bf16.msra.mxu0 %v5723_v7  ;;  %5505 = vmatprep.mubr.msk.bf16.mxu1 %vm351_vm0, %v5745_v20 }
  0x8f   :  { %5253 = vmatprep.subr.bf16.mxu0 %v5724_v8 }
  0x92   :  { %5254 = vmatpush3.bf16.msra.mxu0 %v5725_v9 }
  0x93   :  { %5255 = vmatprep.subr.bf16.mxu0 %v5726_v11 }
  0x95   :  { %5506 = vmatmul.mubr.msk.bf16.gmra.mrb[4].mxu1 %vm351_vm0, %v5746_v22 }
  0x96   :  { %5256 = vmatpush3.bf16.msra.mxu0 %v5727_v12 }
  0x97   :  { %5257 = vmatprep.subr.bf16.mxu0 %v5728_v13 }
  0x9a   :  { %5258 = vmatpush3.bf16.msra.mxu0 %v5729_v18 }
  0x9b   :  { %5259 = vmatprep.subr.bf16.mxu0 %v5730_v19 }
  0x9e   :  { %5260 = vmatpush3.bf16.msra.mxu0 %v5732_v21 }
  0xa1   :  { %397 = vmatmul.mubr.bf16.vlgmr.msra.gmra.mrb[0].mxu0 %v5733_v23 }
  0xa2   :  { %404 = vmatprep.mubr.bf16.mxu0 %v5739_v24 }
  0xa9   :  { %405 = vmatmul.mubr.bf16.gmra.mrb[4].mxu0 %v5741_v25 }
  0xaa   :  { %412 = vmatprep.mubr.bf16.mxu0 %v5742_v26 }
  0xb1   :  { %413 = vmatmul.mubr.bf16.gmra.mrb[8].mxu0 %v5744_v27 }
  0xb2   :  { %420 = vmatprep.mubr.bf16.mxu0 %v5747_v28 }
  0xb9   :  { %421 = vmatmul.mubr.bf16.gmra.mrb[12].mxu0 %v5749_v29 }
 0x160   :  { %v5503_v30 = vpop.f32.mrb[0].mxu1 }
 0x161   :  { %v463_v31 = vpop.f32.mrb[1].mxu1 }
 0x162   :  { %v5504_v32 = vpop.f32.mrb[2].mxu1 }
 0x163   :  { %v466_v33 = vpop.f32.mrb[3].mxu1 }
 0x168   :  { %v6781_v34 = vpop.f32.mrb[4].mxu1 }
 0x169   :  { %v479_v36 = vpop.f32.mrb[5].mxu1 }
 0x16a   :  { %v6785_v39 = vpop.f32.mrb[6].mxu1 }
 0x16b   :  { %v482_v42 = vpop.f32.mrb[7].mxu1 }
 0x174   :  { %v5261_v35 = vpop.f32.mrb[0].mxu0 }
 0x175   :  { %v5262_v37 = vpop.f32.mrb[1].mxu0 }
 0x176   :  { %v5263_v40 = vadd.f32 %v5262_v37, %v5261_v35  ;;  %v5264_v41 = vpop.f32.mrb[2].mxu0 }
 0x177   :  { %v5265_v43 = vpop.f32.mrb[3].mxu0 }
 0x178   :  { %v5266_v44 = vadd.f32 %v5265_v43, %v5264_v41  ;;  %v399_v45 = vadd.f32 %v5263_v40, %v6783_v38 }
 0x17a   :  { %v6788_v46 = vadd.f32 %v463_v31, %v399_v45  ;;  %v402_v47 = vadd.f32 %v5266_v44, %v6783_v38 }
 0x17c   :  { %v6791_v48 = vadd.f32 %v466_v33, %v402_v47  ;;  %v5267_v49 = vpop.f32.mrb[4].mxu0  ;;  %v495_v51 = vsel %vm494_vm1, %v6788_v46, -inf }
 0x17d   :  { %v5268_v50 = vpop.f32.mrb[5].mxu0 }
 0x17e   :  { %v496_v52 = vsel %vm494_vm1, %v6791_v48, -inf  ;;  %v5269_v53 = vadd.f32 %v5268_v50, %v5267_v49  ;;  %v5270_v54 = vpop.f32.mrb[6].mxu0 }
 0x17f   :  { %v497_v55 = vmax.f32 %v495_v51, %v496_v52  ;;  %v5271_v56 = vpop.f32.mrb[7].mxu0 }
 0x180   :  { %v407_v57 = vadd.f32 %v5269_v53, %v6783_v38  ;;  %v5272_v58 = vadd.f32 %v5271_v56, %v5270_v54 }
 0x181   :  { %v498_v59 = vrot.slane %v497_v55, 4 }
 0x182   :  { %v6798_v60 = vadd.f32 %v5503_v30, %v407_v57  ;;  %v410_v61 = vadd.f32 %v5272_v58, %v6783_v38 }
 0x183   :  { %v499_v62 = vmax.f32 %v497_v55, %v498_v59 }
 0x184   :  { %v6801_v63 = vadd.f32 %v5504_v32, %v410_v61  ;;  %v5273_v0 = vpop.f32.mrb[8].mxu0  ;;  %v555_v3 = vsel %vm494_vm1, %v6798_v60, -inf }
 0x185   :  { %v500_v1 = vrot.slane %v499_v62, 2  ;;  %v5274_v2 = vpop.f32.mrb[9].mxu0 }
 0x186   :  { %v556_v4 = vsel %vm494_vm1, %v6801_v63, -inf  ;;  %v5275_v5 = vadd.f32 %v5274_v2, %v5273_v0  ;;  %v5276_v6 = vpop.f32.mrb[10].mxu0 }
 0x187   :  { %v501_v7 = vmax.f32 %v499_v62, %v500_v1  ;;  %v557_v8 = vmax.f32 %v555_v3, %v556_v4  ;;  %v5277_v9 = vpop.f32.mrb[11].mxu0 }
 0x188   :  { %v415_v10 = vadd.f32 %v5275_v5, %v6783_v38  ;;  %v5278_v11 = vadd.f32 %v5277_v9, %v5276_v6 }
 0x189   :  { %v502_v12 = vrot.slane %v501_v7, 1  ;;  %v558_v13 = vrot.slane %v557_v8, 4 }
 0x18a   :  { %v6808_v14 = vadd.f32 %v479_v36, %v415_v10  ;;  %v418_v15 = vadd.f32 %v5278_v11, %v6783_v38 }
 0x18b   :  { %v503_v16 = vmax.f32 %v501_v7, %v502_v12  ;;  %v559_v17 = vmax.f32 %v557_v8, %v558_v13 }
 0x18c   :  { %v6811_v18 = vadd.f32 %v482_v42, %v418_v15  ;;  %v5279_v19 = vpop.f32.mrb[12].mxu0  ;;  %v615_v24 = vsel %vm494_vm1, %v6808_v14, -inf }
 0x18d   :  { %v504_v20 = vsub.f32 %v6788_v46, %v503_v16  ;;  %v505_v21 = vsub.f32 %v6791_v48, %v503_v16  ;;  %v560_v22 = vrot.slane %v559_v17, 2  ;;  %v5280_v23 = vpop.f32.mrb[13].mxu0 }
 0x18e   :  { %v616_v25 = vsel %vm494_vm1, %v6811_v18, -inf  ;;  %v5281_v26 = vadd.f32 %v5280_v23, %v5279_v19  ;;  %v5282_v27 = vpop.f32.mrb[14].mxu0 }
 0x18f   :  { %v506_v28 = vmul.f32 1.442695, %v504_v20  ;;  %v508_v29 = vmul.f32 1.442695, %v505_v21  ;;  %v561_v30 = vmax.f32 %v559_v17, %v560_v22  ;;  %v617_v31 = vmax.f32 %v615_v24, %v616_v25  ;;  %v5283_v32 = vpop.f32.mrb[15].mxu0 }
 0x190   :  { %v423_v33 = vadd.f32 %v5281_v26, %v6783_v38  ;;  %v5284_v35 = vadd.f32 %v5283_v32, %v5282_v27 }
 0x191   :  { %6340 = vpow2.f32 %v506_v28  ;;  %v562_v36 = vrot.slane %v561_v30, 1  ;;  %v618_v37 = vrot.slane %v617_v31, 4 }
 0x192   :  { %6342 = vpow2.f32 %v508_v29  ;;  %v6821_v40 = vadd.f32 %v6781_v34, %v423_v33  ;;  %v426_v41 = vadd.f32 %v5284_v35, %v6783_v38 }
 0x193   :  { %v563_v42 = vmax.f32 %v561_v30, %v562_v36  ;;  %v619_v43 = vmax.f32 %v617_v31, %v618_v37 }
 0x194   :  { %v6825_v44 = vadd.f32 %v6785_v39, %v426_v41  ;;  %v675_v50 = vsel %vm494_vm1, %v6821_v40, -inf }
 0x195   :  { %v565_v45 = vsub.f32 %v6801_v63, %v563_v42  ;;  %v620_v47 = vrot.slane %v619_v43, 2  ;;  %v564_v49 = vsub.f32 %v6798_v60, %v563_v42 }
 0x196   :  { %v676_v51 = vsel %vm494_vm1, %v6825_v44, -inf }
 0x197   :  { %v568_v34 = vmul.f32 1.442695, %v565_v45  ;;  %v621_v52 = vmax.f32 %v619_v43, %v620_v47  ;;  %v677_v53 = vmax.f32 %v675_v50, %v676_v51  ;;  %v566_v38 = vmul.f32 1.442695, %v564_v49 }
 0x199   :  { %6344 = vpow2.f32 %v568_v34  ;;  %v622_v54 = vrot.slane %v621_v52, 1  ;;  %v678_v55 = vrot.slane %v677_v53, 4 }
 0x19a   :  { %6346 = vpow2.f32 %v566_v38  ;;  %v602_v38 = vsel %vm351_vm0, %v6801_v63, -inf }
 0x19b   :  { %v6341_v39 = vpop.eup %6340  ;;  %v623_v56 = vmax.f32 %v621_v52, %v622_v54  ;;  %v679_v57 = vmax.f32 %v677_v53, %v678_v55  ;;  %v662_v54 = vsel %vm351_vm0, %v6811_v18, -inf }
 0x19c   :  { %v6343_v58 = vpop.eup %6342  ;;  %v510_v59 = vsel %vm494_vm1, %v6341_v39, 0.0 }
 0x19d   :  { %v624_v61 = vsub.f32 %v6808_v14, %v623_v56  ;;  %v625_v62 = vsub.f32 %v6811_v18, %v623_v56  ;;  %v680_v0 = vrot.slane %v679_v57, 2  ;;  %v511_v1 = vsel %vm494_vm1, %v6343_v58, 0.0 }
 0x19e   :  { %v512_v2 = vadd.f32 %v511_v1, %v510_v59 }
 0x19f   :  { %v626_v3 = vmul.f32 1.442695, %v624_v61  ;;  %v628_v4 = vmul.f32 1.442695, %v625_v62  ;;  %v681_v5 = vmax.f32 %v679_v57, %v680_v0  ;;  %v601_v57 = vsel %vm351_vm0, %v6798_v60, -inf }
 0x1a0   :  { %v513_v6 = vrot.slane %v512_v2, 4  ;;  %v603_v61 = vmax.f32 %v601_v57, %v602_v38  ;;  %v542_v62 = vsel %vm351_vm0, %v6791_v48, -inf  ;;  %v754_v38 = vld [vmem:[%s7320_s3 + $0x20] sm:$0xff] }
 0x1a1   :  { %6348 = vpow2.f32 %v626_v3  ;;  %v682_v7 = vrot.slane %v681_v5, 1  ;;  %v541_v3 = vsel %vm351_vm0, %v6788_v46, -inf }
 0x1a2   :  { %6350 = vpow2.f32 %v628_v4  ;;  %v514_v8 = vadd.f32 %v513_v6, %v512_v2  ;;  %v722_v2 = vsel %vm351_vm0, %v6825_v44, -inf }
 0x1a3   :  { %v6837_v9 = vpop.eup %6344  ;;  %v683_v10 = vmax.f32 %v681_v5, %v682_v7  ;;  %v543_v5 = vmax.f32 %v541_v3, %v542_v62  ;;  %v604_v7 = vrot.slane %v603_v61, 4  ;;  %v5755_v3 = vld [vmem:[#allocation6 + $0x24] ss:$40 sps:$4 sm:$0xff]  }
 0x1a4   :  { %v6347_v11 = vpop.eup %6346  ;;  %v515_v12 = vrot.slane %v514_v8, 2  ;;  %v571_v13 = vsel %vm494_vm1, %v6837_v9, 0.0  ;;  %1182 = vmatprep.subr.bf16.mxu0 %v5755_v3 }
 0x1a5   :  { %v684_v15 = vsub.f32 %v6821_v40, %v683_v10  ;;  %v685_v16 = vsub.f32 %v6825_v44, %v683_v10  ;;  %v570_v17 = vsel %vm494_vm1, %v6347_v11, 0.0 }
 0x1a6   :  { %v516_v19 = vadd.f32 %v515_v12, %v514_v8  ;;  %v572_v20 = vadd.f32 %v571_v13, %v570_v17  ;;  %v721_v8 = vsel %vm351_vm0, %v6821_v40, -inf  ;;  %v605_v17 = vmax.f32 %v603_v61, %v604_v7 }
 0x1a7   :  { %v686_v21 = vmul.f32 1.442695, %v684_v15  ;;  %v688_v22 = vmul.f32 1.442695, %v685_v16  ;;  %v723_v13 = vmax.f32 %v721_v8, %v722_v2  ;;  %v5753_v2 = vld [vmem:[#allocation6 + $0x20] ss:$40 sps:$4 sm:$0xff]  }
 0x1a8   :  { %v517_v23 = vrot.slane %v516_v19, 1  ;;  %v573_v24 = vrot.slane %v572_v20, 4  ;;  %1183 = vmatpush1.bf16.msra.mxu0 %v5753_v2 }
 0x1a9   :  { %6352 = vpow2.f32 %v686_v21 }
 0x1aa   :  { %6354 = vpow2.f32 %v688_v22  ;;  %v518_v25 = vadd.f32 %v517_v23, %v516_v19  ;;  %v574_v26 = vadd.f32 %v573_v24, %v572_v20  ;;  %v544_v19 = vrot.slane %v543_v5, 4 }
 0x1ab   :  { %v6349_v27 = vpop.eup %6348  ;;  %v724_v22 = vrot.slane %v723_v13, 4  ;;  %v606_v24 = vrot.slane %v605_v17, 2 }
 0x1ac   :  { %v6844_v28 = vpop.eup %6350  ;;  %6356 = vrcp.f32 %v518_v25  ;;  %v575_v29 = vrot.slane %v574_v26, 2  ;;  %v630_v30 = vsel %vm494_vm1, %v6349_v27, 0.0  ;;  %v545_v25 = vmax.f32 %v543_v5, %v544_v19 }
 0x1ad   :  { %v631_v31 = vsel %vm494_vm1, %v6844_v28, 0.0 }
 0x1ae   :  { %v576_v32 = vadd.f32 %v575_v29, %v574_v26  ;;  %v632_v33 = vadd.f32 %v631_v31, %v630_v30  ;;  %v725_v29 = vmax.f32 %v723_v13, %v724_v22  ;;  %v750_v30 = vld [vmem:[%s7320_s3] sm:$0xff]  ;;  %v751_v31 = vld [vmem:[%s7320_s3 + $0x8] sm:$0xff] }
 0x1b0   :  { %v577_v35 = vrot.slane %v576_v32, 1  ;;  %v633_v36 = vrot.slane %v632_v33, 4 }
 0x1b2   :  { %v578_v37 = vadd.f32 %v577_v35, %v576_v32  ;;  %v634_v41 = vadd.f32 %v633_v36, %v632_v33  ;;  %v607_v32 = vmax.f32 %v605_v17, %v606_v24  ;;  %v546_v33 = vrot.slane %v545_v25, 2 }
 0x1b3   :  { %v6849_v42 = vpop.eup %6352  ;;  %v6538_v35 = vmov 0.0|0.0  }
 0x1b4   :  { %v6851_v43 = vpop.eup %6354  ;;  %6358 = vrcp.f32 %v578_v37  ;;  %v635_v45 = vrot.slane %v634_v41, 2  ;;  %v690_v47 = vsel %vm494_vm1, %v6849_v42, 0.0  ;;  %5563 = vmatprep.subr.bf16.mxu1 %v6538_v35  ;;  %v726_v37 = vrot.slane %v725_v29, 2 }
 0x1b5   :  { %v691_v49 = vsel %vm494_vm1, %v6851_v43, 0.0 }
 0x1b6   :  { %v6357_v50 = vpop.eup %6356  ;;  %v636_v51 = vadd.f32 %v635_v45, %v634_v41  ;;  %v692_v34 = vadd.f32 %v691_v49, %v690_v47  ;;  %v752_v41 = vld [vmem:[%s7320_s3 + $0x10] sm:$0xff]  ;;  %v753_v45 = vld [vmem:[%s7320_s3 + $0x18] sm:$0xff] }
 0x1b7   :  { %v521_v52 = vmul.f32 %v6357_v50, %v6343_v58  ;;  %v520_v53 = vmul.f32 %v6357_v50, %v6341_v39  ;;  %v661_v58 = vsel %vm351_vm0, %v6808_v14, -inf  ;;  %v5567_v47 = vpack.c.bf16 %v753_v45, %v752_v41 }
 0x1b8   :  { %v637_v55 = vrot.slane %v636_v51, 1  ;;  %v693_v56 = vrot.slane %v692_v34, 4  ;;  %v663_v0 = vmax.f32 %v661_v58, %v662_v54  ;;  %v608_v50 = vrot.slane %v607_v32, 1  ;;  %v755_v54 = vld [vmem:[%s7320_s3 + $0x28] sm:$0xff]  ;;  %v756_v58 = vld [vmem:[%s7320_s3 + $0x30] sm:$0xff] }
 0x1b9   :  { %526 = vrot.lane.b32.xlu1 %v521_v52, %s6537_s0  ;;  %524 = vrot.lane.b32.xlu0 %v520_v53, %s6537_s0  ;;  %v727_v53 = vmax.f32 %v725_v29, %v726_v37 }
 0x1ba   :  { %v638_v39 = vadd.f32 %v637_v55, %v636_v51  ;;  %v694_v59 = vadd.f32 %v693_v56, %v692_v34  ;;  %v664_v12 = vrot.slane %v663_v0, 4  ;;  %v547_v51 = vmax.f32 %v545_v25, %v546_v33 }
 0x1bb   :  { %v728_v56 = vrot.slane %v727_v53, 1 }
 0x1bc   :  { %6360 = vrcp.f32 %v638_v39  ;;  %v695_v1 = vrot.slane %v694_v59, 2  ;;  %v665_v21 = vmax.f32 %v663_v0, %v664_v12  ;;  %v548_v57 = vrot.slane %v547_v51, 1  ;;  %v757_v39 = vld [vmem:[%s7320_s3 + $0x38] sm:$0xff] }
 0x1bd   :  { %v729_v61 = vmax.f32 %v727_v53, %v728_v56  ;;  %v6541_v0 = vmov 0.0  }
 0x1be   :  { %v6359_v4 = vpop.eup %6358  ;;  %v696_v6 = vadd.f32 %v695_v1, %v694_v59  ;;  %v5573_v59 = vpack.c.bf16 %v757_v39, %v756_v58  ;;  %v549_v62 = vmax.f32 %v547_v51, %v548_v57  ;;  %5525 = vmatprep.mubr.msk.f32.mxu1 %vm6540_vm2, %v6541_v0  ;;  %v5752_v1 = vld [vmem:[#allocation6 + $0x4] ss:$40 sps:$4 sm:$0xff]  }
 0x1bf   :  { %v580_v10 = vmul.f32 %v6359_v4, %v6347_v11  ;;  %v581_v20 = vmul.f32 %v6359_v4, %v6837_v9  ;;  %v666_v11 = vrot.slane %v665_v21, 2  ;;  %v5564_v9 = vpack.c.bf16 %v751_v31, %v750_v30 }
 0x1c0   :  { %v697_v15 = vrot.slane %v696_v6, 1 }
 0x1c1   :  { %584 = vrot.lane.b32.xlu0 %v580_v10, %s6537_s0  ;;  %v667_v36 = vmax.f32 %v665_v21, %v666_v11  ;;  %5565 = vmatpush3.bf16.msra.mxu1 %v5564_v9 }
 0x1c2   :  { %v698_v16 = vadd.f32 %v697_v15, %v696_v6  ;;  %5566 = vmatprep.subr.bf16.mxu1 %v6538_v35 }
 0x1c3   :  { %v668_v52 = vrot.slane %v667_v36, 1 }
 0x1c4   :  { %6362 = vrcp.f32 %v698_v16 }
 0x1c5   :  { %586 = vrot.lane.b32.xlu0 %v581_v20, %s6537_s0  ;;  %5568 = vmatpush3.bf16.msra.mxu1 %v5567_v47  ;;  %v669_v55 = vmax.f32 %v667_v36, %v668_v52 }
 0x1c6   :  { %v6361_v23 = vpop.eup %6360  ;;  %5569 = vmatprep.subr.bf16.mxu1 %v6538_v35 }
 0x1c7   :  { %v640_v26 = vmul.f32 %v6361_v23, %v6349_v27  ;;  %v641_v27 = vmul.f32 %v6361_v23, %v6844_v28 }
 0x1c9   :  { %644 = vrot.lane.b32.xlu1 %v640_v26, %s6537_s0 }
 0x1cd   :  { %646 = vrot.lane.b32.xlu1 %v641_v27, %s6537_s0 }
 0x1ce   :  { %v6363_v49 = vpop.eup %6362 }
 0x1cf   :  { %v701_v28 = vmul.f32 %v6363_v49, %v6851_v43  ;;  %v700_v34 = vmul.f32 %v6363_v49, %v6849_v42  ;;  %v5570_v43 = vpack.c.bf16 %v755_v54, %v754_v38  ;;  %v609_v42 = vmax.f32 %v607_v32, %v608_v50 }
 0x1d1   :  { %706 = vrot.lane.b32.xlu1 %v701_v28, %s6537_s0  ;;  %704 = vrot.lane.b32.xlu0 %v700_v34, %s6537_s0 }
 0x1d2   :  { %5571 = vmatpush3.bf16.msra.mxu1 %v5570_v43 }
 0x1d3   :  { %5572 = vmatprep.subr.bf16.mxu1 %v6538_v35 }
 0x1d5   :  { %671 = vrot.lane.b32.xlu1 %v669_v55, %s6539_s7  ;;  %611 = vrot.lane.b32.xlu0 %v609_v42, %s6539_s7 }
 0x1d6   :  { %5574 = vmatpush3.bf16.msra.mxu1 %v5573_v59 }
 0x1d7   :  { %1018 = vmatprep.subr.bf16.mxu1 %v5752_v1 }
 0x1d9   :  { %731 = vrot.lane.b32.xlu1 %v729_v61, %s6539_s7  ;;  %551 = vrot.lane.b32.xlu0 %v549_v62, %s6539_s7 }
 0x22b   :  { %v527_v4 = vpop.permute.xlu1 %526  ;;  %v525_v5 = vpop.permute.xlu0 %524 }
 0x22c   :  { %v531_v6 = vmul.f32 %v527_v4, %v6791_v48  ;;  %v530_v7 = vmul.f32 %v525_v5, %v6788_v46 }
 0x22e   :  { %v533_v10 = vsel %vm351_vm0, %v531_v6, 0.0  ;;  %v532_v12 = vsel %vm351_vm0, %v530_v7, 0.0  ;;  %v5750_v6 = vld [vmem:[#allocation6] ss:$40 sps:$4 sm:$0xff]  }
 0x22f   :  { %v534_v17 = vadd.f32 %v533_v10, %v532_v12  ;;  %v5758_v10 = vld [vmem:[#allocation6 + $0x54] ss:$40 sps:$4 sm:$0xff]  }
 0x230   :  { %v5761_v12 = vld [vmem:[#allocation6 + $0x74] ss:$40 sps:$4 sm:$0xff]  }
 0x231   :  { %v535_v48 = vrot.slane %v534_v17, 4  ;;  %1184 = vmatprep.subr.bf16.mxu0 %v5761_v12  ;;  %v5855_v12 = vld [vmem:[#allocation9 + $0x1e8] ss:$20 sps:$4 sm:$0xff]  }
 0x233   :  { %v585_v8 = vpop.permute.xlu0 %584  ;;  %v536_v11 = vadd.f32 %v535_v48, %v534_v17  ;;  %v5764_v17 = vld [vmem:[#allocation6 + $0xc] ss:$40 sps:$4 sm:$0xff]  }
 0x234   :  { %v590_v13 = vmul.f32 %v585_v8, %v6798_v60 }
 0x235   :  { %v537_v36 = vrot.slane %v536_v11, 2 }
 0x236   :  { %v592_v19 = vsel %vm351_vm0, %v590_v13, 0.0  ;;  %v5756_v13 = vld [vmem:[#allocation6 + $0x50] ss:$40 sps:$4 sm:$0xff]  }
 0x237   :  { %v587_v15 = vpop.permute.xlu0 %586  ;;  %v538_v49 = vadd.f32 %v537_v36, %v536_v11  ;;  %v5791_v11 = vld [vmem:[#allocation9 + $0x34] ss:$20 sps:$4 sm:$0xff]  }
 0x238   :  { %v591_v16 = vmul.f32 %v587_v15, %v6801_v63  ;;  %v5759_v15 = vld [vmem:[#allocation6 + $0x70] ss:$40 sps:$4 sm:$0xff]   ;;  %v5776_v36 = vld [vmem:[#allocation6 + $0x1c] ss:$40 sps:$4 sm:$0xff]  }
 0x239   :  { %v539_v54 = vrot.slane %v538_v49, 1  ;;  %1185 = vmatpush1.bf16.msra.mxu0 %v5759_v15  ;;  %v5822_v15 = vld [vmem:[#allocation9 + $0x118] ss:$20 sps:$4 sm:$0xff]  }
 0x23a   :  { %v593_v20 = vsel %vm351_vm0, %v591_v16, 0.0  ;;  %v6542_v16 = vmov 0  }
 0x23b   :  { %v594_v21 = vadd.f32 %v593_v20, %v592_v19  ;;  %v645_v22 = vpop.permute.xlu1 %644  ;;  %v540_v39 = vadd.f32 %v539_v54, %v538_v49  ;;  %1214 = vmatprep.mubr.bf16.mxu0 %v6542_v16  ;;  %v5785_v19 = vld [vmem:[#allocation9 + $0xc] ss:$20 sps:$4 sm:$0xff]   ;;  %v4817_v20 = vld [vmem:[#allocation4] ss:$0 sm:$0xff] }
 0x23c   :  { %v650_v46 = vmul.f32 %v645_v22, %v6808_v14  ;;  %4055 = vmatprep.subr.bf16.mxu0 %v5785_v19  ;;  %v5777_v49 = vld [vmem:[#allocation6 + $0x68] ss:$40 sps:$4 sm:$0xff]  }
 0x23d   :  { %v595_v23 = vrot.slane %v594_v21, 4  ;;  %v5794_v54 = vld [vmem:[#allocation9 + $0x54] ss:$20 sps:$4 sm:$0xff]  }
 0x23e   :  { %v652_v29 = vsel %vm351_vm0, %v650_v46, 0.0  ;;  %v5762_v46 = vld [vmem:[#allocation6 + $0x8] ss:$40 sps:$4 sm:$0xff]  }
 0x23f   :  { %v596_v24 = vadd.f32 %v595_v23, %v594_v21  ;;  %v647_v25 = vpop.permute.xlu1 %646  ;;  %v5828_v19 = vld [vmem:[#allocation9 + $0x140] ss:$20 sps:$4 sm:$0xff]  }
 0x240   :  { %v651_v26 = vmul.f32 %v647_v25, %v6811_v18  ;;  %v5767_v25 = vld [vmem:[#allocation6 + $0x5c] ss:$40 sps:$4 sm:$0xff]  }
 0x241   :  { %v597_v60 = vrot.slane %v596_v24, 2 }
 0x242   :  { %v653_v63 = vsel %vm351_vm0, %v651_v26, 0.0  ;;  %v5783_v26 = vld [vmem:[#allocation9 + $0x8] ss:$20 sps:$4 sm:$0xff]  }
 0x243   :  { %v598_v30 = vadd.f32 %v597_v60, %v596_v24  ;;  %v654_v31 = vadd.f32 %v653_v63, %v652_v29  ;;  %v707_v9 = vpop.permute.xlu1 %706  ;;  %v705_v32 = vpop.permute.xlu0 %704  ;;  %v5765_v60 = vld [vmem:[#allocation6 + $0x58] ss:$40 sps:$4 sm:$0xff]   ;;  %v5770_v29 = vld [vmem:[#allocation6 + $0x14] ss:$40 sps:$4 sm:$0xff]  }
 0x244   :  { %v711_v33 = vmul.f32 %v707_v9, %v6825_v44  ;;  %v710_v27 = vmul.f32 %v705_v32, %v6821_v40  ;;  %v5789_v63 = vld [vmem:[#allocation9 + $0x30] ss:$20 sps:$4 sm:$0xff]   ;;  %v5795_v32 = vld [vmem:[#allocation9 + $0x58] ss:$20 sps:$4 sm:$0xff]  }
 0x245   :  { %v655_v14 = vrot.slane %v654_v31, 4  ;;  %v599_v47 = vrot.slane %v598_v30, 1  ;;  %v5773_v9 = vld [vmem:[#allocation6 + $0x64] ss:$40 sps:$4 sm:$0xff]  }
 0x246   :  { %v713_v37 = vsel %vm351_vm0, %v711_v33, 0.0  ;;  %v712_v18 = vsel %vm351_vm0, %v710_v27, 0.0  ;;  %v5803_v33 = vld [vmem:[#allocation9 + $0x84] ss:$20 sps:$4 sm:$0xff]  }
 0x247   :  { %v656_v41 = vadd.f32 %v655_v14, %v654_v31  ;;  %v714_v45 = vadd.f32 %v713_v37, %v712_v18  ;;  %v612_v28 = vpop.permute.xlu0 %611  ;;  %v600_v53 = vadd.f32 %v599_v47, %v598_v30  ;;  %v672_v40 = vpop.permute.xlu1 %671  ;;  %v5797_v30 = vld [vmem:[#allocation9 + $0x5c] ss:$20 sps:$4 sm:$0xff]   ;;  %v5801_v14 = vld [vmem:[#allocation9 + $0x80] ss:$20 sps:$4 sm:$0xff]  }
 0x248   :  { %v5768_v31 = vld [vmem:[#allocation6 + $0x10] ss:$40 sps:$4 sm:$0xff]   ;;  %v5771_v27 = vld [vmem:[#allocation6 + $0x60] ss:$40 sps:$4 sm:$0xff]  }
 0x249   :  { %v657_v50 = vrot.slane %v656_v41, 2  ;;  %v715_v51 = vrot.slane %v714_v45, 4  ;;  %v614_v42 = vsel %vm351_vm0, %v600_v53, %v612_v28  ;;  %v5809_v37 = vld [vmem:[#allocation9 + $0xac] ss:$20 sps:$4 sm:$0xff]   ;;  %v5815_v47 = vld [vmem:[#allocation9 + $0xd4] ss:$20 sps:$4 sm:$0xff]  }
 0x24a   :  { %v736_v59 = vrot.slane %v614_v42, 7  ;;  %v5774_v18 = vld [vmem:[#allocation6 + $0x18] ss:$40 sps:$4 sm:$0xff]  }
 0x24b   :  { %v658_v34 = vadd.f32 %v657_v50, %v656_v41  ;;  %v716_v52 = vadd.f32 %v715_v51, %v714_v45  ;;  %v552_v56 = vpop.permute.xlu0 %551  ;;  %v732_v2 = vpop.permute.xlu1 %731  ;;  %v5779_v41 = vld [vmem:[#allocation6 + $0x6c] ss:$40 sps:$4 sm:$0xff]   ;;  %v5821_v28 = vld [vmem:[#allocation9 + $0xfc] ss:$20 sps:$4 sm:$0xff]  }
 0x24c   :  { %v554_v1 = vsel %vm351_vm0, %v540_v39, %v552_v56  ;;  %v5807_v45 = vld [vmem:[#allocation9 + $0xa8] ss:$20 sps:$4 sm:$0xff]   ;;  %v5782_v50 = vld [vmem:[#allocation9 + $0x4] ss:$20 sps:$4 sm:$0xff]  }
 0x24d   :  { %v717_v38 = vrot.slane %v716_v52, 2  ;;  %v659_v44 = vrot.slane %v658_v34, 1  ;;  %v745_v5 = vsel %vm744_vm3, %v554_v1, %v736_v59  ;;  %v5813_v51 = vld [vmem:[#allocation9 + $0xd0] ss:$20 sps:$4 sm:$0xff]   ;;  %v5819_v53 = vld [vmem:[#allocation9 + $0xf8] ss:$20 sps:$4 sm:$0xff]  }
 0x24e   :  { %v5800_v42 = vld [vmem:[#allocation9 + $0x7c] ss:$20 sps:$4 sm:$0xff]   ;;  %v5806_v39 = vld [vmem:[#allocation9 + $0xa4] ss:$20 sps:$4 sm:$0xff]   ;;  %v5812_v1 = vld [vmem:[#allocation9 + $0xcc] ss:$20 sps:$4 sm:$0xff]  }
 0x24f   :  { %v718_v43 = vadd.f32 %v717_v38, %v716_v52  ;;  %v660_v55 = vadd.f32 %v659_v44, %v658_v34  ;;  %v5780_v34 = vld [vmem:[#allocation9] ss:$20 sps:$4 sm:$0xff]   ;;  %v5827_v38 = vld [vmem:[#allocation9 + $0x124] ss:$20 sps:$4 sm:$0xff]   ;;  %v5786_v44 = vld [vmem:[#allocation9 + $0x28] ss:$20 sps:$4 sm:$0xff]  }
 0x250   :  { %v5788_v52 = vld [vmem:[#allocation9 + $0x2c] ss:$20 sps:$4 sm:$0xff]   ;;  %v5831_v56 = vld [vmem:[#allocation9 + $0x148] ss:$20 sps:$4 sm:$0xff]   ;;  %v5837_v59 = vld [vmem:[#allocation9 + $0x170] ss:$20 sps:$4 sm:$0xff]  }
 0x251   :  { %v674_v57 = vsel %vm351_vm0, %v660_v55, %v672_v40  ;;  %v719_v58 = vrot.slane %v718_v43, 1  ;;  %v5825_v40 = vld [vmem:[#allocation9 + $0x120] ss:$20 sps:$4 sm:$0xff]   ;;  %v5792_v55 = vld [vmem:[#allocation9 + $0x50] ss:$20 sps:$4 sm:$0xff]  }
 0x252   :  { %v739_v61 = vrot.slane %v674_v57, 6  ;;  %v5839_v57 = vld [vmem:[#allocation9 + $0x174] ss:$20 sps:$4 sm:$0xff]  }
 0x253   :  { %v720_v62 = vadd.f32 %v719_v58, %v718_v43  ;;  %v5833_v43 = vld [vmem:[#allocation9 + $0x14c] ss:$20 sps:$4 sm:$0xff]  }
 0x254   :  { %v747_v7 = vsel %vm746_vm4, %v745_v5, %v739_v61  ;;  %v5798_v58 = vld [vmem:[#allocation9 + $0x78] ss:$20 sps:$4 sm:$0xff]   ;;  %v5845_v61 = vld [vmem:[#allocation9 + $0x19c] ss:$20 sps:$4 sm:$0xff]   ;;  %v5818_v5 = vld [vmem:[#allocation9 + $0xf4] ss:$20 sps:$4 sm:$0xff]  }
 0x255   :  { %v734_v3 = vsel %vm351_vm0, %v720_v62, %v732_v2  ;;  %v5804_v62 = vld [vmem:[#allocation9 + $0xa0] ss:$20 sps:$4 sm:$0xff]   ;;  %v5843_v2 = vld [vmem:[#allocation9 + $0x198] ss:$20 sps:$4 sm:$0xff]  }
 0x256   :  { %v742_v4 = vrot.slane %v734_v3, 5  ;;  %v5851_v3 = vld [vmem:[#allocation9 + $0x1c4] ss:$20 sps:$4 sm:$0xff]  }
 0x258   :  { %v749_v8 = vsel %vm748_vm5, %v747_v7, %v742_v4  ;;  %v5810_v4 = vld [vmem:[#allocation9 + $0xc8] ss:$20 sps:$4 sm:$0xff]   ;;  %v5857_v7 = vld [vmem:[#allocation9 + $0x1ec] ss:$20 sps:$4 sm:$0xff]  }
 0x259   :  { %5526 = vmatmul.mubr.msk.f32.vlgmr.msra.gmra.mrb[8].mxu1 %vm765_vm6, %v749_v8  ;;  %v5816_v8 = vld [vmem:[#allocation9 + $0xf0] ss:$20 sps:$4 sm:$0xff]   ;;  %vm4772_vm6 = vcmask 11264  }
 0x25a   :  { %1019 = vmatpush1.bf16.msra.mxu1 %v5750_v6  ;;  %1050 = vmatprep.mubr.bf16.mxu1 %v6542_v16  ;;  %v5849_v6 = vld [vmem:[#allocation9 + $0x1c0] ss:$20 sps:$4 sm:$0xff]  }
 0x25b   :  { %1020 = vmatprep.subr.bf16.mxu1 %v5758_v10  ;;  %v5824_v10 = vld [vmem:[#allocation9 + $0x11c] ss:$20 sps:$4 sm:$0xff]  }
 0x25e   :  { %1021 = vmatpush1.bf16.msra.mxu1 %v5756_v13  ;;  %v5863_v13 = vld [vmem:[#allocation9 + $0x214] ss:$20 sps:$4 sm:$0xff]  }
 0x25f   :  { %1059 = vmatprep.subr.bf16.mxu1 %v5764_v17  ;;  %v5861_v17 = vld [vmem:[#allocation9 + $0x210] ss:$20 sps:$4 sm:$0xff]  }
 0x32c   :  { %v835_v21 = vpop.f32.mrb[8].mxu1 }
 0x32d   :  { %v836_v22 = vadd.f32 %v4817_v20, %v835_v21  ;;  %v5527_v48 = vpop.f32.mrb[9].mxu1  ;;  %v5836_v20 = vld [vmem:[#allocation9 + $0x16c] ss:$20 sps:$4 sm:$0xff]   ;;  %v5834_v21 = vld [vmem:[#allocation9 + $0x168] ss:$20 sps:$4 sm:$0xff]  }
 0x32e   :  { %v5840_v48 = vld [vmem:[#allocation9 + $0x190] ss:$20 sps:$4 sm:$0xff]  }
 0x32f   :  { %v839_v23 = vmax.f32 %v836_v22, 0.0  ;;  %v5842_v22 = vld [vmem:[#allocation9 + $0x194] ss:$20 sps:$4 sm:$0xff]  }
 0x331   :  { %v840_v24 = vpack.c.bf16 %v839_v23, %v839_v23  ;;  %v5848_v23 = vld [vmem:[#allocation9 + $0x1bc] ss:$20 sps:$4 sm:$0xff]  }
 0x333   :  { %4839 = vmatmul.mubr.msk.bf16.vlgmr.msra.gmra.mrb[12].mxu1 %vm351_vm0, %v840_v24  ;;  %4843 = vmatmul.mubr.msk.bf16.vlgmr.msra.gmra.mrb[16].mxu0 %vm351_vm0, %v840_v24 }
 0x334   :  { %1060 = vmatpush1.bf16.msra.mxu1 %v5762_v46  ;;  %1091 = vmatprep.mubr.bf16.mxu1 %v6542_v16  ;;  %v5846_v46 = vld [vmem:[#allocation9 + $0x1b8] ss:$20 sps:$4 sm:$0xff]  }
 0x335   :  { %1061 = vmatprep.subr.bf16.mxu1 %v5767_v25  ;;  %4056 = vmatpush1.bf16.msra.mxu0 %v5783_v26  ;;  %v5852_v25 = vld [vmem:[#allocation9 + $0x1e0] ss:$20 sps:$4 sm:$0xff]  }
 0x336   :  { %4057 = vmatprep.subr.bf16.mxu0 %v5791_v11  ;;  %v5860_v26 = vld [vmem:[#allocation9 + $0x20c] ss:$20 sps:$4 sm:$0xff]   ;;  %v5858_v11 = vld [vmem:[#allocation9 + $0x208] ss:$20 sps:$4 sm:$0xff]  }
 0x338   :  { %1062 = vmatpush1.bf16.msra.mxu1 %v5765_v60  ;;  %v5866_v60 = vld [vmem:[#allocation9 + $0x234] ss:$20 sps:$4 sm:$0xff]  }
 0x339   :  { %1100 = vmatprep.subr.bf16.mxu1 %v5770_v29  ;;  %4058 = vmatpush1.bf16.msra.mxu0 %v5789_v63  ;;  %v5869_v29 = vld [vmem:[#allocation9 + $0x23c] ss:$20 sps:$4 sm:$0xff]  }
 0x33a   :  { %4059 = vmatprep.subr.bf16.mxu0 %v5797_v30  ;;  %v5864_v63 = vld [vmem:[#allocation9 + $0x230] ss:$20 sps:$4 sm:$0xff]   ;;  %v5867_v30 = vld [vmem:[#allocation9 + $0x238] ss:$20 sps:$4 sm:$0xff]  }
 0x33b   :  { %4840 = vmatmul.mubr.msk.bf16.vlgmr.msra.gmra.mrb[16].mxu1 %vm351_vm0, %v840_v24 }
 0x33c   :  { %1101 = vmatpush1.bf16.msra.mxu1 %v5768_v31  ;;  %1132 = vmatprep.mubr.bf16.mxu1 %v6542_v16  ;;  %v5872_v31 = vld [vmem:[#allocation9 + $0x25c] ss:$20 sps:$4 sm:$0xff]  }
 0x33d   :  { %1102 = vmatprep.subr.bf16.mxu1 %v5773_v9  ;;  %4060 = vmatpush1.bf16.msra.mxu0 %v5795_v32  ;;  %v5875_v9 = vld [vmem:[#allocation9 + $0x264] ss:$20 sps:$4 sm:$0xff]  }
 0x33e   :  { %4061 = vmatprep.subr.bf16.mxu0 %v5803_v33  ;;  %v5870_v32 = vld [vmem:[#allocation9 + $0x258] ss:$20 sps:$4 sm:$0xff]   ;;  %v5873_v33 = vld [vmem:[#allocation9 + $0x260] ss:$20 sps:$4 sm:$0xff]  }
 0x340   :  { %1103 = vmatpush1.bf16.msra.mxu1 %v5771_v27  ;;  %v5878_v27 = vld [vmem:[#allocation9 + $0x284] ss:$20 sps:$4 sm:$0xff]  }
 0x341   :  { %1141 = vmatprep.subr.bf16.mxu1 %v5776_v36  ;;  %4062 = vmatpush1.bf16.msra.mxu0 %v5801_v14  ;;  %v5881_v36 = vld [vmem:[#allocation9 + $0x28c] ss:$20 sps:$4 sm:$0xff]   ;;  %v865_v14 = vlaneseq }
 0x342   :  { %4063 = vmatprep.subr.bf16.mxu0 %v5809_v37 }
 0x343   :  { %4841 = vmatmul.mubr.msk.bf16.vlgmr.msra.gmra.mrb[20].mxu1 %vm351_vm0, %v840_v24  ;;  %v6940_v37 = vshrl.u32 %v865_v14, 7  ;;  %v5909_v14 = vld [vmem:[#allocation9 + $0x350] ss:$20 sps:$4 sm:$0xff]  }
 0x344   :  { %1142 = vmatpush1.bf16.msra.mxu1 %v5774_v18  ;;  %1173 = vmatprep.mubr.bf16.mxu1 %v6542_v16  ;;  %v5830_v16 = vld [vmem:[#allocation9 + $0x144] ss:$20 sps:$4 sm:$0xff]  }
 0x345   :  { %1143 = vmatprep.subr.bf16.mxu1 %v5779_v41  ;;  %4064 = vmatpush1.bf16.msra.mxu0 %v5807_v45  ;;  %v6943_v18 = vsub.s32 0, %v6940_v37  ;;  %v6945_v41 = vld [vmem:[#allocation7] sm:$0xff]  ;;  %v6948_v45 = vsub.s32 1, %v6940_v37 }
 0x346   :  { %4065 = vmatprep.subr.bf16.mxu0 %v5815_v47 }
 0x347   :  { %v868_v47 = vrot.slane %v6945_v41, %v6943_v18 }
 0x348   :  { %1144 = vmatpush1.bf16.msra.mxu1 %v5777_v49  ;;  %v872_v49 = vrot.slane %v6945_v41, %v6948_v45 }
 0x349   :  { %3850 = vmatprep.subr.bf16.mxu1 %v5782_v50  ;;  %4066 = vmatpush1.bf16.msra.mxu0 %v5813_v51 }
 0x34a   :  { %4067 = vmatprep.subr.bf16.mxu0 %v5821_v28 }
 0x34b   :  { %4842 = vmatmul.mubr.msk.bf16.vlgmr.msra.gmra.mrb[24].mxu1 %vm351_vm0, %v840_v24  ;;  %v5854_v24 = vld [vmem:[#allocation9 + $0x1e4] ss:$20 sps:$4 sm:$0xff]  }
 0x34c   :  { %3851 = vmatpush1.bf16.msra.mxu1 %v5780_v34 }
 0x34d   :  { %3852 = vmatprep.subr.bf16.mxu1 %v5788_v52  ;;  %4068 = vmatpush1.bf16.msra.mxu0 %v5819_v53 }
 0x34e   :  { %4069 = vmatprep.subr.bf16.mxu0 %v5827_v38 }
 0x350   :  { %3853 = vmatpush1.bf16.msra.mxu1 %v5786_v44 }
 0x351   :  { %3854 = vmatprep.subr.bf16.mxu1 %v5794_v54  ;;  %4070 = vmatpush1.bf16.msra.mxu0 %v5825_v40  ;;  %v879_v54 = vsub.s32 3, %v6940_v37 }
 0x352   :  { %4071 = vmatprep.subr.bf16.mxu0 %v5833_v43 }
 0x354   :  { %3855 = vmatpush1.bf16.msra.mxu1 %v5792_v55 }
 0x355   :  { %3856 = vmatprep.subr.bf16.mxu1 %v5800_v42  ;;  %4072 = vmatpush1.bf16.msra.mxu0 %v5831_v56 }
 0x356   :  { %4073 = vmatprep.subr.bf16.mxu0 %v5839_v57  ;;  %v880_v57 = vrot.slane %v6945_v41, %v879_v54 }
 0x358   :  { %3857 = vmatpush1.bf16.msra.mxu1 %v5798_v58 }
 0x359   :  { %3858 = vmatprep.subr.bf16.mxu1 %v5806_v39  ;;  %4074 = vmatpush1.bf16.msra.mxu0 %v5837_v59  ;;  %v5876_v59 = vld [vmem:[#allocation9 + $0x280] ss:$20 sps:$4 sm:$0xff]  }
 0x35a   :  { %4075 = vmatprep.subr.bf16.mxu0 %v5845_v61  ;;  %v5879_v61 = vld [vmem:[#allocation9 + $0x288] ss:$20 sps:$4 sm:$0xff]  }
 0x35c   :  { %3859 = vmatpush1.bf16.msra.mxu1 %v5804_v62 }
 0x35d   :  { %3860 = vmatprep.subr.bf16.mxu1 %v5812_v1  ;;  %4076 = vmatpush1.bf16.msra.mxu0 %v5843_v2  ;;  %v5884_v2 = vld [vmem:[#allocation9 + $0x2ac] ss:$20 sps:$4 sm:$0xff]  }
 0x35e   :  { %4077 = vmatprep.subr.bf16.mxu0 %v5851_v3  ;;  %v5887_v3 = vld [vmem:[#allocation9 + $0x2b4] ss:$20 sps:$4 sm:$0xff]  }
 0x360   :  { %3861 = vmatpush1.bf16.msra.mxu1 %v5810_v4 }
 0x361   :  { %3862 = vmatprep.subr.bf16.mxu1 %v5818_v5  ;;  %4078 = vmatpush1.bf16.msra.mxu0 %v5849_v6 }
 0x362   :  { %4079 = vmatprep.subr.bf16.mxu0 %v5857_v7  ;;  %v5882_v7 = vld [vmem:[#allocation9 + $0x2a8] ss:$20 sps:$4 sm:$0xff]  }
 0x364   :  { %3863 = vmatpush1.bf16.msra.mxu1 %v5816_v8 }
 0x365   :  { %3864 = vmatprep.subr.bf16.mxu1 %v5824_v10  ;;  %4080 = vmatpush1.bf16.msra.mxu0 %v5855_v12  ;;  %v5885_v10 = vld [vmem:[#allocation9 + $0x2b0] ss:$20 sps:$4 sm:$0xff]   ;;  %v5890_v12 = vld [vmem:[#allocation9 + $0x2d4] ss:$20 sps:$4 sm:$0xff]  }
 0x366   :  { %4081 = vmatprep.subr.bf16.mxu0 %v5863_v13 }
 0x368   :  { %3865 = vmatpush1.bf16.msra.mxu1 %v5822_v15  ;;  %v5893_v15 = vld [vmem:[#allocation9 + $0x2dc] ss:$20 sps:$4 sm:$0xff]  }
 0x369   :  { %3866 = vmatprep.subr.bf16.mxu1 %v5830_v16  ;;  %4082 = vmatpush1.bf16.msra.mxu0 %v5861_v17  ;;  %v5888_v17 = vld [vmem:[#allocation9 + $0x2d0] ss:$20 sps:$4 sm:$0xff]  }
 0x36a   :  { %4083 = vmatprep.subr.bf16.mxu0 %v5869_v29  ;;  %v5900_v29 = vld [vmem:[#allocation9 + $0x320] ss:$20 sps:$4 sm:$0xff]  }
 0x36c   :  { %3867 = vmatpush1.bf16.msra.mxu1 %v5828_v19 }
 0x36d   :  { %3868 = vmatprep.subr.bf16.mxu1 %v5836_v20  ;;  %4084 = vmatpush1.bf16.msra.mxu0 %v5867_v30  ;;  %v5891_v20 = vld [vmem:[#allocation9 + $0x2d8] ss:$20 sps:$4 sm:$0xff]  }
 0x36e   :  { %4085 = vmatprep.subr.bf16.mxu0 %v5875_v9  ;;  %v5911_v9 = vld [vmem:[#allocation9 + $0x354] ss:$20 sps:$4 sm:$0xff]  }
 0x370   :  { %3869 = vmatpush1.bf16.msra.mxu1 %v5834_v21 }
 0x371   :  { %3870 = vmatprep.subr.bf16.mxu1 %v5842_v22  ;;  %4086 = vmatpush1.bf16.msra.mxu0 %v5873_v33  ;;  %v5896_v22 = vld [vmem:[#allocation9 + $0x2fc] ss:$20 sps:$4 sm:$0xff]  }
 0x372   :  { %4096 = vmatprep.subr.bf16.mxu0 %v5881_v36  ;;  %v5906_v36 = vld [vmem:[#allocation9 + $0x348] ss:$20 sps:$4 sm:$0xff]  }
 0x374   :  { %3871 = vmatpush1.bf16.msra.mxu1 %v5840_v48  ;;  %v5899_v48 = vld [vmem:[#allocation9 + $0x304] ss:$20 sps:$4 sm:$0xff]  }
 0x375   :  { %3872 = vmatprep.subr.bf16.mxu1 %v5848_v23 }
 0x378   :  { %3873 = vmatpush1.bf16.msra.mxu1 %v5846_v46 }
 0x379   :  { %3874 = vmatprep.subr.bf16.mxu1 %v5854_v24 }
 0x37c   :  { %3875 = vmatpush1.bf16.msra.mxu1 %v5852_v25  ;;  %v5894_v25 = vld [vmem:[#allocation9 + $0x2f8] ss:$20 sps:$4 sm:$0xff]  }
 0x37d   :  { %3876 = vmatprep.subr.bf16.mxu1 %v5860_v26  ;;  %v5897_v26 = vld [vmem:[#allocation9 + $0x300] ss:$20 sps:$4 sm:$0xff]  }
 0x380   :  { %3877 = vmatpush1.bf16.msra.mxu1 %v5858_v11  ;;  %v5902_v11 = vld [vmem:[#allocation9 + $0x324] ss:$20 sps:$4 sm:$0xff]  }
 0x381   :  { %3878 = vmatprep.subr.bf16.mxu1 %v5866_v60  ;;  %v5905_v60 = vld [vmem:[#allocation9 + $0x32c] ss:$20 sps:$4 sm:$0xff]  }
 0x384   :  { %3879 = vmatpush1.bf16.msra.mxu1 %v5864_v63  ;;  %v5903_v63 = vld [vmem:[#allocation9 + $0x328] ss:$20 sps:$4 sm:$0xff]  }
 0x385   :  { %3880 = vmatprep.subr.bf16.mxu1 %v5872_v31  ;;  %v5908_v31 = vld [vmem:[#allocation9 + $0x34c] ss:$20 sps:$4 sm:$0xff]  }
 0x388   :  { %3881 = vmatpush1.bf16.msra.mxu1 %v5870_v32 }
 0x389   :  { %3891 = vmatprep.subr.bf16.mxu1 %v5878_v27 }
 0x406   :  { %v1052_v50 = vpop.f32.mrb[12].mxu1  ;;  %v6954_v51 = vpop.f32.mrb[16].mxu0 }
 0x407   :  { %v1053_v28 = vadd.f32 %v1052_v50, %v868_v47  ;;  %v1054_v34 = vpop.f32.mrb[13].mxu1  ;;  %v6956_v52 = vpop.f32.mrb[17].mxu0  ;;  %v5914_v47 = vld [vmem:[#allocation9 + $0x374] ss:$20 sps:$4 sm:$0xff]   ;;  %v5912_v50 = vld [vmem:[#allocation9 + $0x370] ss:$20 sps:$4 sm:$0xff]  }
 0x408   :  { %v1055_v53 = vadd.f32 %v1054_v34, %v872_v49  ;;  %v1056_v38 = vpop.f32.mrb[14].mxu1  ;;  %v1220_v44 = vpop.f32.mrb[18].mxu0  ;;  %v5917_v49 = vld [vmem:[#allocation9 + $0x37c] ss:$20 sps:$4 sm:$0xff]  }
 0x409   :  { %vm1223_vm7 = vcmp.gt.f32.partialorder %v1053_v28, 0.0  ;;  %v1233_v40 = vmul.f32 0.1, %v1053_v28  ;;  %v1057_v42 = vpop.f32.mrb[15].mxu1  ;;  %v1221_v56 = vpop.f32.mrb[19].mxu0 }
 0x40a   :  { %vm1224_vm8 = vcmp.gt.f32.partialorder %v1055_v53, 0.0  ;;  %v1234_v43 = vmul.f32 0.1, %v1055_v53  ;;  %v5920_v34 = vld [vmem:[#allocation9 + $0x39c] ss:$20 sps:$4 sm:$0xff]  }
 0x40b   :  { %v1243_v55 = vsel %vm1223_vm7, %v1053_v28, %v1233_v40  ;;  %v5915_v28 = vld [vmem:[#allocation9 + $0x378] ss:$20 sps:$4 sm:$0xff]   ;;  %v5921_v44 = vld [vmem:[#allocation9 + $0x3a0] ss:$20 sps:$4 sm:$0xff]   ;;  %v5927_v42 = vld [vmem:[#allocation9 + $0x3c8] ss:$20 sps:$4 sm:$0xff]  }
 0x40c   :  { %v1244_v58 = vsel %vm1224_vm8, %v1055_v53, %v1234_v43  ;;  %v6964_v62 = vpack.c.bf16 %v1243_v55, %v1243_v55  ;;  %v5923_v53 = vld [vmem:[#allocation9 + $0x3a4] ss:$20 sps:$4 sm:$0xff]   ;;  %v5929_v43 = vld [vmem:[#allocation9 + $0x3cc] ss:$20 sps:$4 sm:$0xff]  }
 0x40d   :  { %v6962_v39 = vpack.c.bf16 %v1244_v58, %v1244_v58  ;;  %v5918_v38 = vld [vmem:[#allocation9 + $0x398] ss:$20 sps:$4 sm:$0xff]   ;;  %v5924_v55 = vld [vmem:[#allocation9 + $0x3c0] ss:$20 sps:$4 sm:$0xff]   ;;  %v5930_v58 = vld [vmem:[#allocation9 + $0x3e8] ss:$20 sps:$4 sm:$0xff]  }
 0x40e   :  { %v6966_v1 = vpop.f32.mrb[16].mxu1  ;;  %v5926_v40 = vld [vmem:[#allocation9 + $0x3c4] ss:$20 sps:$4 sm:$0xff]   ;;  %v5932_v56 = vld [vmem:[#allocation9 + $0x3ec] ss:$20 sps:$4 sm:$0xff]  }
 0x40f   :  { %v1095_v4 = vpop.f32.mrb[17].mxu1  ;;  %3882 = vmatprep.mubr.bf16.mxu1 %v6962_v39  ;;  %4087 = vmatprep.mubr.bf16.mxu0 %v6962_v39 }
 0x410   :  { %v1096_v5 = vadd.f32 %v1095_v4, %v880_v57  ;;  %v1097_v6 = vpop.f32.mrb[18].mxu1  ;;  %3883 = vmatmul.mubr.bf16.vlgmr.msra.gmra.mrb[28].mxu1 %v6964_v62  ;;  %4088 = vmatmul.mubr.bf16.vlgmr.msra.gmra.mrb[20].mxu0 %v6964_v62  ;;  %v5935_v57 = vld [vmem:[#allocation9 + $0x3f4] ss:$20 sps:$4 sm:$0xff]   ;;  %v5939_v4 = vld [vmem:[#allocation9 + $0x418] ss:$20 sps:$4 sm:$0xff]  }
 0x411   :  { %3892 = vmatpush1.bf16.msra.mxu1 %v5876_v59  ;;  %4097 = vmatpush1.bf16.msra.mxu0 %v5879_v61  ;;  %v1098_v8 = vpop.f32.mrb[19].mxu1  ;;  %v5933_v59 = vld [vmem:[#allocation9 + $0x3f0] ss:$20 sps:$4 sm:$0xff]   ;;  %v5938_v61 = vld [vmem:[#allocation9 + $0x414] ss:$20 sps:$4 sm:$0xff]  }
 0x412   :  { %vm1226_vm9 = vcmp.gt.f32.partialorder %v1096_v5, 0.0  ;;  %v1236_v13 = vmul.f32 0.1, %v1096_v5  ;;  %3893 = vmatprep.subr.bf16.mxu1 %v5884_v2  ;;  %4098 = vmatprep.subr.bf16.mxu0 %v5887_v3  ;;  %v5941_v2 = vld [vmem:[#allocation9 + $0x41c] ss:$20 sps:$4 sm:$0xff]  }
 0x413   :  { %v5936_v3 = vld [vmem:[#allocation9 + $0x410] ss:$20 sps:$4 sm:$0xff]   ;;  %v5945_v8 = vld [vmem:[#allocation9 + $0x440] ss:$20 sps:$4 sm:$0xff]  }
 0x414   :  { %v1246_v16 = vsel %vm1226_vm9, %v1096_v5, %v1236_v13  ;;  %v5944_v5 = vld [vmem:[#allocation9 + $0x43c] ss:$20 sps:$4 sm:$0xff]   ;;  %v5947_v6 = vld [vmem:[#allocation9 + $0x444] ss:$20 sps:$4 sm:$0xff]   ;;  %v875_v13 = vsub.s32 2, %v6940_v37 }
 0x415   :  { %3894 = vmatpush1.bf16.msra.mxu1 %v5882_v7  ;;  %4099 = vmatpush1.bf16.msra.mxu0 %v5885_v10  ;;  %v6972_v19 = vpack.c.bf16 %v1246_v16, %v1246_v16  ;;  %v5942_v7 = vld [vmem:[#allocation9 + $0x438] ss:$20 sps:$4 sm:$0xff]   ;;  %v5948_v16 = vld [vmem:[#allocation9 + $0x460] ss:$20 sps:$4 sm:$0xff]  }
 0x416   :  { %v6974_v21 = vpop.f32.mrb[20].mxu1  ;;  %3895 = vmatprep.subr.bf16.mxu1 %v5890_v12  ;;  %4100 = vmatprep.subr.bf16.mxu0 %v5893_v15  ;;  %v5950_v10 = vld [vmem:[#allocation9 + $0x464] ss:$20 sps:$4 sm:$0xff]   ;;  %v5953_v12 = vld [vmem:[#allocation9 + $0x46c] ss:$20 sps:$4 sm:$0xff]   ;;  %v887_v15 = vsub.s32 5, %v6940_v37 }
 0x417   :  { %v6976_v23 = vpop.f32.mrb[21].mxu1  ;;  %3923 = vmatprep.mubr.bf16.mxu1 %v6972_v19  ;;  %4128 = vmatprep.mubr.bf16.mxu0 %v6972_v19 }
 0x418   :  { %v1138_v46 = vpop.f32.mrb[22].mxu1 }
 0x419   :  { %3896 = vmatpush1.bf16.msra.mxu1 %v5888_v17  ;;  %4101 = vmatpush1.bf16.msra.mxu0 %v5891_v20  ;;  %v1139_v24 = vpop.f32.mrb[23].mxu1  ;;  %v5951_v17 = vld [vmem:[#allocation9 + $0x468] ss:$20 sps:$4 sm:$0xff]   ;;  %v5956_v20 = vld [vmem:[#allocation9 + $0x48c] ss:$20 sps:$4 sm:$0xff]   ;;  %v888_v46 = vrot.slane %v6945_v41, %v887_v15 }
 0x41a   :  { %3897 = vmatprep.subr.bf16.mxu1 %v5896_v22  ;;  %4102 = vmatprep.subr.bf16.mxu0 %v5899_v48  ;;  %v5959_v22 = vld [vmem:[#allocation9 + $0x494] ss:$20 sps:$4 sm:$0xff]   ;;  %v876_v48 = vrot.slane %v6945_v41, %v875_v13  ;;  %v6005_v15 = vld [vmem:[#allocation9 + $0x5d0] ss:$20 sps:$4 sm:$0xff]  }
 0x41b   :  { %v5954_v24 = vld [vmem:[#allocation9 + $0x488] ss:$20 sps:$4 sm:$0xff]  }
 0x41d   :  { %3898 = vmatpush1.bf16.msra.mxu1 %v5894_v25  ;;  %4103 = vmatpush1.bf16.msra.mxu0 %v5897_v26  ;;  %v5957_v25 = vld [vmem:[#allocation9 + $0x490] ss:$20 sps:$4 sm:$0xff]   ;;  %v5962_v26 = vld [vmem:[#allocation9 + $0x4b4] ss:$20 sps:$4 sm:$0xff]  }
 0x41e   :  { %v6980_v30 = vpop.f32.mrb[24].mxu1  ;;  %3899 = vmatprep.subr.bf16.mxu1 %v5902_v11  ;;  %4104 = vmatprep.subr.bf16.mxu0 %v5905_v60  ;;  %v5965_v11 = vld [vmem:[#allocation9 + $0x4bc] ss:$20 sps:$4 sm:$0xff]   ;;  %v1094_v60 = vadd.f32 %v6966_v1, %v876_v48  ;;  %v5974_v1 = vld [vmem:[#allocation9 + $0x504] ss:$20 sps:$4 sm:$0xff]  }
 0x41f   :  { %v6982_v32 = vpop.f32.mrb[25].mxu1  ;;  %v6016_v48 = vld [vmem:[#allocation9 + $0x61c] ss:$20 sps:$4 sm:$0xff]  }
 0x420   :  { %v1179_v33 = vpop.f32.mrb[26].mxu1  ;;  %vm1225_vm10 = vcmp.gt.f32.partialorder %v1094_v60, 0.0 }
 0x421   :  { %3900 = vmatpush1.bf16.msra.mxu1 %v5900_v29  ;;  %4105 = vmatpush1.bf16.msra.mxu0 %v5903_v63  ;;  %v1180_v27 = vpop.f32.mrb[27].mxu1  ;;  %v1137_v29 = vadd.f32 %v6976_v23, %v888_v46  ;;  %v5960_v63 = vld [vmem:[#allocation9 + $0x4b0] ss:$20 sps:$4 sm:$0xff]   ;;  %v5977_v23 = vld [vmem:[#allocation9 + $0x50c] ss:$20 sps:$4 sm:$0xff]  }
 0x422   :  { %3901 = vmatprep.subr.bf16.mxu1 %v5908_v31  ;;  %4106 = vmatprep.subr.bf16.mxu0 %v5911_v9  ;;  %v5963_v31 = vld [vmem:[#allocation9 + $0x4b8] ss:$20 sps:$4 sm:$0xff]   ;;  %v5968_v9 = vld [vmem:[#allocation9 + $0x4dc] ss:$20 sps:$4 sm:$0xff]   ;;  %v1235_v27 = vmul.f32 0.1, %v1094_v60 }
 0x423   :  { %v5971_v33 = vld [vmem:[#allocation9 + $0x4e4] ss:$20 sps:$4 sm:$0xff]   ;;  %vm1228_vm11 = vcmp.gt.f32.partialorder %v1137_v29, 0.0 }
 0x424   :  { %v6019_v46 = vld [vmem:[#allocation9 + $0x624] ss:$20 sps:$4 sm:$0xff]  }
 0x425   :  { %3902 = vmatpush1.bf16.msra.mxu1 %v5906_v36  ;;  %4107 = vmatpush1.bf16.msra.mxu0 %v5909_v14  ;;  %v1238_v36 = vmul.f32 0.1, %v1137_v29  ;;  %v5966_v14 = vld [vmem:[#allocation9 + $0x4d8] ss:$20 sps:$4 sm:$0xff]  }
 0x426   :  { %3903 = vmatprep.subr.bf16.mxu1 %v5914_v47  ;;  %4108 = vmatprep.subr.bf16.mxu0 %v5917_v49  ;;  %v5969_v47 = vld [vmem:[#allocation9 + $0x4e0] ss:$20 sps:$4 sm:$0xff]   ;;  %v1245_v49 = vsel %vm1225_vm10, %v1094_v60, %v1235_v27 }
 0x427   :  { %v6020_v60 = vld [vmem:[#allocation9 + $0x640] ss:$20 sps:$4 sm:$0xff]  }
 0x428   :  { %v6034_v27 = vld [vmem:[#allocation9 + $0x694] ss:$20 sps:$4 sm:$0xff]  }
 0x429   :  { %3904 = vmatpush1.bf16.msra.mxu1 %v5912_v50  ;;  %4109 = vmatpush1.bf16.msra.mxu0 %v5915_v28  ;;  %v1248_v50 = vsel %vm1228_vm11, %v1137_v29, %v1238_v36  ;;  %v5972_v28 = vld [vmem:[#allocation9 + $0x500] ss:$20 sps:$4 sm:$0xff]   ;;  %v6023_v29 = vld [vmem:[#allocation9 + $0x648] ss:$20 sps:$4 sm:$0xff]  }
 0x42a   :  { %3905 = vmatprep.subr.bf16.mxu1 %v5920_v34  ;;  %4110 = vmatprep.subr.bf16.mxu0 %v5923_v53  ;;  %v6992_v34 = vpack.c.bf16 %v1245_v49, %v1245_v49  ;;  %v5975_v53 = vld [vmem:[#allocation9 + $0x508] ss:$20 sps:$4 sm:$0xff]   ;;  %v6038_v49 = vld [vmem:[#allocation9 + $0x6b8] ss:$20 sps:$4 sm:$0xff]  }
 0x42b   :  { %v6037_v36 = vld [vmem:[#allocation9 + $0x69c] ss:$20 sps:$4 sm:$0xff]  }
 0x42d   :  { %3906 = vmatpush1.bf16.msra.mxu1 %v5918_v38  ;;  %4111 = vmatpush1.bf16.msra.mxu0 %v5921_v44  ;;  %v6994_v38 = vpack.c.bf16 %v1248_v50, %v1248_v50  ;;  %v5980_v44 = vld [vmem:[#allocation9 + $0x52c] ss:$20 sps:$4 sm:$0xff]  }
 0x42e   :  { %3907 = vmatprep.subr.bf16.mxu1 %v5926_v40  ;;  %4112 = vmatprep.subr.bf16.mxu0 %v5929_v43  ;;  %v5983_v40 = vld [vmem:[#allocation9 + $0x534] ss:$20 sps:$4 sm:$0xff]  }
 0x42f   :  { %v5978_v43 = vld [vmem:[#allocation9 + $0x528] ss:$20 sps:$4 sm:$0xff]   ;;  %v6041_v50 = vld [vmem:[#allocation9 + $0x6c0] ss:$20 sps:$4 sm:$0xff]  }
 0x431   :  { %3908 = vmatpush1.bf16.msra.mxu1 %v5924_v55  ;;  %4113 = vmatpush1.bf16.msra.mxu0 %v5927_v42  ;;  %v5981_v55 = vld [vmem:[#allocation9 + $0x530] ss:$20 sps:$4 sm:$0xff]   ;;  %v5986_v42 = vld [vmem:[#allocation9 + $0x554] ss:$20 sps:$4 sm:$0xff]  }
 0x432   :  { %3909 = vmatprep.subr.bf16.mxu1 %v5932_v56  ;;  %4114 = vmatprep.subr.bf16.mxu0 %v5935_v57  ;;  %v5989_v56 = vld [vmem:[#allocation9 + $0x55c] ss:$20 sps:$4 sm:$0xff]  }
 0x433   :  { %v5984_v57 = vld [vmem:[#allocation9 + $0x550] ss:$20 sps:$4 sm:$0xff]  }
 0x435   :  { %3910 = vmatpush1.bf16.msra.mxu1 %v5930_v58  ;;  %4115 = vmatpush1.bf16.msra.mxu0 %v5933_v59  ;;  %v5987_v58 = vld [vmem:[#allocation9 + $0x558] ss:$20 sps:$4 sm:$0xff]   ;;  %v5992_v59 = vld [vmem:[#allocation9 + $0x57c] ss:$20 sps:$4 sm:$0xff]  }
 0x436   :  { %3911 = vmatprep.subr.bf16.mxu1 %v5938_v61  ;;  %4116 = vmatprep.subr.bf16.mxu0 %v5941_v2  ;;  %v5995_v61 = vld [vmem:[#allocation9 + $0x584] ss:$20 sps:$4 sm:$0xff]  }
 0x437   :  { %v5990_v2 = vld [vmem:[#allocation9 + $0x578] ss:$20 sps:$4 sm:$0xff]  }
 0x439   :  { %3912 = vmatpush1.bf16.msra.mxu1 %v5936_v3  ;;  %4117 = vmatpush1.bf16.msra.mxu0 %v5939_v4  ;;  %v5993_v3 = vld [vmem:[#allocation9 + $0x580] ss:$20 sps:$4 sm:$0xff]   ;;  %v5998_v4 = vld [vmem:[#allocation9 + $0x5a4] ss:$20 sps:$4 sm:$0xff]  }
 0x43a   :  { %3913 = vmatprep.subr.bf16.mxu1 %v5944_v5  ;;  %4118 = vmatprep.subr.bf16.mxu0 %v5947_v6  ;;  %v6001_v5 = vld [vmem:[#allocation9 + $0x5ac] ss:$20 sps:$4 sm:$0xff]  }
 0x43b   :  { %v5996_v6 = vld [vmem:[#allocation9 + $0x5a0] ss:$20 sps:$4 sm:$0xff]  }
 0x43d   :  { %3914 = vmatpush1.bf16.msra.mxu1 %v5942_v7  ;;  %4119 = vmatpush1.bf16.msra.mxu0 %v5945_v8  ;;  %v5999_v7 = vld [vmem:[#allocation9 + $0x5a8] ss:$20 sps:$4 sm:$0xff]   ;;  %v6004_v8 = vld [vmem:[#allocation9 + $0x5cc] ss:$20 sps:$4 sm:$0xff]  }
 0x43e   :  { %3915 = vmatprep.subr.bf16.mxu1 %v5950_v10  ;;  %4120 = vmatprep.subr.bf16.mxu0 %v5953_v12  ;;  %v6007_v10 = vld [vmem:[#allocation9 + $0x5d4] ss:$20 sps:$4 sm:$0xff]  }
 0x43f   :  { %v6002_v12 = vld [vmem:[#allocation9 + $0x5c8] ss:$20 sps:$4 sm:$0xff]  }
 0x441   :  { %3916 = vmatpush1.bf16.msra.mxu1 %v5948_v16  ;;  %4121 = vmatpush1.bf16.msra.mxu0 %v5951_v17  ;;  %v6010_v16 = vld [vmem:[#allocation9 + $0x5f4] ss:$20 sps:$4 sm:$0xff]   ;;  %v6013_v17 = vld [vmem:[#allocation9 + $0x5fc] ss:$20 sps:$4 sm:$0xff]  }
 0x442   :  { %3917 = vmatprep.subr.bf16.mxu1 %v5956_v20  ;;  %4122 = vmatprep.subr.bf16.mxu0 %v5959_v22  ;;  %v6008_v20 = vld [vmem:[#allocation9 + $0x5f0] ss:$20 sps:$4 sm:$0xff]   ;;  %v6011_v22 = vld [vmem:[#allocation9 + $0x5f8] ss:$20 sps:$4 sm:$0xff]  }
 0x445   :  { %3918 = vmatpush1.bf16.msra.mxu1 %v5954_v24  ;;  %4123 = vmatpush1.bf16.msra.mxu0 %v5957_v25  ;;  %v6014_v24 = vld [vmem:[#allocation9 + $0x618] ss:$20 sps:$4 sm:$0xff]   ;;  %v6017_v25 = vld [vmem:[#allocation9 + $0x620] ss:$20 sps:$4 sm:$0xff]  }
 0x446   :  { %3919 = vmatprep.subr.bf16.mxu1 %v5962_v26  ;;  %4124 = vmatprep.subr.bf16.mxu0 %v5965_v11  ;;  %v6022_v26 = vld [vmem:[#allocation9 + $0x644] ss:$20 sps:$4 sm:$0xff]   ;;  %v6025_v11 = vld [vmem:[#allocation9 + $0x64c] ss:$20 sps:$4 sm:$0xff]  }
 0x449   :  { %3920 = vmatpush1.bf16.msra.mxu1 %v5960_v63  ;;  %4125 = vmatpush1.bf16.msra.mxu0 %v5963_v31  ;;  %v6028_v63 = vld [vmem:[#allocation9 + $0x66c] ss:$20 sps:$4 sm:$0xff]   ;;  %v6031_v31 = vld [vmem:[#allocation9 + $0x674] ss:$20 sps:$4 sm:$0xff]  }
 0x44a   :  { %3921 = vmatprep.subr.bf16.mxu1 %v5968_v9  ;;  %4126 = vmatprep.subr.bf16.mxu0 %v5971_v33  ;;  %v6026_v9 = vld [vmem:[#allocation9 + $0x668] ss:$20 sps:$4 sm:$0xff]   ;;  %v6029_v33 = vld [vmem:[#allocation9 + $0x670] ss:$20 sps:$4 sm:$0xff]  }
 0x44d   :  { %3922 = vmatpush1.bf16.msra.mxu1 %v5966_v14  ;;  %4127 = vmatpush1.bf16.msra.mxu0 %v5969_v47  ;;  %v6032_v14 = vld [vmem:[#allocation9 + $0x690] ss:$20 sps:$4 sm:$0xff]   ;;  %v6035_v47 = vld [vmem:[#allocation9 + $0x698] ss:$20 sps:$4 sm:$0xff]  }
 0x44e   :  { %3932 = vmatprep.subr.bf16.mxu1 %v5974_v1  ;;  %4137 = vmatprep.subr.bf16.mxu0 %v5977_v23  ;;  %v6040_v1 = vld [vmem:[#allocation9 + $0x6bc] ss:$20 sps:$4 sm:$0xff]   ;;  %v6043_v23 = vld [vmem:[#allocation9 + $0x6c4] ss:$20 sps:$4 sm:$0xff]  }
 0x450   :  { %3924 = vmatmul.mubr.bf16.vlgmr.msra.gmra.mrb[28].mxu1 %v6992_v34  ;;  %4129 = vmatmul.mubr.bf16.vlgmr.msra.gmra.mrb[20].mxu0 %v6992_v34 }
 0x451   :  { %3933 = vmatpush1.bf16.msra.mxu1 %v5972_v28  ;;  %3964 = vmatprep.mubr.bf16.mxu1 %v6994_v38  ;;  %v6046_v28 = vld [vmem:[#allocation9 + $0x6e4] ss:$20 sps:$4 sm:$0xff]  }
 0x452   :  { %4138 = vmatpush1.bf16.msra.mxu0 %v5975_v53  ;;  %4169 = vmatprep.mubr.bf16.mxu0 %v6994_v38  ;;  %v883_v53 = vsub.s32 4, %v6940_v37 }
 0x453   :  { %3934 = vmatprep.subr.bf16.mxu1 %v5980_v44  ;;  %4139 = vmatprep.subr.bf16.mxu0 %v5983_v40  ;;  %v6049_v44 = vld [vmem:[#allocation9 + $0x6ec] ss:$20 sps:$4 sm:$0xff]   ;;  %v895_v40 = vsub.s32 7, %v6940_v37 }
 0x455   :  { %3935 = vmatpush1.bf16.msra.mxu1 %v5978_v43  ;;  %v6044_v43 = vld [vmem:[#allocation9 + $0x6e0] ss:$20 sps:$4 sm:$0xff]  }
 0x456   :  { %4140 = vmatpush1.bf16.msra.mxu0 %v5981_v55  ;;  %3936 = vmatprep.subr.bf16.mxu1 %v5986_v42  ;;  %v6047_v55 = vld [vmem:[#allocation9 + $0x6e8] ss:$20 sps:$4 sm:$0xff]   ;;  %v6052_v42 = vld [vmem:[#allocation9 + $0x70c] ss:$20 sps:$4 sm:$0xff]  }
 0x457   :  { %4141 = vmatprep.subr.bf16.mxu0 %v5989_v56  ;;  %v884_v56 = vrot.slane %v6945_v41, %v883_v53 }
 0x459   :  { %3937 = vmatpush1.bf16.msra.mxu1 %v5984_v57  ;;  %v6055_v57 = vld [vmem:[#allocation9 + $0x714] ss:$20 sps:$4 sm:$0xff]  }
 0x45a   :  { %4142 = vmatpush1.bf16.msra.mxu0 %v5987_v58  ;;  %3938 = vmatprep.subr.bf16.mxu1 %v5992_v59  ;;  %v896_v58 = vrot.slane %v6945_v41, %v895_v40  ;;  %v6050_v59 = vld [vmem:[#allocation9 + $0x708] ss:$20 sps:$4 sm:$0xff]  }
 0x45b   :  { %4143 = vmatprep.subr.bf16.mxu0 %v5995_v61  ;;  %v6053_v61 = vld [vmem:[#allocation9 + $0x710] ss:$20 sps:$4 sm:$0xff]   ;;  %v6098_v40 = vld [vmem:[#allocation9 + $0x848] ss:$20 sps:$4 sm:$0xff]  }
 0x45d   :  { %3939 = vmatpush1.bf16.msra.mxu1 %v5990_v2  ;;  %v6058_v2 = vld [vmem:[#allocation9 + $0x734] ss:$20 sps:$4 sm:$0xff]  }
 0x45e   :  { %4144 = vmatpush1.bf16.msra.mxu0 %v5993_v3  ;;  %3940 = vmatprep.subr.bf16.mxu1 %v5998_v4  ;;  %v1135_v3 = vadd.f32 %v6974_v21, %v884_v56  ;;  %v6061_v4 = vld [vmem:[#allocation9 + $0x73c] ss:$20 sps:$4 sm:$0xff]   ;;  %v6065_v21 = vld [vmem:[#allocation9 + $0x760] ss:$20 sps:$4 sm:$0xff]  }
 0x45f   :  { %4145 = vmatprep.subr.bf16.mxu0 %v6001_v5  ;;  %v1178_v5 = vadd.f32 %v6982_v32, %v896_v58  ;;  %v6073_v32 = vld [vmem:[#allocation9 + $0x78c] ss:$20 sps:$4 sm:$0xff]   ;;  %v6104_v56 = vld [vmem:[#allocation9 + $0x870] ss:$20 sps:$4 sm:$0xff]  }
 0x460   :  { %vm1227_vm12 = vcmp.gt.f32.partialorder %v1135_v3, 0.0  ;;  %v6112_v58 = vld [vmem:[#allocation9 + $0x89c] ss:$20 sps:$4 sm:$0xff]  }
 0x461   :  { %3941 = vmatpush1.bf16.msra.mxu1 %v5996_v6  ;;  %v6056_v6 = vld [vmem:[#allocation9 + $0x730] ss:$20 sps:$4 sm:$0xff]   ;;  %vm1230_vm13 = vcmp.gt.f32.partialorder %v1178_v5, 0.0 }
 0x462   :  { %4146 = vmatpush1.bf16.msra.mxu0 %v5999_v7  ;;  %3942 = vmatprep.subr.bf16.mxu1 %v6004_v8  ;;  %v6059_v7 = vld [vmem:[#allocation9 + $0x738] ss:$20 sps:$4 sm:$0xff]   ;;  %v6064_v8 = vld [vmem:[#allocation9 + $0x75c] ss:$20 sps:$4 sm:$0xff]  }
 0x463   :  { %4147 = vmatprep.subr.bf16.mxu0 %v6007_v10  ;;  %v1237_v10 = vmul.f32 0.1, %v1135_v3 }
 0x465   :  { %3943 = vmatpush1.bf16.msra.mxu1 %v6002_v12  ;;  %v6067_v12 = vld [vmem:[#allocation9 + $0x764] ss:$20 sps:$4 sm:$0xff]  }
 0x466   :  { %4148 = vmatpush1.bf16.msra.mxu0 %v6005_v15  ;;  %3944 = vmatprep.subr.bf16.mxu1 %v6010_v16  ;;  %v1240_v15 = vmul.f32 0.1, %v1178_v5  ;;  %v6062_v16 = vld [vmem:[#allocation9 + $0x758] ss:$20 sps:$4 sm:$0xff]  }
 0x467   :  { %4149 = vmatprep.subr.bf16.mxu0 %v6013_v17  ;;  %v6070_v17 = vld [vmem:[#allocation9 + $0x784] ss:$20 sps:$4 sm:$0xff]  }
 0x469   :  { %3945 = vmatpush1.bf16.msra.mxu1 %v6008_v20  ;;  %v1247_v20 = vsel %vm1227_vm12, %v1135_v3, %v1237_v10  ;;  %v6118_v3 = vld [vmem:[#allocation9 + $0x8c4] ss:$20 sps:$4 sm:$0xff]   ;;  %v6122_v10 = vld [vmem:[#allocation9 + $0x8e8] ss:$20 sps:$4 sm:$0xff]  }
 0x46a   :  { %4150 = vmatpush1.bf16.msra.mxu0 %v6011_v22  ;;  %3946 = vmatprep.subr.bf16.mxu1 %v6016_v48  ;;  %v6068_v22 = vld [vmem:[#allocation9 + $0x780] ss:$20 sps:$4 sm:$0xff]   ;;  %v1250_v48 = vsel %vm1230_vm13, %v1178_v5, %v1240_v15 }
 0x46b   :  { %4151 = vmatprep.subr.bf16.mxu0 %v6019_v46  ;;  %v7008_v46 = vpack.c.bf16 %v1247_v20, %v1247_v20  ;;  %v6116_v5 = vld [vmem:[#allocation9 + $0x8c0] ss:$20 sps:$4 sm:$0xff]   ;;  %v6136_v20 = vld [vmem:[#allocation9 + $0x93c] ss:$20 sps:$4 sm:$0xff]  }
 0x46c   :  { %v6130_v15 = vld [vmem:[#allocation9 + $0x914] ss:$20 sps:$4 sm:$0xff]  }
 0x46d   :  { %3947 = vmatpush1.bf16.msra.mxu1 %v6014_v24  ;;  %v6071_v24 = vld [vmem:[#allocation9 + $0x788] ss:$20 sps:$4 sm:$0xff]  }
 0x46e   :  { %4152 = vmatpush1.bf16.msra.mxu0 %v6017_v25  ;;  %3948 = vmatprep.subr.bf16.mxu1 %v6022_v26  ;;  %v6076_v25 = vld [vmem:[#allocation9 + $0x7ac] ss:$20 sps:$4 sm:$0xff]   ;;  %v7011_v26 = vpack.c.bf16 %v1250_v48, %v1250_v48 }
 0x46f   :  { %4153 = vmatprep.subr.bf16.mxu0 %v6025_v11  ;;  %v6079_v11 = vld [vmem:[#allocation9 + $0x7b4] ss:$20 sps:$4 sm:$0xff]  }
 0x470   :  { %v6137_v48 = vld [vmem:[#allocation9 + $0x940] ss:$20 sps:$4 sm:$0xff]  }
 0x471   :  { %3949 = vmatpush1.bf16.msra.mxu1 %v6020_v60  ;;  %v6074_v60 = vld [vmem:[#allocation9 + $0x7a8] ss:$20 sps:$4 sm:$0xff]  }
 0x472   :  { %4154 = vmatpush1.bf16.msra.mxu0 %v6023_v29  ;;  %3950 = vmatprep.subr.bf16.mxu1 %v6028_v63  ;;  %v6077_v29 = vld [vmem:[#allocation9 + $0x7b0] ss:$20 sps:$4 sm:$0xff]   ;;  %v6082_v63 = vld [vmem:[#allocation9 + $0x7d4] ss:$20 sps:$4 sm:$0xff]  }
 0x473   :  { %4155 = vmatprep.subr.bf16.mxu0 %v6031_v31  ;;  %v6085_v31 = vld [vmem:[#allocation9 + $0x7dc] ss:$20 sps:$4 sm:$0xff]  }
 0x475   :  { %3951 = vmatpush1.bf16.msra.mxu1 %v6026_v9  ;;  %v6080_v9 = vld [vmem:[#allocation9 + $0x7d0] ss:$20 sps:$4 sm:$0xff]  }
 0x476   :  { %4156 = vmatpush1.bf16.msra.mxu0 %v6029_v33  ;;  %3952 = vmatprep.subr.bf16.mxu1 %v6034_v27  ;;  %v6083_v33 = vld [vmem:[#allocation9 + $0x7d8] ss:$20 sps:$4 sm:$0xff]   ;;  %v6088_v27 = vld [vmem:[#allocation9 + $0x7fc] ss:$20 sps:$4 sm:$0xff]  }
 0x477   :  { %4157 = vmatprep.subr.bf16.mxu0 %v6037_v36  ;;  %v6091_v36 = vld [vmem:[#allocation9 + $0x804] ss:$20 sps:$4 sm:$0xff]  }
 0x479   :  { %3953 = vmatpush1.bf16.msra.mxu1 %v6032_v14  ;;  %v6086_v14 = vld [vmem:[#allocation9 + $0x7f8] ss:$20 sps:$4 sm:$0xff]  }
 0x47a   :  { %4158 = vmatpush1.bf16.msra.mxu0 %v6035_v47  ;;  %3954 = vmatprep.subr.bf16.mxu1 %v6040_v1  ;;  %v6089_v47 = vld [vmem:[#allocation9 + $0x800] ss:$20 sps:$4 sm:$0xff]   ;;  %v6094_v1 = vld [vmem:[#allocation9 + $0x824] ss:$20 sps:$4 sm:$0xff]  }
 0x47b   :  { %4159 = vmatprep.subr.bf16.mxu0 %v6043_v23  ;;  %v6097_v23 = vld [vmem:[#allocation9 + $0x82c] ss:$20 sps:$4 sm:$0xff]  }
 0x47d   :  { %3955 = vmatpush1.bf16.msra.mxu1 %v6038_v49  ;;  %v6092_v49 = vld [vmem:[#allocation9 + $0x820] ss:$20 sps:$4 sm:$0xff]  }
 0x47e   :  { %4160 = vmatpush1.bf16.msra.mxu0 %v6041_v50  ;;  %3956 = vmatprep.subr.bf16.mxu1 %v6046_v28  ;;  %v6095_v50 = vld [vmem:[#allocation9 + $0x828] ss:$20 sps:$4 sm:$0xff]   ;;  %v6100_v28 = vld [vmem:[#allocation9 + $0x84c] ss:$20 sps:$4 sm:$0xff]  }
 0x47f   :  { %4161 = vmatprep.subr.bf16.mxu0 %v6049_v44  ;;  %v6103_v44 = vld [vmem:[#allocation9 + $0x854] ss:$20 sps:$4 sm:$0xff]  }
 0x481   :  { %3957 = vmatpush1.bf16.msra.mxu1 %v6044_v43  ;;  %v6101_v43 = vld [vmem:[#allocation9 + $0x850] ss:$20 sps:$4 sm:$0xff]  }
 0x482   :  { %4162 = vmatpush1.bf16.msra.mxu0 %v6047_v55  ;;  %3958 = vmatprep.subr.bf16.mxu1 %v6052_v42  ;;  %v6106_v55 = vld [vmem:[#allocation9 + $0x874] ss:$20 sps:$4 sm:$0xff]   ;;  %v6109_v42 = vld [vmem:[#allocation9 + $0x87c] ss:$20 sps:$4 sm:$0xff]  }
 0x483   :  { %4163 = vmatprep.subr.bf16.mxu0 %v6055_v57  ;;  %v6107_v57 = vld [vmem:[#allocation9 + $0x878] ss:$20 sps:$4 sm:$0xff]  }
 0x485   :  { %3959 = vmatpush1.bf16.msra.mxu1 %v6050_v59  ;;  %v6115_v59 = vld [vmem:[#allocation9 + $0x8a4] ss:$20 sps:$4 sm:$0xff]  }
 0x486   :  { %4164 = vmatpush1.bf16.msra.mxu0 %v6053_v61  ;;  %3960 = vmatprep.subr.bf16.mxu1 %v6058_v2  ;;  %v6110_v61 = vld [vmem:[#allocation9 + $0x898] ss:$20 sps:$4 sm:$0xff]   ;;  %v6113_v2 = vld [vmem:[#allocation9 + $0x8a0] ss:$20 sps:$4 sm:$0xff]  }
 0x487   :  { %4165 = vmatprep.subr.bf16.mxu0 %v6061_v4  ;;  %v6121_v4 = vld [vmem:[#allocation9 + $0x8cc] ss:$20 sps:$4 sm:$0xff]  }
 0x489   :  { %3961 = vmatpush1.bf16.msra.mxu1 %v6056_v6  ;;  %v6119_v6 = vld [vmem:[#allocation9 + $0x8c8] ss:$20 sps:$4 sm:$0xff]  }
 0x48a   :  { %4166 = vmatpush1.bf16.msra.mxu0 %v6059_v7  ;;  %3962 = vmatprep.subr.bf16.mxu1 %v6064_v8  ;;  %v6124_v7 = vld [vmem:[#allocation9 + $0x8ec] ss:$20 sps:$4 sm:$0xff]   ;;  %v6127_v8 = vld [vmem:[#allocation9 + $0x8f4] ss:$20 sps:$4 sm:$0xff]  }
 0x48b   :  { %4167 = vmatprep.subr.bf16.mxu0 %v6067_v12  ;;  %v6125_v12 = vld [vmem:[#allocation9 + $0x8f0] ss:$20 sps:$4 sm:$0xff]  }
 0x48d   :  { %3963 = vmatpush1.bf16.msra.mxu1 %v6062_v16  ;;  %v6133_v16 = vld [vmem:[#allocation9 + $0x91c] ss:$20 sps:$4 sm:$0xff]  }
 0x48e   :  { %4168 = vmatpush1.bf16.msra.mxu0 %v6065_v21  ;;  %3973 = vmatprep.subr.bf16.mxu1 %v6070_v17  ;;  %v6128_v21 = vld [vmem:[#allocation9 + $0x910] ss:$20 sps:$4 sm:$0xff]   ;;  %v6131_v17 = vld [vmem:[#allocation9 + $0x918] ss:$20 sps:$4 sm:$0xff]  }
 0x48f   :  { %4178 = vmatprep.subr.bf16.mxu0 %v6073_v32  ;;  %v6139_v32 = vld [vmem:[#allocation9 + $0x944] ss:$20 sps:$4 sm:$0xff]  }
 0x490   :  { %3965 = vmatmul.mubr.bf16.vlgmr.msra.gmra.mrb[28].mxu1 %v7008_v46 }
 0x491   :  { %4170 = vmatmul.mubr.bf16.vlgmr.msra.gmra.mrb[20].mxu0 %v7008_v46  ;;  %3974 = vmatpush1.bf16.msra.mxu1 %v6068_v22  ;;  %v6134_v22 = vld [vmem:[#allocation9 + $0x938] ss:$20 sps:$4 sm:$0xff]  }
 0x492   :  { %4005 = vmatprep.mubr.bf16.mxu1 %v7011_v26  ;;  %4179 = vmatpush1.bf16.msra.mxu0 %v6071_v24  ;;  %v6142_v24 = vld [vmem:[#allocation9 + $0x964] ss:$20 sps:$4 sm:$0xff]  }
 0x493   :  { %4210 = vmatprep.mubr.bf16.mxu0 %v7011_v26  ;;  %3975 = vmatprep.subr.bf16.mxu1 %v6076_v25  ;;  %v891_v25 = vsub.s32 6, %v6940_v37 }
 0x494   :  { %4180 = vmatprep.subr.bf16.mxu0 %v6079_v11  ;;  %v6145_v11 = vld [vmem:[#allocation9 + $0x96c] ss:$20 sps:$4 sm:$0xff]  }
 0x495   :  { %3976 = vmatpush1.bf16.msra.mxu1 %v6074_v60  ;;  %v6140_v60 = vld [vmem:[#allocation9 + $0x960] ss:$20 sps:$4 sm:$0xff]  }
 0x496   :  { %4181 = vmatpush1.bf16.msra.mxu0 %v6077_v29  ;;  %3977 = vmatprep.subr.bf16.mxu1 %v6082_v63  ;;  %v7017_v29 = vld [vmem:[#allocation7 + $0x8] sm:$0x3] }
 0x497   :  { %4182 = vmatprep.subr.bf16.mxu0 %v6085_v31  ;;  %v6143_v63 = vld [vmem:[#allocation9 + $0x968] ss:$20 sps:$4 sm:$0xff]   ;;  %v6148_v31 = vld [vmem:[#allocation9 + $0x98c] ss:$20 sps:$4 sm:$0xff]  }
 0x499   :  { %3978 = vmatpush1.bf16.msra.mxu1 %v6080_v9  ;;  %v892_v9 = vrot.slane %v6945_v41, %v891_v25  ;;  %v6155_v41 = vld [vmem:[#allocation9 + $0x9b8] ss:$20 sps:$4 sm:$0xff]   ;;  %v6199_v25 = vld [vmem:[#allocation9 + $0xad4] ss:$20 sps:$4 sm:$0xff]  }
 0x49a   :  { %4183 = vmatpush1.bf16.msra.mxu0 %v6083_v33  ;;  %3979 = vmatprep.subr.bf16.mxu1 %v6088_v27  ;;  %v6151_v33 = vld [vmem:[#allocation9 + $0x994] ss:$20 sps:$4 sm:$0xff]   ;;  %v904_v27 = vrot.slane %v7017_v29, %v6948_v45 }
 0x49b   :  { %4184 = vmatprep.subr.bf16.mxu0 %v6091_v36  ;;  %v6146_v36 = vld [vmem:[#allocation9 + $0x988] ss:$20 sps:$4 sm:$0xff]  }
 0x49d   :  { %3980 = vmatpush1.bf16.msra.mxu1 %v6086_v14  ;;  %v6149_v14 = vld [vmem:[#allocation9 + $0x990] ss:$20 sps:$4 sm:$0xff]  }
 0x49e   :  { %4185 = vmatpush1.bf16.msra.mxu0 %v6089_v47  ;;  %3981 = vmatprep.subr.bf16.mxu1 %v6094_v1  ;;  %v6154_v47 = vld [vmem:[#allocation9 + $0x9b4] ss:$20 sps:$4 sm:$0xff]   ;;  %v1176_v1 = vadd.f32 %v6980_v30, %v892_v9  ;;  %v6200_v9 = vld [vmem:[#allocation9 + $0xaf0] ss:$20 sps:$4 sm:$0xff]  }
 0x49f   :  { %4186 = vmatprep.subr.bf16.mxu0 %v6097_v23  ;;  %v6157_v23 = vld [vmem:[#allocation9 + $0x9bc] ss:$20 sps:$4 sm:$0xff]   ;;  %v6161_v30 = vld [vmem:[#allocation9 + $0x9e0] ss:$20 sps:$4 sm:$0xff]  }
 0x4a0   :  { %vm1229_vm14 = vcmp.gt.f32.partialorder %v1176_v1, 0.0 }
 0x4a1   :  { %3982 = vmatpush1.bf16.msra.mxu1 %v6092_v49  ;;  %v1219_v49 = vadd.f32 %v6956_v52, %v904_v27  ;;  %v6169_v52 = vld [vmem:[#allocation9 + $0xa0c] ss:$20 sps:$4 sm:$0xff]   ;;  %v6208_v27 = vld [vmem:[#allocation9 + $0xb1c] ss:$20 sps:$4 sm:$0xff]  }
 0x4a2   :  { %4187 = vmatpush1.bf16.msra.mxu0 %v6095_v50  ;;  %3983 = vmatprep.subr.bf16.mxu1 %v6100_v28  ;;  %v6152_v50 = vld [vmem:[#allocation9 + $0x9b0] ss:$20 sps:$4 sm:$0xff]  }
 0x4a3   :  { %4188 = vmatprep.subr.bf16.mxu0 %v6103_v44  ;;  %v6160_v28 = vld [vmem:[#allocation9 + $0x9dc] ss:$20 sps:$4 sm:$0xff]   ;;  %v1239_v44 = vmul.f32 0.1, %v1176_v1  ;;  %vm1232_vm15 = vcmp.gt.f32.partialorder %v1219_v49, 0.0 }
 0x4a5   :  { %3984 = vmatpush1.bf16.msra.mxu1 %v6098_v40  ;;  %v6163_v40 = vld [vmem:[#allocation9 + $0x9e4] ss:$20 sps:$4 sm:$0xff]  }
 0x4a6   :  { %4189 = vmatpush1.bf16.msra.mxu0 %v6101_v43  ;;  %3985 = vmatprep.subr.bf16.mxu1 %v6106_v55  ;;  %v1242_v43 = vmul.f32 0.1, %v1219_v49  ;;  %v6158_v55 = vld [vmem:[#allocation9 + $0x9d8] ss:$20 sps:$4 sm:$0xff]  }
 0x4a7   :  { %4190 = vmatprep.subr.bf16.mxu0 %v6109_v42  ;;  %v6166_v42 = vld [vmem:[#allocation9 + $0xa04] ss:$20 sps:$4 sm:$0xff]  }
 0x4a9   :  { %3986 = vmatpush1.bf16.msra.mxu1 %v6104_v56  ;;  %v1249_v56 = vsel %vm1229_vm14, %v1176_v1, %v1239_v44  ;;  %v6214_v1 = vld [vmem:[#allocation9 + $0xb44] ss:$20 sps:$4 sm:$0xff]   ;;  %v6218_v44 = vld [vmem:[#allocation9 + $0xb68] ss:$20 sps:$4 sm:$0xff]  }
 0x4aa   :  { %4191 = vmatpush1.bf16.msra.mxu0 %v6107_v57  ;;  %3987 = vmatprep.subr.bf16.mxu1 %v6112_v58  ;;  %v6164_v57 = vld [vmem:[#allocation9 + $0xa00] ss:$20 sps:$4 sm:$0xff]   ;;  %v1252_v58 = vsel %vm1232_vm15, %v1219_v49, %v1242_v43 }
 0x4ab   :  { %4192 = vmatprep.subr.bf16.mxu0 %v6115_v59  ;;  %v7024_v59 = vpack.c.bf16 %v1249_v56, %v1249_v56  ;;  %v6212_v49 = vld [vmem:[#allocation9 + $0xb40] ss:$20 sps:$4 sm:$0xff]   ;;  %v6232_v56 = vld [vmem:[#allocation9 + $0xbbc] ss:$20 sps:$4 sm:$0xff]  }
 0x4ac   :  { %v6226_v43 = vld [vmem:[#allocation9 + $0xb94] ss:$20 sps:$4 sm:$0xff]  }
 0x4ad   :  { %3988 = vmatpush1.bf16.msra.mxu1 %v6110_v61  ;;  %v6167_v61 = vld [vmem:[#allocation9 + $0xa08] ss:$20 sps:$4 sm:$0xff]  }
 0x4ae   :  { %4193 = vmatpush1.bf16.msra.mxu0 %v6113_v2  ;;  %3989 = vmatprep.subr.bf16.mxu1 %v6118_v3  ;;  %v6172_v2 = vld [vmem:[#allocation9 + $0xa2c] ss:$20 sps:$4 sm:$0xff]   ;;  %v7027_v3 = vpack.c.bf16 %v1252_v58, %v1252_v58 }
 0x4af   :  { %4194 = vmatprep.subr.bf16.mxu0 %v6121_v4  ;;  %v6175_v4 = vld [vmem:[#allocation9 + $0xa34] ss:$20 sps:$4 sm:$0xff]  }
 0x4b0   :  { %v6233_v58 = vld [vmem:[#allocation9 + $0xbc0] ss:$20 sps:$4 sm:$0xff]  }
 0x4b1   :  { %3990 = vmatpush1.bf16.msra.mxu1 %v6116_v5  ;;  %v6170_v5 = vld [vmem:[#allocation9 + $0xa28] ss:$20 sps:$4 sm:$0xff]  }
 0x4b2   :  { %4195 = vmatpush1.bf16.msra.mxu0 %v6119_v6  ;;  %3991 = vmatprep.subr.bf16.mxu1 %v6124_v7  ;;  %v6173_v6 = vld [vmem:[#allocation9 + $0xa30] ss:$20 sps:$4 sm:$0xff]   ;;  %v6178_v7 = vld [vmem:[#allocation9 + $0xa54] ss:$20 sps:$4 sm:$0xff]  }
 0x4b3   :  { %4196 = vmatprep.subr.bf16.mxu0 %v6127_v8  ;;  %v6181_v8 = vld [vmem:[#allocation9 + $0xa5c] ss:$20 sps:$4 sm:$0xff]  }
 0x4b5   :  { %3992 = vmatpush1.bf16.msra.mxu1 %v6122_v10  ;;  %v6176_v10 = vld [vmem:[#allocation9 + $0xa50] ss:$20 sps:$4 sm:$0xff]  }
 0x4b6   :  { %4197 = vmatpush1.bf16.msra.mxu0 %v6125_v12  ;;  %3993 = vmatprep.subr.bf16.mxu1 %v6130_v15  ;;  %v6179_v12 = vld [vmem:[#allocation9 + $0xa58] ss:$20 sps:$4 sm:$0xff]   ;;  %v6184_v15 = vld [vmem:[#allocation9 + $0xa7c] ss:$20 sps:$4 sm:$0xff]  }
 0x4b7   :  { %4198 = vmatprep.subr.bf16.mxu0 %v6133_v16  ;;  %v6187_v16 = vld [vmem:[#allocation9 + $0xa84] ss:$20 sps:$4 sm:$0xff]  }
 0x4b9   :  { %3994 = vmatpush1.bf16.msra.mxu1 %v6128_v21  ;;  %v6182_v21 = vld [vmem:[#allocation9 + $0xa78] ss:$20 sps:$4 sm:$0xff]  }
 0x4ba   :  { %4199 = vmatpush1.bf16.msra.mxu0 %v6131_v17  ;;  %3995 = vmatprep.subr.bf16.mxu1 %v6136_v20  ;;  %v6185_v17 = vld [vmem:[#allocation9 + $0xa80] ss:$20 sps:$4 sm:$0xff]   ;;  %v6190_v20 = vld [vmem:[#allocation9 + $0xaa4] ss:$20 sps:$4 sm:$0xff]  }
 0x4bb   :  { %4200 = vmatprep.subr.bf16.mxu0 %v6139_v32  ;;  %v6193_v32 = vld [vmem:[#allocation9 + $0xaac] ss:$20 sps:$4 sm:$0xff]  }
 0x4bd   :  { %3996 = vmatpush1.bf16.msra.mxu1 %v6134_v22  ;;  %v6188_v22 = vld [vmem:[#allocation9 + $0xaa0] ss:$20 sps:$4 sm:$0xff]  }
 0x4be   :  { %4201 = vmatpush1.bf16.msra.mxu0 %v6137_v48  ;;  %3997 = vmatprep.subr.bf16.mxu1 %v6142_v24  ;;  %v6191_v48 = vld [vmem:[#allocation9 + $0xaa8] ss:$20 sps:$4 sm:$0xff]   ;;  %v6196_v24 = vld [vmem:[#allocation9 + $0xacc] ss:$20 sps:$4 sm:$0xff]  }
 0x4bf   :  { %4202 = vmatprep.subr.bf16.mxu0 %v6145_v11  ;;  %v6194_v11 = vld [vmem:[#allocation9 + $0xac8] ss:$20 sps:$4 sm:$0xff]  }
 0x4c1   :  { %3998 = vmatpush1.bf16.msra.mxu1 %v6140_v60  ;;  %v6197_v60 = vld [vmem:[#allocation9 + $0xad0] ss:$20 sps:$4 sm:$0xff]  }
 0x4c2   :  { %4203 = vmatpush1.bf16.msra.mxu0 %v6143_v63  ;;  %3999 = vmatprep.subr.bf16.mxu1 %v6148_v31  ;;  %v6202_v63 = vld [vmem:[#allocation9 + $0xaf4] ss:$20 sps:$4 sm:$0xff]   ;;  %v6205_v31 = vld [vmem:[#allocation9 + $0xafc] ss:$20 sps:$4 sm:$0xff]  }
 0x4c3   :  { %4204 = vmatprep.subr.bf16.mxu0 %v6151_v33  ;;  %v6203_v33 = vld [vmem:[#allocation9 + $0xaf8] ss:$20 sps:$4 sm:$0xff]  }
 0x4c5   :  { %4000 = vmatpush1.bf16.msra.mxu1 %v6146_v36  ;;  %v6211_v36 = vld [vmem:[#allocation9 + $0xb24] ss:$20 sps:$4 sm:$0xff]  }
 0x4c6   :  { %4205 = vmatpush1.bf16.msra.mxu0 %v6149_v14  ;;  %4001 = vmatprep.subr.bf16.mxu1 %v6154_v47  ;;  %v6206_v14 = vld [vmem:[#allocation9 + $0xb18] ss:$20 sps:$4 sm:$0xff]   ;;  %v6209_v47 = vld [vmem:[#allocation9 + $0xb20] ss:$20 sps:$4 sm:$0xff]  }
 0x4c7   :  { %4206 = vmatprep.subr.bf16.mxu0 %v6157_v23  ;;  %v6217_v23 = vld [vmem:[#allocation9 + $0xb4c] ss:$20 sps:$4 sm:$0xff]  }
 0x4c9   :  { %4002 = vmatpush1.bf16.msra.mxu1 %v6152_v50  ;;  %v6215_v50 = vld [vmem:[#allocation9 + $0xb48] ss:$20 sps:$4 sm:$0xff]  }
 0x4ca   :  { %4207 = vmatpush1.bf16.msra.mxu0 %v6155_v41  ;;  %4003 = vmatprep.subr.bf16.mxu1 %v6160_v28  ;;  %v6220_v41 = vld [vmem:[#allocation9 + $0xb6c] ss:$20 sps:$4 sm:$0xff]   ;;  %v6223_v28 = vld [vmem:[#allocation9 + $0xb74] ss:$20 sps:$4 sm:$0xff]  }
 0x4cb   :  { %4208 = vmatprep.subr.bf16.mxu0 %v6163_v40  ;;  %v6221_v40 = vld [vmem:[#allocation9 + $0xb70] ss:$20 sps:$4 sm:$0xff]  }
 0x4cd   :  { %4004 = vmatpush1.bf16.msra.mxu1 %v6158_v55  ;;  %v6229_v55 = vld [vmem:[#allocation9 + $0xb9c] ss:$20 sps:$4 sm:$0xff]  }
 0x4ce   :  { %4209 = vmatpush1.bf16.msra.mxu0 %v6161_v30  ;;  %4014 = vmatprep.subr.bf16.mxu1 %v6166_v42  ;;  %v6224_v30 = vld [vmem:[#allocation9 + $0xb90] ss:$20 sps:$4 sm:$0xff]   ;;  %v6227_v42 = vld [vmem:[#allocation9 + $0xb98] ss:$20 sps:$4 sm:$0xff]  }
 0x4cf   :  { %4219 = vmatprep.subr.bf16.mxu0 %v6169_v52  ;;  %v6235_v52 = vld [vmem:[#allocation9 + $0xbc4] ss:$20 sps:$4 sm:$0xff]  }
 0x4d0   :  { %4006 = vmatmul.mubr.bf16.vlgmr.msra.gmra.mrb[28].mxu1 %v7024_v59 }
 0x4d1   :  { %4211 = vmatmul.mubr.bf16.vlgmr.msra.gmra.mrb[20].mxu0 %v7024_v59  ;;  %4015 = vmatpush1.bf16.msra.mxu1 %v6164_v57  ;;  %v6230_v57 = vld [vmem:[#allocation9 + $0xbb8] ss:$20 sps:$4 sm:$0xff]  }
 0x4d2   :  { %4046 = vmatprep.mubr.bf16.mxu1 %v7027_v3  ;;  %4220 = vmatpush1.bf16.msra.mxu0 %v6167_v61  ;;  %v6238_v61 = vld [vmem:[#allocation9 + $0xbe4] ss:$20 sps:$4 sm:$0xff]  }
 0x4d3   :  { %4251 = vmatprep.mubr.bf16.mxu0 %v7027_v3  ;;  %4016 = vmatprep.subr.bf16.mxu1 %v6172_v2  ;;  %v6241_v2 = vld [vmem:[#allocation9 + $0xbec] ss:$20 sps:$4 sm:$0xff]  }
 0x4d4   :  { %4221 = vmatprep.subr.bf16.mxu0 %v6175_v4  ;;  %v6236_v4 = vld [vmem:[#allocation9 + $0xbe0] ss:$20 sps:$4 sm:$0xff]  }
 0x4d5   :  { %4017 = vmatpush1.bf16.msra.mxu1 %v6170_v5  ;;  %v6239_v5 = vld [vmem:[#allocation9 + $0xbe8] ss:$20 sps:$4 sm:$0xff]  }
 0x4d6   :  { %4222 = vmatpush1.bf16.msra.mxu0 %v6173_v6  ;;  %4018 = vmatprep.subr.bf16.mxu1 %v6178_v7  ;;  %v6244_v6 = vld [vmem:[#allocation9 + $0xc0c] ss:$20 sps:$4 sm:$0xff]   ;;  %v900_v7 = vrot.slane %v7017_v29, %v6943_v18  ;;  %v6259_v29 = vld [vmem:[#allocation9 + $0xc64] ss:$20 sps:$4 sm:$0xff]  }
 0x4d7   :  { %4223 = vmatprep.subr.bf16.mxu0 %v6181_v8  ;;  %v6247_v8 = vld [vmem:[#allocation9 + $0xc14] ss:$20 sps:$4 sm:$0xff]  }
 0x4d9   :  { %4019 = vmatpush1.bf16.msra.mxu1 %v6176_v10  ;;  %v6242_v10 = vld [vmem:[#allocation9 + $0xc08] ss:$20 sps:$4 sm:$0xff]  }
 0x4da   :  { %4224 = vmatpush1.bf16.msra.mxu0 %v6179_v12  ;;  %4020 = vmatprep.subr.bf16.mxu1 %v6184_v15  ;;  %v6245_v12 = vld [vmem:[#allocation9 + $0xc10] ss:$20 sps:$4 sm:$0xff]   ;;  %v6250_v15 = vld [vmem:[#allocation9 + $0xc34] ss:$20 sps:$4 sm:$0xff]  }
 0x4db   :  { %4225 = vmatprep.subr.bf16.mxu0 %v6187_v16  ;;  %v1217_v16 = vadd.f32 %v6954_v51, %v900_v7  ;;  %v6261_v51 = vld [vmem:[#allocation9 + $0x3d0] ss:$20 sps:$4 sm:$0xff]  }
 0x4dc   :  { %v6293_v7 = vld [vmem:[#allocation9 + $0x8d0] ss:$20 sps:$4 sm:$0xff]  }
 0x4dd   :  { %4021 = vmatpush1.bf16.msra.mxu1 %v6182_v21  ;;  %v6253_v21 = vld [vmem:[#allocation9 + $0xc3c] ss:$20 sps:$4 sm:$0xff]   ;;  %vm1231_vm0 = vcmp.gt.f32.partialorder %v1217_v16, 0.0 }
 0x4de   :  { %4226 = vmatpush1.bf16.msra.mxu0 %v6185_v17  ;;  %4022 = vmatprep.subr.bf16.mxu1 %v6190_v20  ;;  %v6248_v17 = vld [vmem:[#allocation9 + $0xc30] ss:$20 sps:$4 sm:$0xff]   ;;  %v6251_v20 = vld [vmem:[#allocation9 + $0xc38] ss:$20 sps:$4 sm:$0xff]  }
 0x4df   :  { %4227 = vmatprep.subr.bf16.mxu0 %v6193_v32  ;;  %v6256_v32 = vld [vmem:[#allocation9 + $0xc5c] ss:$20 sps:$4 sm:$0xff]  }
 0x4e1   :  { %4023 = vmatpush1.bf16.msra.mxu1 %v6188_v22  ;;  %v1241_v22 = vmul.f32 0.1, %v1217_v16 }
 0x4e2   :  { %4228 = vmatpush1.bf16.msra.mxu0 %v6191_v48  ;;  %4024 = vmatprep.subr.bf16.mxu1 %v6196_v24  ;;  %v6254_v48 = vld [vmem:[#allocation9 + $0xc58] ss:$20 sps:$4 sm:$0xff]   ;;  %v6257_v24 = vld [vmem:[#allocation9 + $0xc60] ss:$20 sps:$4 sm:$0xff]  }
 0x4e3   :  { %4229 = vmatprep.subr.bf16.mxu0 %v6199_v25  ;;  %v6260_v25 = vld [vmem:[#allocation9 + $0x150] ss:$20 sps:$4 sm:$0xff]  }
 0x4e5   :  { %4025 = vmatpush1.bf16.msra.mxu1 %v6194_v11  ;;  %v1251_v11 = vsel %vm1231_vm0, %v1217_v16, %v1241_v22  ;;  %v6298_v16 = vld [vmem:[#allocation9 + $0x538] ss:$20 sps:$4 sm:$0xff]   ;;  %v6304_v22 = vld [vmem:[#allocation9 + $0x6c8] ss:$20 sps:$4 sm:$0xff]  }
 0x4e6   :  { %4230 = vmatpush1.bf16.msra.mxu0 %v6197_v60  ;;  %4026 = vmatprep.subr.bf16.mxu1 %v6202_v63  ;;  %v6262_v60 = vld [vmem:[#allocation9 + $0x10] ss:$20 sps:$4 sm:$0xff]   ;;  %v7035_v63 = vpack.c.bf16 %v1251_v11, %v1251_v11  ;;  %v6312_v11 = vld [vmem:[#allocation9 + $0x718] ss:$20 sps:$4 sm:$0xff]  }
 0x4e7   :  { %4231 = vmatprep.subr.bf16.mxu0 %v6205_v31  ;;  %v6263_v31 = vld [vmem:[#allocation9 + $0x290] ss:$20 sps:$4 sm:$0xff]  }
 0x4e9   :  { %4027 = vmatpush1.bf16.msra.mxu1 %v6200_v9  ;;  %v6264_v9 = vld [vmem:[#allocation9 + $0x178] ss:$20 sps:$4 sm:$0xff]  }
 0x4ea   :  { %4232 = vmatpush1.bf16.msra.mxu0 %v6203_v33  ;;  %4028 = vmatprep.subr.bf16.mxu1 %v6208_v27  ;;  %v6265_v33 = vld [vmem:[#allocation9 + $0x3f8] ss:$20 sps:$4 sm:$0xff]  }
 0x4eb   :  { %4233 = vmatprep.subr.bf16.mxu0 %v6211_v36  ;;  %v6266_v27 = vld [vmem:[#allocation9 + $0x38] ss:$20 sps:$4 sm:$0xff]  }
 0x4ec   :  { %v6267_v36 = vld [vmem:[#allocation9 + $0x2b8] ss:$20 sps:$4 sm:$0xff]  }
 0x4ed   :  { %4029 = vmatpush1.bf16.msra.mxu1 %v6206_v14  ;;  %v6268_v14 = vld [vmem:[#allocation9 + $0x1a0] ss:$20 sps:$4 sm:$0xff]  }
 0x4ee   :  { %4234 = vmatpush1.bf16.msra.mxu0 %v6209_v47  ;;  %4030 = vmatprep.subr.bf16.mxu1 %v6214_v1  ;;  %v6269_v47 = vld [vmem:[#allocation9 + $0x420] ss:$20 sps:$4 sm:$0xff]  }
 0x4ef   :  { %4235 = vmatprep.subr.bf16.mxu0 %v6217_v23  ;;  %v6270_v1 = vld [vmem:[#allocation9 + $0x60] ss:$20 sps:$4 sm:$0xff]  }
 0x4f0   :  { %v6271_v23 = vld [vmem:[#allocation9 + $0x2e0] ss:$20 sps:$4 sm:$0xff]  }
 0x4f1   :  { %4031 = vmatpush1.bf16.msra.mxu1 %v6212_v49  ;;  %v6272_v49 = vld [vmem:[#allocation9 + $0x1c8] ss:$20 sps:$4 sm:$0xff]  }
 0x4f2   :  { %4236 = vmatpush1.bf16.msra.mxu0 %v6215_v50  ;;  %4032 = vmatprep.subr.bf16.mxu1 %v6220_v41  ;;  %v6273_v50 = vld [vmem:[#allocation9 + $0x448] ss:$20 sps:$4 sm:$0xff]  }
 0x4f3   :  { %4237 = vmatprep.subr.bf16.mxu0 %v6223_v28  ;;  %v6274_v41 = vld [vmem:[#allocation9 + $0x88] ss:$20 sps:$4 sm:$0xff]   ;;  %v6276_v28 = vld [vmem:[#allocation9 + $0x1f0] ss:$20 sps:$4 sm:$0xff]  }
 0x4f5   :  { %4033 = vmatpush1.bf16.msra.mxu1 %v6218_v44  ;;  %v6277_v44 = vld [vmem:[#allocation9 + $0x470] ss:$20 sps:$4 sm:$0xff]  }
 0x4f6   :  { %4238 = vmatpush1.bf16.msra.mxu0 %v6221_v40  ;;  %4034 = vmatprep.subr.bf16.mxu1 %v6226_v43  ;;  %v6279_v40 = vld [vmem:[#allocation9 + $0x330] ss:$20 sps:$4 sm:$0xff]   ;;  %v6280_v43 = vld [vmem:[#allocation9 + $0x218] ss:$20 sps:$4 sm:$0xff]  }
 0x4f7   :  { %4239 = vmatprep.subr.bf16.mxu0 %v6229_v55  ;;  %v6281_v55 = vld [vmem:[#allocation9 + $0x498] ss:$20 sps:$4 sm:$0xff]  }
 0x4f9   :  { %4035 = vmatpush1.bf16.msra.mxu1 %v6224_v30  ;;  %v6282_v30 = vld [vmem:[#allocation9 + $0xd8] ss:$20 sps:$4 sm:$0xff]  }
 0x4fa   :  { %4240 = vmatpush1.bf16.msra.mxu0 %v6227_v42  ;;  %4036 = vmatprep.subr.bf16.mxu1 %v6232_v56  ;;  %v6283_v42 = vld [vmem:[#allocation9 + $0x358] ss:$20 sps:$4 sm:$0xff]   ;;  %v6284_v56 = vld [vmem:[#allocation9 + $0x240] ss:$20 sps:$4 sm:$0xff]  }
 0x4fb   :  { %4241 = vmatprep.subr.bf16.mxu0 %v6235_v52  ;;  %v6285_v52 = vld [vmem:[#allocation9 + $0x4c0] ss:$20 sps:$4 sm:$0xff]  }
 0x4fd   :  { %4037 = vmatpush1.bf16.msra.mxu1 %v6230_v57  ;;  %v6286_v57 = vld [vmem:[#allocation9 + $0x100] ss:$20 sps:$4 sm:$0xff]  }
 0x4fe   :  { %4242 = vmatpush1.bf16.msra.mxu0 %v6233_v58  ;;  %4038 = vmatprep.subr.bf16.mxu1 %v6238_v61  ;;  %v6287_v58 = vld [vmem:[#allocation9 + $0x380] ss:$20 sps:$4 sm:$0xff]   ;;  %v6288_v61 = vld [vmem:[#allocation9 + $0x268] ss:$20 sps:$4 sm:$0xff]  }
 0x4ff   :  { %4243 = vmatprep.subr.bf16.mxu0 %v6241_v2  ;;  %v6289_v2 = vld [vmem:[#allocation9 + $0x4e8] ss:$20 sps:$4 sm:$0xff]  }
 0x501   :  { %4039 = vmatpush1.bf16.msra.mxu1 %v6236_v4  ;;  %v6290_v4 = vld [vmem:[#allocation9 + $0x128] ss:$20 sps:$4 sm:$0xff]  }
 0x502   :  { %4244 = vmatpush1.bf16.msra.mxu0 %v6239_v5  ;;  %4040 = vmatprep.subr.bf16.mxu1 %v6244_v6  ;;  %v6291_v5 = vld [vmem:[#allocation9 + $0x3a8] ss:$20 sps:$4 sm:$0xff]   ;;  %v6292_v6 = vld [vmem:[#allocation9 + $0x650] ss:$20 sps:$4 sm:$0xff]  }
 0x503   :  { %4245 = vmatprep.subr.bf16.mxu0 %v6247_v8  ;;  %v6294_v8 = vld [vmem:[#allocation9 + $0x510] ss:$20 sps:$4 sm:$0xff]  }
 0x505   :  { %4041 = vmatpush1.bf16.msra.mxu1 %v6242_v10  ;;  %v6295_v10 = vld [vmem:[#allocation9 + $0x790] ss:$20 sps:$4 sm:$0xff]  }
 0x506   :  { %4246 = vmatpush1.bf16.msra.mxu0 %v6245_v12  ;;  %4042 = vmatprep.subr.bf16.mxu1 %v6250_v15  ;;  %v6296_v12 = vld [vmem:[#allocation9 + $0x678] ss:$20 sps:$4 sm:$0xff]  }
 0x507   :  { %4247 = vmatprep.subr.bf16.mxu0 %v6253_v21  ;;  %v6297_v15 = vld [vmem:[#allocation9 + $0x8f8] ss:$20 sps:$4 sm:$0xff]  }
 0x508   :  { %v6299_v21 = vld [vmem:[#allocation9 + $0x7b8] ss:$20 sps:$4 sm:$0xff]  }
 0x509   :  { %4043 = vmatpush1.bf16.msra.mxu1 %v6248_v17  ;;  %v6300_v17 = vld [vmem:[#allocation9 + $0x6a0] ss:$20 sps:$4 sm:$0xff]  }
 0x50a   :  { %4248 = vmatpush1.bf16.msra.mxu0 %v6251_v20  ;;  %4044 = vmatprep.subr.bf16.mxu1 %v6256_v32  ;;  %v6301_v20 = vld [vmem:[#allocation9 + $0x920] ss:$20 sps:$4 sm:$0xff]  }
 0x50b   :  { %4249 = vmatprep.subr.bf16.mxu0 %v6259_v29  ;;  %v6302_v32 = vld [vmem:[#allocation9 + $0x560] ss:$20 sps:$4 sm:$0xff]   ;;  %v6306_v29 = vld [vmem:[#allocation9 + $0x588] ss:$20 sps:$4 sm:$0xff]  }
 0x50d   :  { %4045 = vmatpush1.bf16.msra.mxu1 %v6254_v48  ;;  %v6308_v48 = vld [vmem:[#allocation9 + $0x6f0] ss:$20 sps:$4 sm:$0xff]  }
 0x50e   :  { %4250 = vmatpush1.bf16.msra.mxu0 %v6257_v24  ;;  %5300 = vmatprep.subr.bf16.mxu1 %v6260_v25  ;;  %v6309_v24 = vld [vmem:[#allocation9 + $0x970] ss:$20 sps:$4 sm:$0xff]  }
 0x50f   :  { %5322 = vmatprep.subr.bf16.mxu0 %v6261_v51  ;;  %v6311_v25 = vld [vmem:[#allocation9 + $0x830] ss:$20 sps:$4 sm:$0xff]   ;;  %v6313_v51 = vld [vmem:[#allocation9 + $0x998] ss:$20 sps:$4 sm:$0xff]  }
 0x510   :  { %4047 = vmatmul.mubr.bf16.vlgmr.msra.gmra.mrb[28].mxu1 %v7035_v63 }
 0x511   :  { %4252 = vmatmul.mubr.bf16.vlgmr.msra.gmra.mrb[20].mxu0 %v7035_v63  ;;  %5301 = vmatpush3.bf16.msra.mxu1 %v6262_v60  ;;  %v6314_v60 = vld [vmem:[#allocation9 + $0x5d8] ss:$20 sps:$4 sm:$0xff]  }
 0x512   :  { %4292 = vmatprep.mubr.bf16.mxu1 %v6962_v39  ;;  %5323 = vmatpush3.bf16.msra.mxu0 %v6263_v31  ;;  %v6275_v39 = vld [vmem:[#allocation9 + $0x308] ss:$20 sps:$4 sm:$0xff]   ;;  %v6315_v31 = vld [vmem:[#allocation9 + $0x858] ss:$20 sps:$4 sm:$0xff]  }
 0x513   :  { %4332 = vmatprep.mubr.bf16.mxu0 %v6972_v19  ;;  %5302 = vmatprep.subr.bf16.mxu1 %v6264_v9  ;;  %v6278_v19 = vld [vmem:[#allocation9 + $0xb0] ss:$20 sps:$4 sm:$0xff]   ;;  %v6316_v9 = vld [vmem:[#allocation9 + $0x740] ss:$20 sps:$4 sm:$0xff]  }
 0x514   :  { %5324 = vmatprep.subr.bf16.mxu0 %v6265_v33  ;;  %v6317_v33 = vld [vmem:[#allocation9 + $0x9c0] ss:$20 sps:$4 sm:$0xff]  }
 0x515   :  { %5303 = vmatpush3.bf16.msra.mxu1 %v6266_v27  ;;  %v6318_v27 = vld [vmem:[#allocation9 + $0x600] ss:$20 sps:$4 sm:$0xff]  }
 0x516   :  { %5325 = vmatpush3.bf16.msra.mxu0 %v6267_v36  ;;  %5304 = vmatprep.subr.bf16.mxu1 %v6268_v14  ;;  %v6319_v36 = vld [vmem:[#allocation9 + $0x880] ss:$20 sps:$4 sm:$0xff]   ;;  %v6320_v14 = vld [vmem:[#allocation9 + $0x768] ss:$20 sps:$4 sm:$0xff]  }
 0x517   :  { %5326 = vmatprep.subr.bf16.mxu0 %v6269_v47  ;;  %v6321_v47 = vld [vmem:[#allocation9 + $0x9e8] ss:$20 sps:$4 sm:$0xff]  }
 0x519   :  { %5305 = vmatpush3.bf16.msra.mxu1 %v6270_v1  ;;  %v4491_v1 = vld [vmem:[%s7326_s9 + $0x80] sm:$0xff] }
 0x51a   :  { %5327 = vmatpush3.bf16.msra.mxu0 %v6271_v23  ;;  %5306 = vmatprep.subr.bf16.mxu1 %v6272_v49  ;;  %v4492_v23 = vld [vmem:[%s7326_s9 + $0x88] sm:$0xff] }
 0x51b   :  { %5328 = vmatprep.subr.bf16.mxu0 %v6273_v50  ;;  %v6322_v49 = vld [vmem:[#allocation9 + $0x628] ss:$20 sps:$4 sm:$0xff]  }
 0x51c   :  { %v6323_v50 = vld [vmem:[#allocation9 + $0x8a8] ss:$20 sps:$4 sm:$0xff]  }
 0x51d   :  { %5307 = vmatpush3.bf16.msra.mxu1 %v6274_v41  ;;  %v6324_v41 = vld [vmem:[#allocation9 + $0xb50] ss:$20 sps:$4 sm:$0xff]  }
 0x51e   :  { %5329 = vmatpush3.bf16.msra.mxu0 %v6275_v39  ;;  %5308 = vmatprep.subr.bf16.mxu1 %v6276_v28  ;;  %v5575_v39 = vpack.c.bf16 %v4492_v23, %v4491_v1  ;;  %v4475_v28 = vld [vmem:[%s7326_s9] sm:$0xff]  ;;  %v4488_v1 = vld [vmem:[%s7326_s9 + $0x68] sm:$0xff] }
 0x51f   :  { %5330 = vmatprep.subr.bf16.mxu0 %v6277_v44  ;;  %v4476_v44 = vld [vmem:[%s7326_s9 + $0x8] sm:$0xff] }
 0x520   :  { %v6337_v23 = vld [vmem:[#allocation9 + $0xb00] ss:$20 sps:$4 sm:$0xff]  }
 0x521   :  { %5309 = vmatpush3.bf16.msra.mxu1 %v6278_v19  ;;  %v6325_v19 = vld [vmem:[#allocation9 + $0xa10] ss:$20 sps:$4 sm:$0xff]  }
 0x522   :  { %5331 = vmatpush3.bf16.msra.mxu0 %v6279_v40  ;;  %5310 = vmatprep.subr.bf16.mxu1 %v6280_v43  ;;  %v4493_v40 = vld [vmem:[%s7326_s9 + $0x90] sm:$0xff]  ;;  %v4494_v43 = vld [vmem:[%s7326_s9 + $0x98] sm:$0xff] }
 0x523   :  { %5332 = vmatprep.subr.bf16.mxu0 %v6281_v55  ;;  %v6326_v55 = vld [vmem:[#allocation9 + $0xb78] ss:$20 sps:$4 sm:$0xff]  }
 0x525   :  { %5311 = vmatpush3.bf16.msra.mxu1 %v6282_v30  ;;  %v5577_v30 = vpack.c.bf16 %v4476_v44, %v4475_v28  ;;  %v4524_v28 = vld [vmem:[%s7326_s9 + $0x188] sm:$0xff] }
 0x526   :  { %5333 = vmatpush3.bf16.msra.mxu0 %v6283_v42  ;;  %5312 = vmatprep.subr.bf16.mxu1 %v6284_v56  ;;  %v5579_v42 = vpack.c.bf16 %v4494_v43, %v4493_v40  ;;  %v4477_v56 = vld [vmem:[%s7326_s9 + $0x10] sm:$0xff]  ;;  %v4490_v43 = vld [vmem:[%s7326_s9 + $0x78] sm:$0xff] }
 0x527   :  { %5334 = vmatprep.subr.bf16.mxu0 %v6285_v52  ;;  %v4478_v52 = vld [vmem:[%s7326_s9 + $0x18] sm:$0xff]  ;;  %v4489_v40 = vld [vmem:[%s7326_s9 + $0x70] sm:$0xff] }
 0x529   :  { %5313 = vmatpush3.bf16.msra.mxu1 %v6286_v57  ;;  %v6327_v57 = vld [vmem:[#allocation9 + $0xa38] ss:$20 sps:$4 sm:$0xff]  }
 0x52a   :  { %5335 = vmatpush3.bf16.msra.mxu0 %v6287_v58  ;;  %5314 = vmatprep.subr.bf16.mxu1 %v6288_v61  ;;  %v4495_v58 = vld [vmem:[%s7326_s9 + $0xa0] sm:$0xff] }
 0x52b   :  { %5336 = vmatprep.subr.bf16.mxu0 %v6289_v2  ;;  %v6328_v61 = vld [vmem:[#allocation9 + $0xba0] ss:$20 sps:$4 sm:$0xff]   ;;  %v5581_v2 = vpack.c.bf16 %v4478_v52, %v4477_v56 }
 0x52c   :  { %v4508_v56 = vld [vmem:[%s7326_s9 + $0x108] sm:$0xff]  ;;  %v4525_v52 = vld [vmem:[%s7326_s9 + $0x190] sm:$0xff] }
 0x52d   :  { %5315 = vmatpush3.bf16.msra.mxu1 %v6290_v4 }
 0x52e   :  { %5337 = vmatpush3.bf16.msra.mxu0 %v6291_v5  ;;  %5344 = vmatprep.subr.bf16.mxu1 %v6292_v6  ;;  %v4480_v5 = vld [vmem:[%s7326_s9 + $0x28] sm:$0xff] }
 0x52f   :  { %5366 = vmatprep.subr.bf16.mxu0 %v6293_v7  ;;  %v6329_v6 = vld [vmem:[#allocation9 + $0xa60] ss:$20 sps:$4 sm:$0xff]   ;;  %v4498_v7 = vld [vmem:[%s7326_s9 + $0xb8] sm:$0xff] }
 0x530   :  { %4293 = vmatmul.mubr.bf16.vlgmr.msra.gmra.mrb[32].mxu1 %v6964_v62  ;;  %v6303_v62 = vld [vmem:[#allocation9 + $0x7e0] ss:$20 sps:$4 sm:$0xff]  }
 0x531   :  { %4333 = vmatmul.mubr.bf16.vlgmr.msra.gmra.mrb[24].mxu0 %v6992_v34  ;;  %5345 = vmatpush3.bf16.msra.mxu1 %v6294_v8  ;;  %v6305_v34 = vld [vmem:[#allocation9 + $0x948] ss:$20 sps:$4 sm:$0xff]  }
 0x532   :  { %4372 = vmatprep.mubr.bf16.mxu1 %v6994_v38  ;;  %5367 = vmatpush3.bf16.msra.mxu0 %v6295_v10  ;;  %v6307_v38 = vld [vmem:[#allocation9 + $0x808] ss:$20 sps:$4 sm:$0xff]  }
 0x533   :  { %4412 = vmatprep.mubr.bf16.mxu0 %v7011_v26  ;;  %5346 = vmatprep.subr.bf16.mxu1 %v6296_v12  ;;  %v6310_v26 = vld [vmem:[#allocation9 + $0x5b0] ss:$20 sps:$4 sm:$0xff]   ;;  %v6330_v8 = vld [vmem:[#allocation9 + $0xbc8] ss:$20 sps:$4 sm:$0xff]  }
 0x534   :  { %5368 = vmatprep.subr.bf16.mxu0 %v6297_v15  ;;  %v4481_v15 = vld [vmem:[%s7326_s9 + $0x30] sm:$0xff] }
 0x535   :  { %5347 = vmatpush3.bf16.msra.mxu1 %v6298_v16  ;;  %v4482_v16 = vld [vmem:[%s7326_s9 + $0x38] sm:$0xff] }
 0x536   :  { %5369 = vmatpush3.bf16.msra.mxu0 %v6299_v21  ;;  %5348 = vmatprep.subr.bf16.mxu1 %v6300_v17  ;;  %v6331_v21 = vld [vmem:[#allocation9 + $0xa88] ss:$20 sps:$4 sm:$0xff]   ;;  %v4499_v17 = vld [vmem:[%s7326_s9 + $0xc0] sm:$0xff] }
 0x537   :  { %5370 = vmatprep.subr.bf16.mxu0 %v6301_v20  ;;  %v4500_v20 = vld [vmem:[%s7326_s9 + $0xc8] sm:$0xff] }
 0x539   :  { %5349 = vmatpush3.bf16.msra.mxu1 %v6302_v32  ;;  %v6332_v32 = vld [vmem:[#allocation9 + $0xbf0] ss:$20 sps:$4 sm:$0xff]  }
 0x53a   :  { %5371 = vmatpush3.bf16.msra.mxu0 %v6303_v62  ;;  %5350 = vmatprep.subr.bf16.mxu1 %v6304_v22  ;;  %v5589_v62 = vpack.c.bf16 %v4482_v16, %v4481_v15  ;;  %v5591_v22 = vpack.c.bf16 %v4500_v20, %v4499_v17  ;;  %v4513_v16 = vld [vmem:[%s7326_s9 + $0x130] sm:$0xff]  ;;  %v4531_v17 = vld [vmem:[%s7326_s9 + $0x1c0] sm:$0xff]  ;;  %v4532_v20 = vld [vmem:[%s7326_s9 + $0x1c8] sm:$0xff] }
 0x53b   :  { %5372 = vmatprep.subr.bf16.mxu0 %v6305_v34  ;;  %v4483_v34 = vld [vmem:[%s7326_s9 + $0x40] sm:$0xff] }
 0x53d   :  { %5351 = vmatpush3.bf16.msra.mxu1 %v6306_v29  ;;  %v4484_v29 = vld [vmem:[%s7326_s9 + $0x48] sm:$0xff] }
 0x53e   :  { %5373 = vmatpush3.bf16.msra.mxu0 %v6307_v38  ;;  %5352 = vmatprep.subr.bf16.mxu1 %v6308_v48  ;;  %v6333_v38 = vld [vmem:[#allocation9 + $0xab0] ss:$20 sps:$4 sm:$0xff]  }
 0x53f   :  { %5374 = vmatprep.subr.bf16.mxu0 %v6309_v24  ;;  %v4501_v48 = vld [vmem:[%s7326_s9 + $0xd0] sm:$0xff]  ;;  %v4502_v24 = vld [vmem:[%s7326_s9 + $0xd8] sm:$0xff] }
 0x541   :  { %5353 = vmatpush3.bf16.msra.mxu1 %v6310_v26  ;;  %v6334_v26 = vld [vmem:[#allocation9 + $0xc18] ss:$20 sps:$4 sm:$0xff]  }
 0x542   :  { %5375 = vmatpush3.bf16.msra.mxu0 %v6311_v25  ;;  %5354 = vmatprep.subr.bf16.mxu1 %v6312_v11  ;;  %v5593_v25 = vpack.c.bf16 %v4484_v29, %v4483_v34  ;;  %v5595_v11 = vpack.c.bf16 %v4502_v24, %v4501_v48  ;;  %v4516_v34 = vld [vmem:[%s7326_s9 + $0x148] sm:$0xff]  ;;  %v4533_v29 = vld [vmem:[%s7326_s9 + $0x1d0] sm:$0xff] }
 0x543   :  { %5376 = vmatprep.subr.bf16.mxu0 %v6313_v51  ;;  %v4485_v51 = vld [vmem:[%s7326_s9 + $0x50] sm:$0xff] }
 0x545   :  { %5355 = vmatpush3.bf16.msra.mxu1 %v6314_v60  ;;  %v4486_v60 = vld [vmem:[%s7326_s9 + $0x58] sm:$0xff] }
 0x546   :  { %5377 = vmatpush3.bf16.msra.mxu0 %v6315_v31  ;;  %5356 = vmatprep.subr.bf16.mxu1 %v6316_v9  ;;  %v6335_v31 = vld [vmem:[#allocation9 + $0xad8] ss:$20 sps:$4 sm:$0xff]   ;;  %v6336_v9 = vld [vmem:[#allocation9 + $0xc40] ss:$20 sps:$4 sm:$0xff]  }
 0x547   :  { %5378 = vmatprep.subr.bf16.mxu0 %v6317_v33  ;;  %v4503_v33 = vld [vmem:[%s7326_s9 + $0xe0] sm:$0xff] }
 0x549   :  { %5357 = vmatpush3.bf16.msra.mxu1 %v6318_v27  ;;  %v4504_v27 = vld [vmem:[%s7326_s9 + $0xe8] sm:$0xff] }
 0x54a   :  { %5379 = vmatpush3.bf16.msra.mxu0 %v6319_v36  ;;  %5358 = vmatprep.subr.bf16.mxu1 %v6320_v14  ;;  %v5597_v36 = vpack.c.bf16 %v4486_v60, %v4485_v51  ;;  %v5599_v14 = vpack.c.bf16 %v4504_v27, %v4503_v33  ;;  %v4536_v51 = vld [vmem:[%s7326_s9 + $0x1e8] sm:$0xff]  ;;  %v4537_v27 = vld [vmem:[%s7326_s9 + $0x1f0] sm:$0xff] }
 0x54b   :  { %5380 = vmatprep.subr.bf16.mxu0 %v6321_v47  ;;  %v4487_v47 = vld [vmem:[%s7326_s9 + $0x60] sm:$0xff]  ;;  %v4520_v33 = vld [vmem:[%s7326_s9 + $0x168] sm:$0xff] }
 0x54c   :  { %v5601_v44 = vpack.c.bf16 %v4488_v1, %v4487_v47  ;;  %v4521_v1 = vld [vmem:[%s7326_s9 + $0x170] sm:$0xff] }
 0x54d   :  { %5359 = vmatpush3.bf16.msra.mxu1 %v6322_v49  ;;  %v6338_v49 = vld [vmem:[#allocation9 + $0xc68] ss:$20 sps:$4 sm:$0xff]  }
 0x54e   :  { %5381 = vmatpush3.bf16.msra.mxu0 %v6323_v50  ;;  %5388 = vmatprep.subr.bf16.mxu1 %v6324_v41  ;;  %v4505_v50 = vld [vmem:[%s7326_s9 + $0xf0] sm:$0xff]  ;;  %v4506_v41 = vld [vmem:[%s7326_s9 + $0xf8] sm:$0xff] }
 0x54f   :  { %5576 = vmatprep.subr.bf16.mxu0 %v5575_v39  ;;  %v4523_v39 = vld [vmem:[%s7326_s9 + $0x180] sm:$0xff] }
 0x550   :  { %4373 = vmatmul.mubr.bf16.vlgmr.msra.gmra.mrb[36].mxu1 %v7008_v46  ;;  %v4496_v46 = vld [vmem:[%s7326_s9 + $0xa8] sm:$0xff] }
 0x551   :  { %4413 = vmatmul.mubr.bf16.vlgmr.msra.gmra.mrb[28].mxu0 %v7024_v59  ;;  %5389 = vmatpush3.bf16.msra.mxu1 %v6325_v19  ;;  %v5583_v4 = vpack.c.bf16 %v4496_v46, %v4495_v58  ;;  %v4479_v59 = vld [vmem:[%s7326_s9 + $0x20] sm:$0xff]  ;;  %v5603_v19 = vpack.c.bf16 %v4506_v41, %v4505_v50  ;;  %v5605_v58 = vpack.c.bf16 %v4490_v43, %v4489_v40  ;;  %v7242_v50 = vld [vmem:[#allocation10] sm:$0x1f] }
 0x552   :  { %4452 = vmatprep.mubr.bf16.mxu1 %v7027_v3  ;;  %5390 = vmatprep.subr.bf16.mxu1 %v6326_v55  ;;  %v4497_v3 = vld [vmem:[%s7326_s9 + $0xb0] sm:$0xff]  ;;  %v5585_v10 = vpack.c.bf16 %v4480_v5, %v4479_v59  ;;  %v4527_v59 = vld [vmem:[%s7326_s9 + $0x1a0] sm:$0xff]  ;;  %v4528_v5 = vld [vmem:[%s7326_s9 + $0x1a8] sm:$0xff]  ;;  %v1748_v41 = vrot.slane %v7242_v50, %v6943_v18 }
 0x553   :  { %5578 = vmatpush3.bf16.msra.mxu0 %v5577_v30  ;;  %v5587_v12 = vpack.c.bf16 %v4498_v7, %v4497_v3  ;;  %v6339_v55 = vld [vmem:[#allocation9 + $0xb28] ss:$20 sps:$4 sm:$0xff]   ;;  %v5607_v30 = vpack.c.bf16 %v4524_v28, %v4523_v39  ;;  %v5615_v3 = vpack.c.bf16 %v4528_v5, %v4527_v59  ;;  %v4511_v7 = vld [vmem:[%s7326_s9 + $0x120] sm:$0xff]  ;;  %v1756_v39 = vrot.slane %v7242_v50, %v875_v13 }
 0x554   :  { %5580 = vmatprep.subr.bf16.mxu0 %v5579_v42  ;;  %v4507_v42 = vld [vmem:[%s7326_s9 + $0x100] sm:$0xff]  ;;  %v1752_v28 = vrot.slane %v7242_v50, %v6948_v45  ;;  %v4540_v18 = vld [vmem:[%s7326_s9 + $0x208] sm:$0xff] }
 0x555   :  { %5391 = vmatpush3.bf16.msra.mxu1 %v6327_v57  ;;  %v4526_v57 = vld [vmem:[%s7326_s9 + $0x198] sm:$0xff]  ;;  %v5609_v46 = vpack.c.bf16 %v4508_v56, %v4507_v42 }
 0x556   :  { %5392 = vmatprep.subr.bf16.mxu1 %v6328_v61  ;;  %v5611_v61 = vpack.c.bf16 %v4526_v57, %v4525_v52 }
 0x557   :  { %5582 = vmatpush3.bf16.msra.mxu0 %v5581_v2  ;;  %v4509_v2 = vld [vmem:[%s7326_s9 + $0x110] sm:$0xff] }
 0x558   :  { %5584 = vmatprep.subr.bf16.mxu0 %v5583_v4  ;;  %v4510_v4 = vld [vmem:[%s7326_s9 + $0x118] sm:$0xff] }
 0x559   :  { %5393 = vmatpush3.bf16.msra.mxu1 %v6329_v6  ;;  %v5613_v6 = vpack.c.bf16 %v4510_v4, %v4509_v2 }
 0x55a   :  { %5394 = vmatprep.subr.bf16.mxu1 %v6330_v8  ;;  %v4512_v8 = vld [vmem:[%s7326_s9 + $0x128] sm:$0xff] }
 0x55b   :  { %5586 = vmatpush3.bf16.msra.mxu0 %v5585_v10  ;;  %v4529_v10 = vld [vmem:[%s7326_s9 + $0x1b0] sm:$0xff] }
 0x55c   :  { %5588 = vmatprep.subr.bf16.mxu0 %v5587_v12  ;;  %v5617_v12 = vpack.c.bf16 %v4512_v8, %v4511_v7 }
 0x55d   :  { %5395 = vmatpush3.bf16.msra.mxu1 %v6331_v21  ;;  %v4514_v21 = vld [vmem:[%s7326_s9 + $0x138] sm:$0xff] }
 0x55e   :  { %5396 = vmatprep.subr.bf16.mxu1 %v6332_v32  ;;  %v5621_v32 = vpack.c.bf16 %v4514_v21, %v4513_v16  ;;  %v4545_v21 = vld [vmem:[%s7326_s9 + $0x230] sm:$0xff] }
 0x55f   :  { %5590 = vmatpush3.bf16.msra.mxu0 %v5589_v62  ;;  %v5623_v62 = vpack.c.bf16 %v4532_v20, %v4531_v17  ;;  %v4546_v17 = vld [vmem:[%s7326_s9 + $0x238] sm:$0xff] }
 0x560   :  { %5592 = vmatprep.subr.bf16.mxu0 %v5591_v22  ;;  %v4515_v22 = vld [vmem:[%s7326_s9 + $0x140] sm:$0xff]  ;;  %v5649_v20 = vpack.c.bf16 %v4546_v17, %v4545_v21 }
 0x561   :  { %5397 = vmatpush3.bf16.msra.mxu1 %v6333_v38  ;;  %v4534_v38 = vld [vmem:[%s7326_s9 + $0x1d8] sm:$0xff]  ;;  %v5625_v48 = vpack.c.bf16 %v4516_v34, %v4515_v22  ;;  %v4549_v22 = vld [vmem:[%s7326_s9 + $0x250] sm:$0xff] }
 0x562   :  { %5398 = vmatprep.subr.bf16.mxu1 %v6334_v26  ;;  %v5627_v24 = vpack.c.bf16 %v4534_v38, %v4533_v29  ;;  %v4517_v26 = vld [vmem:[%s7326_s9 + $0x150] sm:$0xff]  ;;  %v4550_v34 = vld [vmem:[%s7326_s9 + $0x258] sm:$0xff]  ;;  %v4551_v38 = vld [vmem:[%s7326_s9 + $0x260] sm:$0xff] }
 0x563   :  { %5594 = vmatpush3.bf16.msra.mxu0 %v5593_v25  ;;  %v4518_v25 = vld [vmem:[%s7326_s9 + $0x158] sm:$0xff]  ;;  %v5655_v29 = vpack.c.bf16 %v4550_v34, %v4549_v22 }
 0x564   :  { %5596 = vmatprep.subr.bf16.mxu0 %v5595_v11  ;;  %v4535_v11 = vld [vmem:[%s7326_s9 + $0x1e0] sm:$0xff]  ;;  %v5629_v60 = vpack.c.bf16 %v4518_v25, %v4517_v26  ;;  %v4553_v26 = vld [vmem:[%s7326_s9 + $0x270] sm:$0xff]  ;;  %v4554_v25 = vld [vmem:[%s7326_s9 + $0x278] sm:$0xff] }
 0x565   :  { %5399 = vmatpush3.bf16.msra.mxu1 %v6335_v31  ;;  %v5631_v31 = vpack.c.bf16 %v4536_v51, %v4535_v11  ;;  %v1764_v51 = vrot.slane %v7242_v50, %v883_v53 }
 0x566   :  { %5400 = vmatprep.subr.bf16.mxu1 %v6336_v9  ;;  %v4519_v9 = vld [vmem:[%s7326_s9 + $0x160] sm:$0xff] }
 0x567   :  { %5598 = vmatpush3.bf16.msra.mxu0 %v5597_v36  ;;  %v4538_v36 = vld [vmem:[%s7326_s9 + $0x1f8] sm:$0xff] }
 0x568   :  { %5600 = vmatprep.subr.bf16.mxu0 %v5599_v14  ;;  %v5633_v14 = vpack.c.bf16 %v4520_v33, %v4519_v9  ;;  %v5635_v47 = vpack.c.bf16 %v4538_v36, %v4537_v27  ;;  %v5661_v9 = vpack.c.bf16 %v4554_v25, %v4553_v26 }
 0x569   :  { %5401 = vmatpush3.bf16.msra.mxu1 %v6337_v23  ;;  %v4522_v23 = vld [vmem:[%s7326_s9 + $0x178] sm:$0xff] }
 0x56a   :  { %5402 = vmatprep.subr.bf16.mxu1 %v6338_v49  ;;  %v5637_v49 = vpack.c.bf16 %v4522_v23, %v4521_v1 }
 0x56b   :  { %5602 = vmatpush3.bf16.msra.mxu0 %v5601_v44  ;;  %v1760_v44 = vrot.slane %v7242_v50, %v879_v54 }
 0x56c   :  { %5604 = vmatprep.subr.bf16.mxu0 %v5603_v19 }
 0x56d   :  { %5403 = vmatpush3.bf16.msra.mxu1 %v6339_v55 }
 0x56e   :  { %5608 = vmatprep.subr.bf16.mxu1 %v5607_v30  ;;  %v4539_v30 = vld [vmem:[%s7326_s9 + $0x200] sm:$0xff] }
 0x56f   :  { %5606 = vmatpush3.bf16.msra.mxu0 %v5605_v58  ;;  %v5640_v4 = vpack.c.bf16 %v4540_v18, %v4539_v30 }
 0x570   :  { %4453 = vmatmul.mubr.bf16.vlgmr.msra.gmra.mrb[40].mxu1 %v7035_v63  ;;  %5639 = vmatprep.subr.bf16.mxu0 %v6538_v35  ;;  %v4530_v63 = vld [vmem:[%s7326_s9 + $0x1b8] sm:$0xff] }
 0x571   :  { %5610 = vmatpush3.bf16.msra.mxu1 %v5609_v46  ;;  %v5619_v15 = vpack.c.bf16 %v4530_v63, %v4529_v10 }
 0x572   :  { %5612 = vmatprep.subr.bf16.mxu1 %v5611_v61 }
 0x575   :  { %5614 = vmatpush3.bf16.msra.mxu1 %v5613_v6  ;;  %v4541_v6 = vld [vmem:[%s7326_s9 + $0x210] sm:$0xff] }
 0x576   :  { %5616 = vmatprep.subr.bf16.mxu1 %v5615_v3  ;;  %v4542_v3 = vld [vmem:[%s7326_s9 + $0x218] sm:$0xff] }
 0x577   :  { %v5643_v63 = vpack.c.bf16 %v4542_v3, %v4541_v6 }
 0x579   :  { %5618 = vmatpush3.bf16.msra.mxu1 %v5617_v12  ;;  %v4543_v12 = vld [vmem:[%s7326_s9 + $0x220] sm:$0xff] }
 0x57a   :  { %5620 = vmatprep.subr.bf16.mxu1 %v5619_v15  ;;  %v4544_v15 = vld [vmem:[%s7326_s9 + $0x228] sm:$0xff] }
 0x57b   :  { %v5646_v16 = vpack.c.bf16 %v4544_v15, %v4543_v12 }
 0x57d   :  { %5622 = vmatpush3.bf16.msra.mxu1 %v5621_v32  ;;  %v4548_v32 = vld [vmem:[%s7326_s9 + $0x248] sm:$0xff] }
 0x57e   :  { %5624 = vmatprep.subr.bf16.mxu1 %v5623_v62 }
 0x581   :  { %5626 = vmatpush3.bf16.msra.mxu1 %v5625_v48  ;;  %v4552_v48 = vld [vmem:[%s7326_s9 + $0x268] sm:$0xff] }
 0x582   :  { %5628 = vmatprep.subr.bf16.mxu1 %v5627_v24  ;;  %v5658_v24 = vpack.c.bf16 %v4552_v48, %v4551_v38 }
 0x585   :  { %5630 = vmatpush3.bf16.msra.mxu1 %v5629_v60 }
 0x586   :  { %5632 = vmatprep.subr.bf16.mxu1 %v5631_v31 }
 0x589   :  { %5634 = vmatpush3.bf16.msra.mxu1 %v5633_v14 }
 0x58a   :  { %5636 = vmatprep.subr.bf16.mxu1 %v5635_v47 }
 0x58d   :  { %5638 = vmatpush3.bf16.msra.mxu1 %v5637_v49 }
 0x5e3   :  { %v4048_v19 = vpop.f32.mrb[28].mxu1 }
 0x5e4   :  { %v5663_v40 = vadd.f32 %v4048_v19, %v1748_v41  ;;  %v4253_v43 = vpop.f32.mrb[20].mxu0  ;;  %v4050_v55 = vpop.f32.mrb[29].mxu1 }
 0x5e5   :  { %v5665_v13 = vadd.f32 %v4253_v43, %v1756_v39  ;;  %v5664_v42 = vadd.f32 %v4050_v55, %v1752_v28  ;;  %v4255_v56 = vpop.f32.mrb[21].mxu0  ;;  %v4052_v45 = vpop.f32.mrb[30].mxu1 }
 0x5e6   :  { %v4465_v52 = vmul.f32 0.1, %v5663_v40  ;;  %v5666_v57 = vadd.f32 %v4255_v56, %v1760_v44  ;;  %v4257_v58 = vpop.f32.mrb[22].mxu0  ;;  %v4053_v54 = vpop.f32.mrb[31].mxu1  ;;  %vm4460_vm1 = vcmp.gt.f32.partialorder %v5663_v40, 0.0 }
 0x5e7   :  { %v4467_v46 = vmul.f32 0.1, %v5665_v13  ;;  %v4466_v61 = vmul.f32 0.1, %v5664_v42  ;;  %v4258_v2 = vpop.f32.mrb[23].mxu0  ;;  %vm4462_vm3 = vcmp.gt.f32.partialorder %v5665_v13, 0.0 }
 0x5e8   :  { %v4468_v59 = vmul.f32 0.1, %v5666_v57  ;;  %vm4461_vm4 = vcmp.gt.f32.partialorder %v5664_v42, 0.0  ;;  %vm4463_vm5 = vcmp.gt.f32.partialorder %v5666_v57, 0.0  ;;  %v4470_v8 = vsel %vm4460_vm1, %v5663_v40, %v4465_v52 }
 0x5e9   :  { %v4471_v5 = vsel %vm4461_vm4, %v5664_v42, %v4466_v61  ;;  %v4472_v10 = vsel %vm4462_vm3, %v5665_v13, %v4467_v46  ;;  %v5244_v61 = vld [vmem:[#allocation12] ss:$0 sm:$0xff] }
 0x5ea   :  { %4626 = vmatprep.mubr.f32.mxu0 %v4471_v5  ;;  %v4473_v7 = vsel %vm4463_vm5, %v5666_v57, %v4468_v59 }
 0x5eb   :  { %4696 = vmatprep.mubr.f32.mxu1 %v4473_v7  ;;  %4627 = vmatmul.mubr.f32.vlgmr.msra.gmra.mrb[32].mxu0 %v4470_v8 }
 0x5ec   :  { %4697 = vmatmul.mubr.f32.vlgmr.msra.gmra.mrb[10].mxu1 %v4472_v10  ;;  %5641 = vmatpush3.bf16.msra.mxu0 %v5640_v4 }
 0x5ed   :  { %5642 = vmatprep.subr.bf16.mxu0 %v6538_v35  ;;  %5560 = vmatprep.mubr.msk.f32.mxu0 %vm6540_vm2, %v6541_v0  ;;  %v4547_v0 = vld [vmem:[%s7326_s9 + $0x240] sm:$0xff] }
 0x5ee   :  { %v5652_v62 = vpack.c.bf16 %v4548_v32, %v4547_v0 }
 0x5f0   :  { %5644 = vmatpush3.bf16.msra.mxu0 %v5643_v63 }
 0x5f1   :  { %5645 = vmatprep.subr.bf16.mxu0 %v6538_v35 }
 0x5f4   :  { %5647 = vmatpush3.bf16.msra.mxu0 %v5646_v16 }
 0x5f5   :  { %5648 = vmatprep.subr.bf16.mxu0 %v6538_v35 }
 0x5f8   :  { %5650 = vmatpush3.bf16.msra.mxu0 %v5649_v20 }
 0x5f9   :  { %5651 = vmatprep.subr.bf16.mxu0 %v6538_v35 }
 0x5fc   :  { %5653 = vmatpush3.bf16.msra.mxu0 %v5652_v62 }
 0x5fd   :  { %5654 = vmatprep.subr.bf16.mxu0 %v6538_v35 }
 0x600   :  { %5656 = vmatpush3.bf16.msra.mxu0 %v5655_v29 }
 0x601   :  { %5657 = vmatprep.subr.bf16.mxu0 %v6538_v35 }
 0x603   :  { %v5316_v11 = vpop.f32.mrb[32].mxu1 }
 0x604   :  { %v5338_v60 = vpop.f32.mrb[24].mxu0  ;;  %v5317_v31 = vpop.f32.mrb[33].mxu1  ;;  %5659 = vmatpush3.bf16.msra.mxu0 %v5658_v24 }
 0x605   :  { %v5318_v33 = vadd.f32 %v5317_v31, %v5316_v11  ;;  %v5339_v27 = vpop.f32.mrb[25].mxu0  ;;  %v5319_v36 = vpop.f32.mrb[34].mxu1  ;;  %5660 = vmatprep.subr.bf16.mxu0 %v6538_v35 }
 0x606   :  { %v5340_v14 = vadd.f32 %v5339_v27, %v5338_v60  ;;  %v5341_v47 = vpop.f32.mrb[26].mxu0  ;;  %v5320_v1 = vpop.f32.mrb[35].mxu1 }
 0x607   :  { %v4295_v23 = vadd.f32 %v5318_v33, %v1764_v51  ;;  %v5342_v49 = vpop.f32.mrb[27].mxu0 }
 0x608   :  { %5662 = vmatpush3.bf16.msra.mxu0 %v5661_v9 }
 0x609   :  { %v4335_v41 = vadd.f32 %v5340_v14, %v4295_v23 }
 0x623   :  { %v5360_v39 = vpop.f32.mrb[36].mxu1 }
 0x624   :  { %v5382_v37 = vpop.f32.mrb[28].mxu0  ;;  %v5361_v28 = vpop.f32.mrb[37].mxu1 }
 0x625   :  { %v5362_v53 = vadd.f32 %v5361_v28, %v5360_v39  ;;  %v5383_v50 = vpop.f32.mrb[29].mxu0  ;;  %v5363_v44 = vpop.f32.mrb[38].mxu1 }
 0x626   :  { %v5384_v19 = vadd.f32 %v5383_v50, %v5382_v37  ;;  %v5385_v40 = vpop.f32.mrb[30].mxu0  ;;  %v5364_v43 = vpop.f32.mrb[39].mxu1 }
 0x627   :  { %v4375_v55 = vadd.f32 %v5362_v53, %v4335_v41  ;;  %v5386_v30 = vpop.f32.mrb[31].mxu0 }
 0x629   :  { %v4415_v18 = vadd.f32 %v5384_v19, %v4375_v55 }
 0x643   :  { %v5404_v35 = vpop.f32.mrb[40].mxu1 }
 0x644   :  { %v5405_v13 = vpop.f32.mrb[41].mxu1 }
 0x645   :  { %v5406_v42 = vadd.f32 %v5405_v13, %v5404_v35  ;;  %v5407_v56 = vpop.f32.mrb[42].mxu1 }
 0x646   :  { %v5408_v45 = vpop.f32.mrb[43].mxu1 }
 0x647   :  { %v4455_v52 = vadd.f32 %v5406_v42, %v4415_v18 }
 0x649   :  { %v4469_v57 = vmul.f32 0.1, %v4455_v52  ;;  %vm4464_vm2 = vcmp.gt.f32.partialorder %v4455_v52, 0.0 }
 0x64b   :  { %v4474_v58 = vsel %vm4464_vm2, %v4455_v52, %v4469_v57 }
 0x64c   :  { %5561 = vmatmul.mubr.f32.vlgmr.msra.gmra.mrb[34].mxu0 %v4474_v58 }
 0x6be   :  { %v5442_v54 = vpop.f32.mrb[32].mxu0 }
 0x6bf   :  { %v5477_v46 = vpop.f32.mrb[10].mxu1  ;;  %v5443_v2 = vpop.f32.mrb[33].mxu0 }
 0x6c0   :  { %v5444_v4 = vadd.f32 %v5443_v2, %v5442_v54  ;;  %v5478_v59 = vpop.f32.mrb[11].mxu1 }
 0x6c1   :  { %v5479_v5 = vadd.f32 %v5478_v59, %v5477_v46 }
 0x6c2   :  { %v4629_v6 = vadd.f32 %v5444_v4, %v5244_v61 }
 0x6c4   :  { %v4699_v3 = vadd.f32 %v5479_v5, %v4629_v6 }
 0x71f   :  { %v4768_v7 = vpop.f32.mrb[34].mxu0 }
 0x720   :  { %v4769_v8 = vadd.f32 %v4768_v7, %v4699_v3  ;;  %v5562_v10 = vpop.f32.mrb[35].mxu0 }
 0x722   :  { %4773 = vst.msk [vmem:[%s7328_s11] sm:$0xf] %vm4772_vm6, %v4769_v8 }
 0x723   :  { %4778 = vsyncpa [#allocation3], 1 }
 0x724   :  { %4779 = vsyncpa [#allocation5], 1 }
 0x725   :  { %4780 = vsyncpa [#allocation8], 1 }
 0x726   :  { %4781 = vsyncpa [#allocation11], 1 }

</bundles_post_ra>
